<compile_context>
chip_gen: v7x
topology: tpu7x:2x2x1
jax: 0.10.0
libtpu: 0.0.40
codegen_flags: <defaults>
</compile_context>

<pallas_src>
import jax
import jax.numpy as jnp
from jax.experimental import pallas as pl
from jax.experimental.pallas import tpu as pltpu

_HP = 128  # padded per-gate / hidden lane width (one full vreg lane dim)
_BP = 8    # padded batch rows (one full sublane tile)


# ---------------------------------------------------------------------------
# Kernel
# ---------------------------------------------------------------------------
def _gait_kernel(x_ref,                        # (T*BP, HP)  time-major, padded input
                 wih0_ref, whh0_ref, b0_ref,   # (HP,4HP), (HP,4HP), (1,4HP)  LSTM layer 0
                 wih1_ref, whh1_ref, b1_ref,   # (HP,4HP), (HP,4HP), (1,4HP)  LSTM layer 1
                 wf1_ref, bf1_ref,             # (HP,HP), (1,HP)              fc1
                 wf2_ref, bf2_ref,             # (HP,O),  (1,O)               fc2
                 out_ref,                      # (B, O)
                 xp_ref, h0_ref):              # scratch: (T*BP,4HP), (T*BP,HP)
    TB, HP = x_ref.shape
    BP = _BP
    T = TB // BP
    G = 4 * HP

    def gates_to_state(gates, c):
        # Each gate occupies its own full 128-lane vreg -> vreg-aligned slices.
        i = jax.nn.sigmoid(gates[:, 0 * HP:1 * HP])
        f = jax.nn.sigmoid(gates[:, 1 * HP:2 * HP])
        g = jnp.tanh(gates[:, 2 * HP:3 * HP])
        o = jax.nn.sigmoid(gates[:, 3 * HP:4 * HP])
        c_new = f * c + i * g                      # padded lanes stay exactly 0
        h_new = o * jnp.tanh(c_new)
        return h_new, c_new

    zeros = jnp.zeros((BP, HP), jnp.float32)

    # ---- Layer 0: input projection + bias for ALL timesteps (one MXU matmul) ----
    xp_ref[...] = (jnp.dot(x_ref[...], wih0_ref[...],
                           preferred_element_type=jnp.float32)
                   + jnp.broadcast_to(b0_ref[...], (TB, G)))

    # ---- Layer 0 recurrence: only the h @ W_hh^T matmul stays in the loop ----
    def step0(t, carry):
        h, c = carry
        row = pl.multiple_of(t * BP, BP)
        gates = xp_ref[pl.ds(row, BP), :] + jnp.dot(
            h, whh0_ref[...], preferred_element_type=jnp.float32)
        h, c = gates_to_state(gates, c)
        h0_ref[pl.ds(row, BP), :] = h              # stash h0_t for layer-1 projection
        return h, c

    jax.lax.fori_loop(0, T, step0, (zeros, zeros), unroll=True)

    # ---- Layer 1: input projection + bias for ALL timesteps (one MXU matmul) ----
    xp_ref[...] = (jnp.dot(h0_ref[...], wih1_ref[...],
                           preferred_element_type=jnp.float32)
                   + jnp.broadcast_to(b1_ref[...], (TB, G)))

    # ---- Layer 1 recurrence (only the final hidden state is needed) ----
    def step1(t, carry):
        h, c = carry
        row = pl.multiple_of(t * BP, BP)
        gates = xp_ref[pl.ds(row, BP), :] + jnp.dot(
            h, whh1_ref[...], preferred_element_type=jnp.float32)
        return gates_to_state(gates, c)

    h1, _ = jax.lax.fori_loop(0, T, step1, (zeros, zeros), unroll=True)

    # last_output = out[:, -1, :]; dropout in eval mode == identity.
    # TODO(synk): training-mode dropout (random mask) not implemented; eval semantics only.
    z = jnp.dot(h1, wf1_ref[...], preferred_element_type=jnp.float32) + bf1_ref[...]
    z = jnp.maximum(z, 0.0)
    y = jnp.dot(z, wf2_ref[...], preferred_element_type=jnp.float32) + bf2_ref[...]

    out_ref[...] = y[:out_ref.shape[0], :].astype(out_ref.dtype)


# ---------------------------------------------------------------------------
# Wrapper
# ---------------------------------------------------------------------------
def gait_analysis_forward(x, kp):
    """x: (B, T, input_size) float32.  kp: packed/padded kernel params (see _pack_params)."""
    B, T, I = x.shape
    HP, BP = _HP, _BP
    assert B <= BP, "batch must fit one sublane tile"
    O = kp["wf2"].shape[1]

    # Time-major, batch- and feature-padded input, flattened so the layer-0 input
    # projection is a single 2-D MXU matmul.  One DMA, whole-x VMEM residency.
    x_pad = jnp.zeros((T, BP, HP), x.dtype).at[:, :B, :I].set(jnp.transpose(x, (1, 0, 2)))
    x_flat = x_pad.reshape(T * BP, HP)

    full = lambda shape: pl.BlockSpec(shape, lambda i: (0,) * len(shape))

    grid_spec = pltpu.PrefetchScalarGridSpec(
        num_scalar_prefetch=0,
        grid=(1,),                                 # single invocation; recurrence is in-kernel
        in_specs=[
            full((T * BP, HP)),                            # x
            full((HP, 4 * HP)), full((HP, 4 * HP)), full((1, 4 * HP)),   # layer 0
            full((HP, 4 * HP)), full((HP, 4 * HP)), full((1, 4 * HP)),   # layer 1
            full((HP, HP)), full((1, HP)),                 # fc1
            full((HP, O)), full((1, O)),                   # fc2
        ],
        out_specs=pl.BlockSpec((B, O), lambda i: (0, 0)),
        scratch_shapes=[
            pltpu.VMEM((T * BP, 4 * HP), jnp.float32),     # precomputed input projections
            pltpu.VMEM((T * BP, HP), jnp.float32),         # layer-0 hidden states, all t
        ],
    )

    return pl.pallas_call(
        _gait_kernel,
        out_shape=jax.ShapeDtypeStruct((B, O), jnp.float32),
        grid_spec=grid_spec,
        compiler_params=pltpu.CompilerParams(dimension_semantics=("arbitrary",)),
    )(x_flat,
      kp["wih0"], kp["whh0"], kp["b0"],
      kp["wih1"], kp["whh1"], kp["b1"],
      kp["wf1"], kp["bf1"], kp["wf2"], kp["bf2"])


# ---------------------------------------------------------------------------
# Parameter packing (PyTorch layout -> padded, gate-per-vreg kernel layout)
# ---------------------------------------------------------------------------
def _pack_lstm_layer(w_ih, w_hh, b_ih, b_hh, in_size, H):
    """w_ih: (4H, in), w_hh: (4H, H), biases (4H,) in PyTorch [i,f,g,o] order.

    Returns Wih, Whh: (HP, 4*HP) and b: (1, 4*HP) where gate g occupies columns
    [g*HP, g*HP+H); rows [0:in_size] (resp. [0:H]) hold W^T; everything else zero.
    """
    HP = _HP
    Wih = jnp.zeros((HP, 4 * HP), jnp.float32)
    Whh = jnp.zeros((HP, 4 * HP), jnp.float32)
    b = jnp.zeros((1, 4 * HP), jnp.float32)
    for g in range(4):
        Wih = Wih.at[0:in_size, g * HP:g * HP + H].set(w_ih[g * H:(g + 1) * H, :].T)
        Whh = Whh.at[0:H, g * HP:g * HP + H].set(w_hh[g * H:(g + 1) * H, :].T)
        b = b.at[0, g * HP:g * HP + H].set(b_ih[g * H:(g + 1) * H] +
                                           b_hh[g * H:(g + 1) * H])
    return Wih, Whh, b


def _pack_fc(w, b, out_cols):
    """w: (out, in) PyTorch Linear weight -> (HP, out_cols) zero-padded, transposed."""
    out_dim, in_dim = w.shape
    W = jnp.zeros((_HP, out_cols), jnp.float32).at[0:in_dim, 0:out_dim].set(w.T)
    bb = jnp.zeros((1, out_cols), jnp.float32).at[0, 0:out_dim].set(b)
    return W, bb


def _pack_params(raw, input_size, hidden_size, output_size):
    H = hidden_size
    wih0, whh0, b0 = _pack_lstm_layer(raw["w_ih0"], raw["w_hh0"], raw["b_ih0"],
                                      raw["b_hh0"], input_size, H)
    wih1, whh1, b1 = _pack_lstm_layer(raw["w_ih1"], raw["w_hh1"], raw["b_ih1"],
                                      raw["b_hh1"], H, H)
    wf1, bf1 = _pack_fc(raw["w_fc1"], raw["b_fc1"], _HP)           # fc1 output padded to HP
    wf2, bf2 = _pack_fc(raw["w_fc2"], raw["b_fc2"], output_size)   # final O lanes (store runs once)
    return dict(wih0=wih0, whh0=whh0, b0=b0, wih1=wih1, whh1=whh1, b1=b1,
                wf1=wf1, bf1=bf1, wf2=wf2, bf2=bf2)


# ---------------------------------------------------------------------------
# Pure-JAX reference (matches the PyTorch forward in eval mode) and init
# ---------------------------------------------------------------------------
def _reference_forward(x, raw, hidden_size):
    B, T, _ = x.shape
    H = hidden_size

    def cell(x_in, h, c, w_ih, w_hh, b_ih, b_hh):
        gates = x_in @ w_ih.T + h @ w_hh.T + b_ih + b_hh
        i = jax.nn.sigmoid(gates[:, 0 * H:1 * H])
        f = jax.nn.sigmoid(gates[:, 1 * H:2 * H])
        g = jnp.tanh(gates[:, 2 * H:3 * H])
        o = jax.nn.sigmoid(gates[:, 3 * H:4 * H])
        c_new = f * c + i * g
        return o * jnp.tanh(c_new), c_new

    h0 = c0 = h1 = c1 = jnp.zeros((B, H), jnp.float32)
    for t in range(T):
        h0, c0 = cell(x[:, t, :], h0, c0, raw["w_ih0"], raw["w_hh0"], raw["b_ih0"], raw["b_hh0"])
        h1, c1 = cell(h0, h1, c1, raw["w_ih1"], raw["w_hh1"], raw["b_ih1"], raw["b_hh1"])
    z = jnp.maximum(h1 @ raw["w_fc1"].T + raw["b_fc1"], 0.0)
    return z @ raw["w_fc2"].T + raw["b_fc2"]


def _init_raw_params(key, input_size, hidden_size, output_size):
    """Deterministic init (uniform(-1/sqrt(H), 1/sqrt(H)), like PyTorch defaults)."""
    H = hidden_size
    bound = 1.0 / jnp.sqrt(jnp.float32(H))
    keys = jax.random.split(key, 12)
    u = lambda k, shape: jax.random.uniform(k, shape, jnp.float32, -bound, bound)
    return {
        "w_ih0": u(keys[0], (4 * H, input_size)),
        "w_hh0": u(keys[1], (4 * H, H)),
        "b_ih0": u(keys[2], (4 * H,)),
        "b_hh0": u(keys[3], (4 * H,)),
        "w_ih1": u(keys[4], (4 * H, H)),
        "w_hh1": u(keys[5], (4 * H, H)),
        "b_ih1": u(keys[6], (4 * H,)),
        "b_hh1": u(keys[7], (4 * H,)),
        "w_fc1": u(keys[8], (H, H)),
        "b_fc1": u(keys[9], (H,)),
        "w_fc2": u(keys[10], (output_size, H)),
        "b_fc2": u(keys[11], (output_size,)),
    }


if __name__ == "__main__":
    B, T = 2, 8                       # batch, sequence length
    INPUT, HIDDEN, OUTPUT = 8, 32, 8  # num_layers = 2 (layer 0 and 1 handled explicitly)

    key = jax.random.PRNGKey(0)
    k_x, k_p = jax.random.split(key)
    x = jax.random.normal(k_x, (B, T, INPUT), jnp.float32)

    raw = _init_raw_params(k_p, INPUT, HIDDEN, OUTPUT)
    kp = _pack_params(raw, INPUT, HIDDEN, OUTPUT)

    out = jax.block_until_ready(gait_analysis_forward(x, kp))
    ref = _reference_forward(x, raw, HIDDEN)

    assert out.shape == (B, OUTPUT)
    assert jnp.allclose(out, ref, atol=1e-4, rtol=1e-4), "Pallas output mismatch vs reference"

    print("KERNEL_OK")
</pallas_src>

<mosaic_0001>
module attributes {stable_mosaic.version = 11 : i64} {
  func.func @_gait_kernel(%arg0: i32, %arg1: memref<64x128xf32, #tpu.memory_space<vmem>>, %arg2: memref<128x512xf32, #tpu.memory_space<vmem>>, %arg3: memref<128x512xf32, #tpu.memory_space<vmem>>, %arg4: memref<1x512xf32, #tpu.memory_space<vmem>>, %arg5: memref<128x512xf32, #tpu.memory_space<vmem>>, %arg6: memref<128x512xf32, #tpu.memory_space<vmem>>, %arg7: memref<1x512xf32, #tpu.memory_space<vmem>>, %arg8: memref<128x128xf32, #tpu.memory_space<vmem>>, %arg9: memref<1x128xf32, #tpu.memory_space<vmem>>, %arg10: memref<128x8xf32, #tpu.memory_space<vmem>>, %arg11: memref<1x8xf32, #tpu.memory_space<vmem>>, %arg12: memref<2x8xf32, #tpu.memory_space<vmem>>, %arg13: memref<64x512xf32, #tpu.memory_space<vmem>>, %arg14: memref<64x128xf32, #tpu.memory_space<vmem>>) attributes {dimension_semantics = [#tpu.dimension_semantics<arbitrary>], iteration_bounds = array<i64: 1>, scalar_prefetch = 0 : i64, scratch_operands = 2 : i64, tpu.core_type = #tpu.core_type<tc>, window_params = [{pipeline_mode = #tpu.pipeline_mode<synchronous>, transform_indices = @transform_0, window_bounds = array<i64: 64, 128>}, {pipeline_mode = #tpu.pipeline_mode<synchronous>, transform_indices = @transform_1, window_bounds = array<i64: 128, 512>}, {pipeline_mode = #tpu.pipeline_mode<synchronous>, transform_indices = @transform_2, window_bounds = array<i64: 128, 512>}, {pipeline_mode = #tpu.pipeline_mode<synchronous>, transform_indices = @transform_3, window_bounds = array<i64: 1, 512>}, {pipeline_mode = #tpu.pipeline_mode<synchronous>, transform_indices = @transform_4, window_bounds = array<i64: 128, 512>}, {pipeline_mode = #tpu.pipeline_mode<synchronous>, transform_indices = @transform_5, window_bounds = array<i64: 128, 512>}, {pipeline_mode = #tpu.pipeline_mode<synchronous>, transform_indices = @transform_6, window_bounds = array<i64: 1, 512>}, {pipeline_mode = #tpu.pipeline_mode<synchronous>, transform_indices = @transform_7, window_bounds = array<i64: 128, 128>}, {pipeline_mode = #tpu.pipeline_mode<synchronous>, transform_indices = @transform_8, window_bounds = array<i64: 1, 128>}, {pipeline_mode = #tpu.pipeline_mode<synchronous>, transform_indices = @transform_9, window_bounds = array<i64: 128, 8>}, {pipeline_mode = #tpu.pipeline_mode<synchronous>, transform_indices = @transform_10, window_bounds = array<i64: 1, 8>}, {pipeline_mode = #tpu.pipeline_mode<synchronous>, transform_indices = @transform_11, window_bounds = array<i64: 2, 8>}]} {
    %cst = arith.constant 0.000000e+00 : f32
    %0 = vector.broadcast %cst : f32 to vector<8x128xf32>
    %c0 = arith.constant 0 : index
    %c0_0 = arith.constant 0 : index
    %1 = vector.load %arg1[%c0, %c0_0] : memref<64x128xf32, #tpu.memory_space<vmem>>, vector<64x128xf32>
    %c0_1 = arith.constant 0 : index
    %c0_2 = arith.constant 0 : index
    %2 = vector.load %arg2[%c0_1, %c0_2] : memref<128x512xf32, #tpu.memory_space<vmem>>, vector<128x512xf32>
    %cst_3 = arith.constant dense<0.000000e+00> : vector<64x512xf32>
    %3 = tpu.matmul %1, %2, %cst_3 {dimension_numbers = #tpu.dot_dimension_numbers<[1], [0], [0], [1], [0, 0, 1, 1], [], []>} : vector<64x128xf32>, vector<128x512xf32>, vector<64x512xf32> -> vector<64x512xf32>
    %c0_4 = arith.constant 0 : index
    %c0_5 = arith.constant 0 : index
    %4 = vector.load %arg4[%c0_4, %c0_5] : memref<1x512xf32, #tpu.memory_space<vmem>>, vector<1x512xf32>
    %5 = vector.shape_cast %4 : vector<1x512xf32> to vector<1x512xf32>
    %6 = vector.broadcast %5 : vector<1x512xf32> to vector<64x512xf32>
    %7 = arith.addf %3, %6 : vector<64x512xf32>
    %c0_6 = arith.constant 0 : index
    %c0_7 = arith.constant 0 : index
    %8 = vector.load %arg13[%c0_6, %c0_7] : memref<64x512xf32, #tpu.memory_space<vmem>>, vector<64x512xf32>
    tpu.vector_store %arg13[%c0_6, %c0_7], %7 {strides = array<i32>} : memref<64x512xf32, #tpu.memory_space<vmem>>, vector<64x512xf32>,
    %c0_i32 = arith.constant 0 : i32
    %c8_i32 = arith.constant 8 : i32
    %9 = arith.muli %c0_i32, %c8_i32 : i32
    %10 = tpu.assume_multiple %9, 8 : i32
    %11 = arith.index_cast %10 : i32 to index
    %c0_8 = arith.constant 0 : index
    %12 = vector.load %arg13[%11, %c0_8] : memref<64x512xf32, #tpu.memory_space<vmem>>, vector<8x512xf32>
    %c0_9 = arith.constant 0 : index
    %c0_10 = arith.constant 0 : index
    %13 = vector.load %arg3[%c0_9, %c0_10] : memref<128x512xf32, #tpu.memory_space<vmem>>, vector<128x512xf32>
    %cst_11 = arith.constant dense<0.000000e+00> : vector<8x512xf32>
    %14 = tpu.matmul %0, %13, %cst_11 {dimension_numbers = #tpu.dot_dimension_numbers<[1], [0], [0], [1], [0, 0, 1, 1], [], []>} : vector<8x128xf32>, vector<128x512xf32>, vector<8x512xf32> -> vector<8x512xf32>
    %15 = arith.addf %12, %14 : vector<8x512xf32>
    %16 = vector.extract_strided_slice %15 {offsets = [0, 0], sizes = [8, 128], strides = [1, 1]} : vector<8x512xf32> to vector<8x128xf32>
    %17 = arith.negf %16 : vector<8x128xf32>
    %18 = math.exp %17 : vector<8x128xf32>
    %cst_12 = arith.constant 1.000000e+00 : f32
    %19 = vector.broadcast %cst_12 : f32 to vector<8x128xf32>
    %20 = arith.addf %19, %18 : vector<8x128xf32>
    %21 = arith.divf %19, %20 : vector<8x128xf32>
    %22 = vector.extract_strided_slice %15 {offsets = [0, 128], sizes = [8, 128], strides = [1, 1]} : vector<8x512xf32> to vector<8x128xf32>
    %23 = arith.negf %22 : vector<8x128xf32>
    %24 = math.exp %23 : vector<8x128xf32>
    %cst_13 = arith.constant 1.000000e+00 : f32
    %25 = vector.broadcast %cst_13 : f32 to vector<8x128xf32>
    %26 = arith.addf %25, %24 : vector<8x128xf32>
    %27 = arith.divf %25, %26 : vector<8x128xf32>
    %28 = vector.extract_strided_slice %15 {offsets = [0, 256], sizes = [8, 128], strides = [1, 1]} : vector<8x512xf32> to vector<8x128xf32>
    %29 = math.tanh %28 : vector<8x128xf32>
    %30 = vector.extract_strided_slice %15 {offsets = [0, 384], sizes = [8, 128], strides = [1, 1]} : vector<8x512xf32> to vector<8x128xf32>
    %31 = arith.negf %30 : vector<8x128xf32>
    %32 = math.exp %31 : vector<8x128xf32>
    %cst_14 = arith.constant 1.000000e+00 : f32
    %33 = vector.broadcast %cst_14 : f32 to vector<8x128xf32>
    %34 = arith.addf %33, %32 : vector<8x128xf32>
    %35 = arith.divf %33, %34 : vector<8x128xf32>
    %36 = arith.mulf %27, %0 : vector<8x128xf32>
    %37 = arith.mulf %21, %29 : vector<8x128xf32>
    %38 = arith.addf %36, %37 : vector<8x128xf32>
    %39 = math.tanh %38 : vector<8x128xf32>
    %40 = arith.mulf %35, %39 : vector<8x128xf32>
    %41 = arith.index_cast %10 : i32 to index
    %c0_15 = arith.constant 0 : index
    %42 = vector.load %arg14[%41, %c0_15] : memref<64x128xf32, #tpu.memory_space<vmem>>, vector<8x128xf32>
    tpu.vector_store %arg14[%41, %c0_15], %40 {strides = array<i32>} : memref<64x128xf32, #tpu.memory_space<vmem>>, vector<8x128xf32>,
    %c1_i32 = arith.constant 1 : i32
    %c8_i32_16 = arith.constant 8 : i32
    %43 = arith.muli %c1_i32, %c8_i32_16 : i32
    %44 = tpu.assume_multiple %43, 8 : i32
    %45 = arith.index_cast %44 : i32 to index
    %c0_17 = arith.constant 0 : index
    %46 = vector.load %arg13[%45, %c0_17] : memref<64x512xf32, #tpu.memory_space<vmem>>, vector<8x512xf32>
    %c0_18 = arith.constant 0 : index
    %c0_19 = arith.constant 0 : index
    %47 = vector.load %arg3[%c0_18, %c0_19] : memref<128x512xf32, #tpu.memory_space<vmem>>, vector<128x512xf32>
    %cst_20 = arith.constant dense<0.000000e+00> : vector<8x512xf32>
    %48 = tpu.matmul %40, %47, %cst_20 {dimension_numbers = #tpu.dot_dimension_numbers<[1], [0], [0], [1], [0, 0, 1, 1], [], []>} : vector<8x128xf32>, vector<128x512xf32>, vector<8x512xf32> -> vector<8x512xf32>
    %49 = arith.addf %46, %48 : vector<8x512xf32>
    %50 = vector.extract_strided_slice %49 {offsets = [0, 0], sizes = [8, 128], strides = [1, 1]} : vector<8x512xf32> to vector<8x128xf32>
    %51 = arith.negf %50 : vector<8x128xf32>
    %52 = math.exp %51 : vector<8x128xf32>
    %cst_21 = arith.constant 1.000000e+00 : f32
    %53 = vector.broadcast %cst_21 : f32 to vector<8x128xf32>
    %54 = arith.addf %53, %52 : vector<8x128xf32>
    %55 = arith.divf %53, %54 : vector<8x128xf32>
    %56 = vector.extract_strided_slice %49 {offsets = [0, 128], sizes = [8, 128], strides = [1, 1]} : vector<8x512xf32> to vector<8x128xf32>
    %57 = arith.negf %56 : vector<8x128xf32>
    %58 = math.exp %57 : vector<8x128xf32>
    %cst_22 = arith.constant 1.000000e+00 : f32
    %59 = vector.broadcast %cst_22 : f32 to vector<8x128xf32>
    %60 = arith.addf %59, %58 : vector<8x128xf32>
    %61 = arith.divf %59, %60 : vector<8x128xf32>
    %62 = vector.extract_strided_slice %49 {offsets = [0, 256], sizes = [8, 128], strides = [1, 1]} : vector<8x512xf32> to vector<8x128xf32>
    %63 = math.tanh %62 : vector<8x128xf32>
    %64 = vector.extract_strided_slice %49 {offsets = [0, 384], sizes = [8, 128], strides = [1, 1]} : vector<8x512xf32> to vector<8x128xf32>
    %65 = arith.negf %64 : vector<8x128xf32>
    %66 = math.exp %65 : vector<8x128xf32>
    %cst_23 = arith.constant 1.000000e+00 : f32
    %67 = vector.broadcast %cst_23 : f32 to vector<8x128xf32>
    %68 = arith.addf %67, %66 : vector<8x128xf32>
    %69 = arith.divf %67, %68 : vector<8x128xf32>
    %70 = arith.mulf %61, %38 : vector<8x128xf32>
    %71 = arith.mulf %55, %63 : vector<8x128xf32>
    %72 = arith.addf %70, %71 : vector<8x128xf32>
    %73 = math.tanh %72 : vector<8x128xf32>
    %74 = arith.mulf %69, %73 : vector<8x128xf32>
    %75 = arith.index_cast %44 : i32 to index
    %c0_24 = arith.constant 0 : index
    %76 = vector.load %arg14[%75, %c0_24] : memref<64x128xf32, #tpu.memory_space<vmem>>, vector<8x128xf32>
    tpu.vector_store %arg14[%75, %c0_24], %74 {strides = array<i32>} : memref<64x128xf32, #tpu.memory_space<vmem>>, vector<8x128xf32>,
    %c2_i32 = arith.constant 2 : i32
    %c8_i32_25 = arith.constant 8 : i32
    %77 = arith.muli %c2_i32, %c8_i32_25 : i32
    %78 = tpu.assume_multiple %77, 8 : i32
    %79 = arith.index_cast %78 : i32 to index
    %c0_26 = arith.constant 0 : index
    %80 = vector.load %arg13[%79, %c0_26] : memref<64x512xf32, #tpu.memory_space<vmem>>, vector<8x512xf32>
    %c0_27 = arith.constant 0 : index
    %c0_28 = arith.constant 0 : index
    %81 = vector.load %arg3[%c0_27, %c0_28] : memref<128x512xf32, #tpu.memory_space<vmem>>, vector<128x512xf32>
    %cst_29 = arith.constant dense<0.000000e+00> : vector<8x512xf32>
    %82 = tpu.matmul %74, %81, %cst_29 {dimension_numbers = #tpu.dot_dimension_numbers<[1], [0], [0], [1], [0, 0, 1, 1], [], []>} : vector<8x128xf32>, vector<128x512xf32>, vector<8x512xf32> -> vector<8x512xf32>
    %83 = arith.addf %80, %82 : vector<8x512xf32>
    %84 = vector.extract_strided_slice %83 {offsets = [0, 0], sizes = [8, 128], strides = [1, 1]} : vector<8x512xf32> to vector<8x128xf32>
    %85 = arith.negf %84 : vector<8x128xf32>
    %86 = math.exp %85 : vector<8x128xf32>
    %cst_30 = arith.constant 1.000000e+00 : f32
    %87 = vector.broadcast %cst_30 : f32 to vector<8x128xf32>
    %88 = arith.addf %87, %86 : vector<8x128xf32>
    %89 = arith.divf %87, %88 : vector<8x128xf32>
    %90 = vector.extract_strided_slice %83 {offsets = [0, 128], sizes = [8, 128], strides = [1, 1]} : vector<8x512xf32> to vector<8x128xf32>
    %91 = arith.negf %90 : vector<8x128xf32>
    %92 = math.exp %91 : vector<8x128xf32>
    %cst_31 = arith.constant 1.000000e+00 : f32
    %93 = vector.broadcast %cst_31 : f32 to vector<8x128xf32>
    %94 = arith.addf %93, %92 : vector<8x128xf32>
    %95 = arith.divf %93, %94 : vector<8x128xf32>
    %96 = vector.extract_strided_slice %83 {offsets = [0, 256], sizes = [8, 128], strides = [1, 1]} : vector<8x512xf32> to vector<8x128xf32>
    %97 = math.tanh %96 : vector<8x128xf32>
    %98 = vector.extract_strided_slice %83 {offsets = [0, 384], sizes = [8, 128], strides = [1, 1]} : vector<8x512xf32> to vector<8x128xf32>
    %99 = arith.negf %98 : vector<8x128xf32>
    %100 = math.exp %99 : vector<8x128xf32>
    %cst_32 = arith.constant 1.000000e+00 : f32
    %101 = vector.broadcast %cst_32 : f32 to vector<8x128xf32>
    %102 = arith.addf %101, %100 : vector<8x128xf32>
    %103 = arith.divf %101, %102 : vector<8x128xf32>
    %104 = arith.mulf %95, %72 : vector<8x128xf32>
    %105 = arith.mulf %89, %97 : vector<8x128xf32>
    %106 = arith.addf %104, %105 : vector<8x128xf32>
    %107 = math.tanh %106 : vector<8x128xf32>
    %108 = arith.mulf %103, %107 : vector<8x128xf32>
    %109 = arith.index_cast %78 : i32 to index
    %c0_33 = arith.constant 0 : index
    %110 = vector.load %arg14[%109, %c0_33] : memref<64x128xf32, #tpu.memory_space<vmem>>, vector<8x128xf32>
    tpu.vector_store %arg14[%109, %c0_33], %108 {strides = array<i32>} : memref<64x128xf32, #tpu.memory_space<vmem>>, vector<8x128xf32>,
    %c3_i32 = arith.constant 3 : i32
    %c8_i32_34 = arith.constant 8 : i32
    %111 = arith.muli %c3_i32, %c8_i32_34 : i32
    %112 = tpu.assume_multiple %111, 8 : i32
    %113 = arith.index_cast %112 : i32 to index
    %c0_35 = arith.constant 0 : index
    %114 = vector.load %arg13[%113, %c0_35] : memref<64x512xf32, #tpu.memory_space<vmem>>, vector<8x512xf32>
    %c0_36 = arith.constant 0 : index
    %c0_37 = arith.constant 0 : index
    %115 = vector.load %arg3[%c0_36, %c0_37] : memref<128x512xf32, #tpu.memory_space<vmem>>, vector<128x512xf32>
    %cst_38 = arith.constant dense<0.000000e+00> : vector<8x512xf32>
    %116 = tpu.matmul %108, %115, %cst_38 {dimension_numbers = #tpu.dot_dimension_numbers<[1], [0], [0], [1], [0, 0, 1, 1], [], []>} : vector<8x128xf32>, vector<128x512xf32>, vector<8x512xf32> -> vector<8x512xf32>
    %117 = arith.addf %114, %116 : vector<8x512xf32>
    %118 = vector.extract_strided_slice %117 {offsets = [0, 0], sizes = [8, 128], strides = [1, 1]} : vector<8x512xf32> to vector<8x128xf32>
    %119 = arith.negf %118 : vector<8x128xf32>
    %120 = math.exp %119 : vector<8x128xf32>
    %cst_39 = arith.constant 1.000000e+00 : f32
    %121 = vector.broadcast %cst_39 : f32 to vector<8x128xf32>
    %122 = arith.addf %121, %120 : vector<8x128xf32>
    %123 = arith.divf %121, %122 : vector<8x128xf32>
    %124 = vector.extract_strided_slice %117 {offsets = [0, 128], sizes = [8, 128], strides = [1, 1]} : vector<8x512xf32> to vector<8x128xf32>
    %125 = arith.negf %124 : vector<8x128xf32>
    %126 = math.exp %125 : vector<8x128xf32>
    %cst_40 = arith.constant 1.000000e+00 : f32
    %127 = vector.broadcast %cst_40 : f32 to vector<8x128xf32>
    %128 = arith.addf %127, %126 : vector<8x128xf32>
    %129 = arith.divf %127, %128 : vector<8x128xf32>
    %130 = vector.extract_strided_slice %117 {offsets = [0, 256], sizes = [8, 128], strides = [1, 1]} : vector<8x512xf32> to vector<8x128xf32>
    %131 = math.tanh %130 : vector<8x128xf32>
    %132 = vector.extract_strided_slice %117 {offsets = [0, 384], sizes = [8, 128], strides = [1, 1]} : vector<8x512xf32> to vector<8x128xf32>
    %133 = arith.negf %132 : vector<8x128xf32>
    %134 = math.exp %133 : vector<8x128xf32>
    %cst_41 = arith.constant 1.000000e+00 : f32
    %135 = vector.broadcast %cst_41 : f32 to vector<8x128xf32>
    %136 = arith.addf %135, %134 : vector<8x128xf32>
    %137 = arith.divf %135, %136 : vector<8x128xf32>
    %138 = arith.mulf %129, %106 : vector<8x128xf32>
    %139 = arith.mulf %123, %131 : vector<8x128xf32>
    %140 = arith.addf %138, %139 : vector<8x128xf32>
    %141 = math.tanh %140 : vector<8x128xf32>
    %142 = arith.mulf %137, %141 : vector<8x128xf32>
    %143 = arith.index_cast %112 : i32 to index
    %c0_42 = arith.constant 0 : index
    %144 = vector.load %arg14[%143, %c0_42] : memref<64x128xf32, #tpu.memory_space<vmem>>, vector<8x128xf32>
    tpu.vector_store %arg14[%143, %c0_42], %142 {strides = array<i32>} : memref<64x128xf32, #tpu.memory_space<vmem>>, vector<8x128xf32>,
    %c4_i32 = arith.constant 4 : i32
    %c8_i32_43 = arith.constant 8 : i32
    %145 = arith.muli %c4_i32, %c8_i32_43 : i32
    %146 = tpu.assume_multiple %145, 8 : i32
    %147 = arith.index_cast %146 : i32 to index
    %c0_44 = arith.constant 0 : index
    %148 = vector.load %arg13[%147, %c0_44] : memref<64x512xf32, #tpu.memory_space<vmem>>, vector<8x512xf32>
    %c0_45 = arith.constant 0 : index
    %c0_46 = arith.constant 0 : index
    %149 = vector.load %arg3[%c0_45, %c0_46] : memref<128x512xf32, #tpu.memory_space<vmem>>, vector<128x512xf32>
    %cst_47 = arith.constant dense<0.000000e+00> : vector<8x512xf32>
    %150 = tpu.matmul %142, %149, %cst_47 {dimension_numbers = #tpu.dot_dimension_numbers<[1], [0], [0], [1], [0, 0, 1, 1], [], []>} : vector<8x128xf32>, vector<128x512xf32>, vector<8x512xf32> -> vector<8x512xf32>
    %151 = arith.addf %148, %150 : vector<8x512xf32>
    %152 = vector.extract_strided_slice %151 {offsets = [0, 0], sizes = [8, 128], strides = [1, 1]} : vector<8x512xf32> to vector<8x128xf32>
    %153 = arith.negf %152 : vector<8x128xf32>
    %154 = math.exp %153 : vector<8x128xf32>
    %cst_48 = arith.constant 1.000000e+00 : f32
    %155 = vector.broadcast %cst_48 : f32 to vector<8x128xf32>
    %156 = arith.addf %155, %154 : vector<8x128xf32>
    %157 = arith.divf %155, %156 : vector<8x128xf32>
    %158 = vector.extract_strided_slice %151 {offsets = [0, 128], sizes = [8, 128], strides = [1, 1]} : vector<8x512xf32> to vector<8x128xf32>
    %159 = arith.negf %158 : vector<8x128xf32>
    %160 = math.exp %159 : vector<8x128xf32>
    %cst_49 = arith.constant 1.000000e+00 : f32
    %161 = vector.broadcast %cst_49 : f32 to vector<8x128xf32>
    %162 = arith.addf %161, %160 : vector<8x128xf32>
    %163 = arith.divf %161, %162 : vector<8x128xf32>
    %164 = vector.extract_strided_slice %151 {offsets = [0, 256], sizes = [8, 128], strides = [1, 1]} : vector<8x512xf32> to vector<8x128xf32>
    %165 = math.tanh %164 : vector<8x128xf32>
    %166 = vector.extract_strided_slice %151 {offsets = [0, 384], sizes = [8, 128], strides = [1, 1]} : vector<8x512xf32> to vector<8x128xf32>
    %167 = arith.negf %166 : vector<8x128xf32>
    %168 = math.exp %167 : vector<8x128xf32>
    %cst_50 = arith.constant 1.000000e+00 : f32
    %169 = vector.broadcast %cst_50 : f32 to vector<8x128xf32>
    %170 = arith.addf %169, %168 : vector<8x128xf32>
    %171 = arith.divf %169, %170 : vector<8x128xf32>
    %172 = arith.mulf %163, %140 : vector<8x128xf32>
    %173 = arith.mulf %157, %165 : vector<8x128xf32>
    %174 = arith.addf %172, %173 : vector<8x128xf32>
    %175 = math.tanh %174 : vector<8x128xf32>
    %176 = arith.mulf %171, %175 : vector<8x128xf32>
    %177 = arith.index_cast %146 : i32 to index
    %c0_51 = arith.constant 0 : index
    %178 = vector.load %arg14[%177, %c0_51] : memref<64x128xf32, #tpu.memory_space<vmem>>, vector<8x128xf32>
    tpu.vector_store %arg14[%177, %c0_51], %176 {strides = array<i32>} : memref<64x128xf32, #tpu.memory_space<vmem>>, vector<8x128xf32>,
    %c5_i32 = arith.constant 5 : i32
    %c8_i32_52 = arith.constant 8 : i32
    %179 = arith.muli %c5_i32, %c8_i32_52 : i32
    %180 = tpu.assume_multiple %179, 8 : i32
    %181 = arith.index_cast %180 : i32 to index
    %c0_53 = arith.constant 0 : index
    %182 = vector.load %arg13[%181, %c0_53] : memref<64x512xf32, #tpu.memory_space<vmem>>, vector<8x512xf32>
    %c0_54 = arith.constant 0 : index
    %c0_55 = arith.constant 0 : index
    %183 = vector.load %arg3[%c0_54, %c0_55] : memref<128x512xf32, #tpu.memory_space<vmem>>, vector<128x512xf32>
    %cst_56 = arith.constant dense<0.000000e+00> : vector<8x512xf32>
    %184 = tpu.matmul %176, %183, %cst_56 {dimension_numbers = #tpu.dot_dimension_numbers<[1], [0], [0], [1], [0, 0, 1, 1], [], []>} : vector<8x128xf32>, vector<128x512xf32>, vector<8x512xf32> -> vector<8x512xf32>
    %185 = arith.addf %182, %184 : vector<8x512xf32>
    %186 = vector.extract_strided_slice %185 {offsets = [0, 0], sizes = [8, 128], strides = [1, 1]} : vector<8x512xf32> to vector<8x128xf32>
    %187 = arith.negf %186 : vector<8x128xf32>
    %188 = math.exp %187 : vector<8x128xf32>
    %cst_57 = arith.constant 1.000000e+00 : f32
    %189 = vector.broadcast %cst_57 : f32 to vector<8x128xf32>
    %190 = arith.addf %189, %188 : vector<8x128xf32>
    %191 = arith.divf %189, %190 : vector<8x128xf32>
    %192 = vector.extract_strided_slice %185 {offsets = [0, 128], sizes = [8, 128], strides = [1, 1]} : vector<8x512xf32> to vector<8x128xf32>
    %193 = arith.negf %192 : vector<8x128xf32>
    %194 = math.exp %193 : vector<8x128xf32>
    %cst_58 = arith.constant 1.000000e+00 : f32
    %195 = vector.broadcast %cst_58 : f32 to vector<8x128xf32>
    %196 = arith.addf %195, %194 : vector<8x128xf32>
    %197 = arith.divf %195, %196 : vector<8x128xf32>
    %198 = vector.extract_strided_slice %185 {offsets = [0, 256], sizes = [8, 128], strides = [1, 1]} : vector<8x512xf32> to vector<8x128xf32>
    %199 = math.tanh %198 : vector<8x128xf32>
    %200 = vector.extract_strided_slice %185 {offsets = [0, 384], sizes = [8, 128], strides = [1, 1]} : vector<8x512xf32> to vector<8x128xf32>
    %201 = arith.negf %200 : vector<8x128xf32>
    %202 = math.exp %201 : vector<8x128xf32>
    %cst_59 = arith.constant 1.000000e+00 : f32
    %203 = vector.broadcast %cst_59 : f32 to vector<8x128xf32>
    %204 = arith.addf %203, %202 : vector<8x128xf32>
    %205 = arith.divf %203, %204 : vector<8x128xf32>
    %206 = arith.mulf %197, %174 : vector<8x128xf32>
    %207 = arith.mulf %191, %199 : vector<8x128xf32>
    %208 = arith.addf %206, %207 : vector<8x128xf32>
    %209 = math.tanh %208 : vector<8x128xf32>
    %210 = arith.mulf %205, %209 : vector<8x128xf32>
    %211 = arith.index_cast %180 : i32 to index
    %c0_60 = arith.constant 0 : index
    %212 = vector.load %arg14[%211, %c0_60] : memref<64x128xf32, #tpu.memory_space<vmem>>, vector<8x128xf32>
    tpu.vector_store %arg14[%211, %c0_60], %210 {strides = array<i32>} : memref<64x128xf32, #tpu.memory_space<vmem>>, vector<8x128xf32>,
    %c6_i32 = arith.constant 6 : i32
    %c8_i32_61 = arith.constant 8 : i32
    %213 = arith.muli %c6_i32, %c8_i32_61 : i32
    %214 = tpu.assume_multiple %213, 8 : i32
    %215 = arith.index_cast %214 : i32 to index
    %c0_62 = arith.constant 0 : index
    %216 = vector.load %arg13[%215, %c0_62] : memref<64x512xf32, #tpu.memory_space<vmem>>, vector<8x512xf32>
    %c0_63 = arith.constant 0 : index
    %c0_64 = arith.constant 0 : index
    %217 = vector.load %arg3[%c0_63, %c0_64] : memref<128x512xf32, #tpu.memory_space<vmem>>, vector<128x512xf32>
    %cst_65 = arith.constant dense<0.000000e+00> : vector<8x512xf32>
    %218 = tpu.matmul %210, %217, %cst_65 {dimension_numbers = #tpu.dot_dimension_numbers<[1], [0], [0], [1], [0, 0, 1, 1], [], []>} : vector<8x128xf32>, vector<128x512xf32>, vector<8x512xf32> -> vector<8x512xf32>
    %219 = arith.addf %216, %218 : vector<8x512xf32>
    %220 = vector.extract_strided_slice %219 {offsets = [0, 0], sizes = [8, 128], strides = [1, 1]} : vector<8x512xf32> to vector<8x128xf32>
    %221 = arith.negf %220 : vector<8x128xf32>
    %222 = math.exp %221 : vector<8x128xf32>
    %cst_66 = arith.constant 1.000000e+00 : f32
    %223 = vector.broadcast %cst_66 : f32 to vector<8x128xf32>
    %224 = arith.addf %223, %222 : vector<8x128xf32>
    %225 = arith.divf %223, %224 : vector<8x128xf32>
    %226 = vector.extract_strided_slice %219 {offsets = [0, 128], sizes = [8, 128], strides = [1, 1]} : vector<8x512xf32> to vector<8x128xf32>
    %227 = arith.negf %226 : vector<8x128xf32>
    %228 = math.exp %227 : vector<8x128xf32>
    %cst_67 = arith.constant 1.000000e+00 : f32
    %229 = vector.broadcast %cst_67 : f32 to vector<8x128xf32>
    %230 = arith.addf %229, %228 : vector<8x128xf32>
    %231 = arith.divf %229, %230 : vector<8x128xf32>
    %232 = vector.extract_strided_slice %219 {offsets = [0, 256], sizes = [8, 128], strides = [1, 1]} : vector<8x512xf32> to vector<8x128xf32>
    %233 = math.tanh %232 : vector<8x128xf32>
    %234 = vector.extract_strided_slice %219 {offsets = [0, 384], sizes = [8, 128], strides = [1, 1]} : vector<8x512xf32> to vector<8x128xf32>
    %235 = arith.negf %234 : vector<8x128xf32>
    %236 = math.exp %235 : vector<8x128xf32>
    %cst_68 = arith.constant 1.000000e+00 : f32
    %237 = vector.broadcast %cst_68 : f32 to vector<8x128xf32>
    %238 = arith.addf %237, %236 : vector<8x128xf32>
    %239 = arith.divf %237, %238 : vector<8x128xf32>
    %240 = arith.mulf %231, %208 : vector<8x128xf32>
    %241 = arith.mulf %225, %233 : vector<8x128xf32>
    %242 = arith.addf %240, %241 : vector<8x128xf32>
    %243 = math.tanh %242 : vector<8x128xf32>
    %244 = arith.mulf %239, %243 : vector<8x128xf32>
    %245 = arith.index_cast %214 : i32 to index
    %c0_69 = arith.constant 0 : index
    %246 = vector.load %arg14[%245, %c0_69] : memref<64x128xf32, #tpu.memory_space<vmem>>, vector<8x128xf32>
    tpu.vector_store %arg14[%245, %c0_69], %244 {strides = array<i32>} : memref<64x128xf32, #tpu.memory_space<vmem>>, vector<8x128xf32>,
    %c7_i32 = arith.constant 7 : i32
    %c8_i32_70 = arith.constant 8 : i32
    %247 = arith.muli %c7_i32, %c8_i32_70 : i32
    %248 = tpu.assume_multiple %247, 8 : i32
    %249 = arith.index_cast %248 : i32 to index
    %c0_71 = arith.constant 0 : index
    %250 = vector.load %arg13[%249, %c0_71] : memref<64x512xf32, #tpu.memory_space<vmem>>, vector<8x512xf32>
    %c0_72 = arith.constant 0 : index
    %c0_73 = arith.constant 0 : index
    %251 = vector.load %arg3[%c0_72, %c0_73] : memref<128x512xf32, #tpu.memory_space<vmem>>, vector<128x512xf32>
    %cst_74 = arith.constant dense<0.000000e+00> : vector<8x512xf32>
    %252 = tpu.matmul %244, %251, %cst_74 {dimension_numbers = #tpu.dot_dimension_numbers<[1], [0], [0], [1], [0, 0, 1, 1], [], []>} : vector<8x128xf32>, vector<128x512xf32>, vector<8x512xf32> -> vector<8x512xf32>
    %253 = arith.addf %250, %252 : vector<8x512xf32>
    %254 = vector.extract_strided_slice %253 {offsets = [0, 0], sizes = [8, 128], strides = [1, 1]} : vector<8x512xf32> to vector<8x128xf32>
    %255 = arith.negf %254 : vector<8x128xf32>
    %256 = math.exp %255 : vector<8x128xf32>
    %cst_75 = arith.constant 1.000000e+00 : f32
    %257 = vector.broadcast %cst_75 : f32 to vector<8x128xf32>
    %258 = arith.addf %257, %256 : vector<8x128xf32>
    %259 = arith.divf %257, %258 : vector<8x128xf32>
    %260 = vector.extract_strided_slice %253 {offsets = [0, 128], sizes = [8, 128], strides = [1, 1]} : vector<8x512xf32> to vector<8x128xf32>
    %261 = arith.negf %260 : vector<8x128xf32>
    %262 = math.exp %261 : vector<8x128xf32>
    %cst_76 = arith.constant 1.000000e+00 : f32
    %263 = vector.broadcast %cst_76 : f32 to vector<8x128xf32>
    %264 = arith.addf %263, %262 : vector<8x128xf32>
    %265 = arith.divf %263, %264 : vector<8x128xf32>
    %266 = vector.extract_strided_slice %253 {offsets = [0, 256], sizes = [8, 128], strides = [1, 1]} : vector<8x512xf32> to vector<8x128xf32>
    %267 = math.tanh %266 : vector<8x128xf32>
    %268 = vector.extract_strided_slice %253 {offsets = [0, 384], sizes = [8, 128], strides = [1, 1]} : vector<8x512xf32> to vector<8x128xf32>
    %269 = arith.negf %268 : vector<8x128xf32>
    %270 = math.exp %269 : vector<8x128xf32>
    %cst_77 = arith.constant 1.000000e+00 : f32
    %271 = vector.broadcast %cst_77 : f32 to vector<8x128xf32>
    %272 = arith.addf %271, %270 : vector<8x128xf32>
    %273 = arith.divf %271, %272 : vector<8x128xf32>
    %274 = arith.mulf %265, %242 : vector<8x128xf32>
    %275 = arith.mulf %259, %267 : vector<8x128xf32>
    %276 = arith.addf %274, %275 : vector<8x128xf32>
    %277 = math.tanh %276 : vector<8x128xf32>
    %278 = arith.mulf %273, %277 : vector<8x128xf32>
    %279 = arith.index_cast %248 : i32 to index
    %c0_78 = arith.constant 0 : index
    %280 = vector.load %arg14[%279, %c0_78] : memref<64x128xf32, #tpu.memory_space<vmem>>, vector<8x128xf32>
    tpu.vector_store %arg14[%279, %c0_78], %278 {strides = array<i32>} : memref<64x128xf32, #tpu.memory_space<vmem>>, vector<8x128xf32>,
    %c8_i32_79 = arith.constant 8 : i32
    %c0_80 = arith.constant 0 : index
    %c0_81 = arith.constant 0 : index
    %281 = vector.load %arg14[%c0_80, %c0_81] : memref<64x128xf32, #tpu.memory_space<vmem>>, vector<64x128xf32>
    %c0_82 = arith.constant 0 : index
    %c0_83 = arith.constant 0 : index
    %282 = vector.load %arg5[%c0_82, %c0_83] : memref<128x512xf32, #tpu.memory_space<vmem>>, vector<128x512xf32>
    %cst_84 = arith.constant dense<0.000000e+00> : vector<64x512xf32>
    %283 = tpu.matmul %281, %282, %cst_84 {dimension_numbers = #tpu.dot_dimension_numbers<[1], [0], [0], [1], [0, 0, 1, 1], [], []>} : vector<64x128xf32>, vector<128x512xf32>, vector<64x512xf32> -> vector<64x512xf32>
    %c0_85 = arith.constant 0 : index
    %c0_86 = arith.constant 0 : index
    %284 = vector.load %arg7[%c0_85, %c0_86] : memref<1x512xf32, #tpu.memory_space<vmem>>, vector<1x512xf32>
    %285 = vector.shape_cast %284 : vector<1x512xf32> to vector<1x512xf32>
    %286 = vector.broadcast %285 : vector<1x512xf32> to vector<64x512xf32>
    %287 = arith.addf %283, %286 : vector<64x512xf32>
    %c0_87 = arith.constant 0 : index
    %c0_88 = arith.constant 0 : index
    %288 = vector.load %arg13[%c0_87, %c0_88] : memref<64x512xf32, #tpu.memory_space<vmem>>, vector<64x512xf32>
    tpu.vector_store %arg13[%c0_87, %c0_88], %287 {strides = array<i32>} : memref<64x512xf32, #tpu.memory_space<vmem>>, vector<64x512xf32>,
    %c0_i32_89 = arith.constant 0 : i32
    %c8_i32_90 = arith.constant 8 : i32
    %289 = arith.muli %c0_i32_89, %c8_i32_90 : i32
    %290 = tpu.assume_multiple %289, 8 : i32
    %291 = arith.index_cast %290 : i32 to index
    %c0_91 = arith.constant 0 : index
    %292 = vector.load %arg13[%291, %c0_91] : memref<64x512xf32, #tpu.memory_space<vmem>>, vector<8x512xf32>
    %c0_92 = arith.constant 0 : index
    %c0_93 = arith.constant 0 : index
    %293 = vector.load %arg6[%c0_92, %c0_93] : memref<128x512xf32, #tpu.memory_space<vmem>>, vector<128x512xf32>
    %cst_94 = arith.constant dense<0.000000e+00> : vector<8x512xf32>
    %294 = tpu.matmul %0, %293, %cst_94 {dimension_numbers = #tpu.dot_dimension_numbers<[1], [0], [0], [1], [0, 0, 1, 1], [], []>} : vector<8x128xf32>, vector<128x512xf32>, vector<8x512xf32> -> vector<8x512xf32>
    %295 = arith.addf %292, %294 : vector<8x512xf32>
    %296 = vector.extract_strided_slice %295 {offsets = [0, 0], sizes = [8, 128], strides = [1, 1]} : vector<8x512xf32> to vector<8x128xf32>
    %297 = arith.negf %296 : vector<8x128xf32>
    %298 = math.exp %297 : vector<8x128xf32>
    %cst_95 = arith.constant 1.000000e+00 : f32
    %299 = vector.broadcast %cst_95 : f32 to vector<8x128xf32>
    %300 = arith.addf %299, %298 : vector<8x128xf32>
    %301 = arith.divf %299, %300 : vector<8x128xf32>
    %302 = vector.extract_strided_slice %295 {offsets = [0, 128], sizes = [8, 128], strides = [1, 1]} : vector<8x512xf32> to vector<8x128xf32>
    %303 = arith.negf %302 : vector<8x128xf32>
    %304 = math.exp %303 : vector<8x128xf32>
    %cst_96 = arith.constant 1.000000e+00 : f32
    %305 = vector.broadcast %cst_96 : f32 to vector<8x128xf32>
    %306 = arith.addf %305, %304 : vector<8x128xf32>
    %307 = arith.divf %305, %306 : vector<8x128xf32>
    %308 = vector.extract_strided_slice %295 {offsets = [0, 256], sizes = [8, 128], strides = [1, 1]} : vector<8x512xf32> to vector<8x128xf32>
    %309 = math.tanh %308 : vector<8x128xf32>
    %310 = vector.extract_strided_slice %295 {offsets = [0, 384], sizes = [8, 128], strides = [1, 1]} : vector<8x512xf32> to vector<8x128xf32>
    %311 = arith.negf %310 : vector<8x128xf32>
    %312 = math.exp %311 : vector<8x128xf32>
    %cst_97 = arith.constant 1.000000e+00 : f32
    %313 = vector.broadcast %cst_97 : f32 to vector<8x128xf32>
    %314 = arith.addf %313, %312 : vector<8x128xf32>
    %315 = arith.divf %313, %314 : vector<8x128xf32>
    %316 = arith.mulf %307, %0 : vector<8x128xf32>
    %317 = arith.mulf %301, %309 : vector<8x128xf32>
    %318 = arith.addf %316, %317 : vector<8x128xf32>
    %319 = math.tanh %318 : vector<8x128xf32>
    %320 = arith.mulf %315, %319 : vector<8x128xf32>
    %c1_i32_98 = arith.constant 1 : i32
    %c8_i32_99 = arith.constant 8 : i32
    %321 = arith.muli %c1_i32_98, %c8_i32_99 : i32
    %322 = tpu.assume_multiple %321, 8 : i32
    %323 = arith.index_cast %322 : i32 to index
    %c0_100 = arith.constant 0 : index
    %324 = vector.load %arg13[%323, %c0_100] : memref<64x512xf32, #tpu.memory_space<vmem>>, vector<8x512xf32>
    %c0_101 = arith.constant 0 : index
    %c0_102 = arith.constant 0 : index
    %325 = vector.load %arg6[%c0_101, %c0_102] : memref<128x512xf32, #tpu.memory_space<vmem>>, vector<128x512xf32>
    %cst_103 = arith.constant dense<0.000000e+00> : vector<8x512xf32>
    %326 = tpu.matmul %320, %325, %cst_103 {dimension_numbers = #tpu.dot_dimension_numbers<[1], [0], [0], [1], [0, 0, 1, 1], [], []>} : vector<8x128xf32>, vector<128x512xf32>, vector<8x512xf32> -> vector<8x512xf32>
    %327 = arith.addf %324, %326 : vector<8x512xf32>
    %328 = vector.extract_strided_slice %327 {offsets = [0, 0], sizes = [8, 128], strides = [1, 1]} : vector<8x512xf32> to vector<8x128xf32>
    %329 = arith.negf %328 : vector<8x128xf32>
    %330 = math.exp %329 : vector<8x128xf32>
    %cst_104 = arith.constant 1.000000e+00 : f32
    %331 = vector.broadcast %cst_104 : f32 to vector<8x128xf32>
    %332 = arith.addf %331, %330 : vector<8x128xf32>
    %333 = arith.divf %331, %332 : vector<8x128xf32>
    %334 = vector.extract_strided_slice %327 {offsets = [0, 128], sizes = [8, 128], strides = [1, 1]} : vector<8x512xf32> to vector<8x128xf32>
    %335 = arith.negf %334 : vector<8x128xf32>
    %336 = math.exp %335 : vector<8x128xf32>
    %cst_105 = arith.constant 1.000000e+00 : f32
    %337 = vector.broadcast %cst_105 : f32 to vector<8x128xf32>
    %338 = arith.addf %337, %336 : vector<8x128xf32>
    %339 = arith.divf %337, %338 : vector<8x128xf32>
    %340 = vector.extract_strided_slice %327 {offsets = [0, 256], sizes = [8, 128], strides = [1, 1]} : vector<8x512xf32> to vector<8x128xf32>
    %341 = math.tanh %340 : vector<8x128xf32>
    %342 = vector.extract_strided_slice %327 {offsets = [0, 384], sizes = [8, 128], strides = [1, 1]} : vector<8x512xf32> to vector<8x128xf32>
    %343 = arith.negf %342 : vector<8x128xf32>
    %344 = math.exp %343 : vector<8x128xf32>
    %cst_106 = arith.constant 1.000000e+00 : f32
    %345 = vector.broadcast %cst_106 : f32 to vector<8x128xf32>
    %346 = arith.addf %345, %344 : vector<8x128xf32>
    %347 = arith.divf %345, %346 : vector<8x128xf32>
    %348 = arith.mulf %339, %318 : vector<8x128xf32>
    %349 = arith.mulf %333, %341 : vector<8x128xf32>
    %350 = arith.addf %348, %349 : vector<8x128xf32>
    %351 = math.tanh %350 : vector<8x128xf32>
    %352 = arith.mulf %347, %351 : vector<8x128xf32>
    %c2_i32_107 = arith.constant 2 : i32
    %c8_i32_108 = arith.constant 8 : i32
    %353 = arith.muli %c2_i32_107, %c8_i32_108 : i32
    %354 = tpu.assume_multiple %353, 8 : i32
    %355 = arith.index_cast %354 : i32 to index
    %c0_109 = arith.constant 0 : index
    %356 = vector.load %arg13[%355, %c0_109] : memref<64x512xf32, #tpu.memory_space<vmem>>, vector<8x512xf32>
    %c0_110 = arith.constant 0 : index
    %c0_111 = arith.constant 0 : index
    %357 = vector.load %arg6[%c0_110, %c0_111] : memref<128x512xf32, #tpu.memory_space<vmem>>, vector<128x512xf32>
    %cst_112 = arith.constant dense<0.000000e+00> : vector<8x512xf32>
    %358 = tpu.matmul %352, %357, %cst_112 {dimension_numbers = #tpu.dot_dimension_numbers<[1], [0], [0], [1], [0, 0, 1, 1], [], []>} : vector<8x128xf32>, vector<128x512xf32>, vector<8x512xf32> -> vector<8x512xf32>
    %359 = arith.addf %356, %358 : vector<8x512xf32>
    %360 = vector.extract_strided_slice %359 {offsets = [0, 0], sizes = [8, 128], strides = [1, 1]} : vector<8x512xf32> to vector<8x128xf32>
    %361 = arith.negf %360 : vector<8x128xf32>
    %362 = math.exp %361 : vector<8x128xf32>
    %cst_113 = arith.constant 1.000000e+00 : f32
    %363 = vector.broadcast %cst_113 : f32 to vector<8x128xf32>
    %364 = arith.addf %363, %362 : vector<8x128xf32>
    %365 = arith.divf %363, %364 : vector<8x128xf32>
    %366 = vector.extract_strided_slice %359 {offsets = [0, 128], sizes = [8, 128], strides = [1, 1]} : vector<8x512xf32> to vector<8x128xf32>
    %367 = arith.negf %366 : vector<8x128xf32>
    %368 = math.exp %367 : vector<8x128xf32>
    %cst_114 = arith.constant 1.000000e+00 : f32
    %369 = vector.broadcast %cst_114 : f32 to vector<8x128xf32>
    %370 = arith.addf %369, %368 : vector<8x128xf32>
    %371 = arith.divf %369, %370 : vector<8x128xf32>
    %372 = vector.extract_strided_slice %359 {offsets = [0, 256], sizes = [8, 128], strides = [1, 1]} : vector<8x512xf32> to vector<8x128xf32>
    %373 = math.tanh %372 : vector<8x128xf32>
    %374 = vector.extract_strided_slice %359 {offsets = [0, 384], sizes = [8, 128], strides = [1, 1]} : vector<8x512xf32> to vector<8x128xf32>
    %375 = arith.negf %374 : vector<8x128xf32>
    %376 = math.exp %375 : vector<8x128xf32>
    %cst_115 = arith.constant 1.000000e+00 : f32
    %377 = vector.broadcast %cst_115 : f32 to vector<8x128xf32>
    %378 = arith.addf %377, %376 : vector<8x128xf32>
    %379 = arith.divf %377, %378 : vector<8x128xf32>
    %380 = arith.mulf %371, %350 : vector<8x128xf32>
    %381 = arith.mulf %365, %373 : vector<8x128xf32>
    %382 = arith.addf %380, %381 : vector<8x128xf32>
    %383 = math.tanh %382 : vector<8x128xf32>
    %384 = arith.mulf %379, %383 : vector<8x128xf32>
    %c3_i32_116 = arith.constant 3 : i32
    %c8_i32_117 = arith.constant 8 : i32
    %385 = arith.muli %c3_i32_116, %c8_i32_117 : i32
    %386 = tpu.assume_multiple %385, 8 : i32
    %387 = arith.index_cast %386 : i32 to index
    %c0_118 = arith.constant 0 : index
    %388 = vector.load %arg13[%387, %c0_118] : memref<64x512xf32, #tpu.memory_space<vmem>>, vector<8x512xf32>
    %c0_119 = arith.constant 0 : index
    %c0_120 = arith.constant 0 : index
    %389 = vector.load %arg6[%c0_119, %c0_120] : memref<128x512xf32, #tpu.memory_space<vmem>>, vector<128x512xf32>
    %cst_121 = arith.constant dense<0.000000e+00> : vector<8x512xf32>
    %390 = tpu.matmul %384, %389, %cst_121 {dimension_numbers = #tpu.dot_dimension_numbers<[1], [0], [0], [1], [0, 0, 1, 1], [], []>} : vector<8x128xf32>, vector<128x512xf32>, vector<8x512xf32> -> vector<8x512xf32>
    %391 = arith.addf %388, %390 : vector<8x512xf32>
    %392 = vector.extract_strided_slice %391 {offsets = [0, 0], sizes = [8, 128], strides = [1, 1]} : vector<8x512xf32> to vector<8x128xf32>
    %393 = arith.negf %392 : vector<8x128xf32>
    %394 = math.exp %393 : vector<8x128xf32>
    %cst_122 = arith.constant 1.000000e+00 : f32
    %395 = vector.broadcast %cst_122 : f32 to vector<8x128xf32>
    %396 = arith.addf %395, %394 : vector<8x128xf32>
    %397 = arith.divf %395, %396 : vector<8x128xf32>
    %398 = vector.extract_strided_slice %391 {offsets = [0, 128], sizes = [8, 128], strides = [1, 1]} : vector<8x512xf32> to vector<8x128xf32>
    %399 = arith.negf %398 : vector<8x128xf32>
    %400 = math.exp %399 : vector<8x128xf32>
    %cst_123 = arith.constant 1.000000e+00 : f32
    %401 = vector.broadcast %cst_123 : f32 to vector<8x128xf32>
    %402 = arith.addf %401, %400 : vector<8x128xf32>
    %403 = arith.divf %401, %402 : vector<8x128xf32>
    %404 = vector.extract_strided_slice %391 {offsets = [0, 256], sizes = [8, 128], strides = [1, 1]} : vector<8x512xf32> to vector<8x128xf32>
    %405 = math.tanh %404 : vector<8x128xf32>
    %406 = vector.extract_strided_slice %391 {offsets = [0, 384], sizes = [8, 128], strides = [1, 1]} : vector<8x512xf32> to vector<8x128xf32>
    %407 = arith.negf %406 : vector<8x128xf32>
    %408 = math.exp %407 : vector<8x128xf32>
    %cst_124 = arith.constant 1.000000e+00 : f32
    %409 = vector.broadcast %cst_124 : f32 to vector<8x128xf32>
    %410 = arith.addf %409, %408 : vector<8x128xf32>
    %411 = arith.divf %409, %410 : vector<8x128xf32>
    %412 = arith.mulf %403, %382 : vector<8x128xf32>
    %413 = arith.mulf %397, %405 : vector<8x128xf32>
    %414 = arith.addf %412, %413 : vector<8x128xf32>
    %415 = math.tanh %414 : vector<8x128xf32>
    %416 = arith.mulf %411, %415 : vector<8x128xf32>
    %c4_i32_125 = arith.constant 4 : i32
    %c8_i32_126 = arith.constant 8 : i32
    %417 = arith.muli %c4_i32_125, %c8_i32_126 : i32
    %418 = tpu.assume_multiple %417, 8 : i32
    %419 = arith.index_cast %418 : i32 to index
    %c0_127 = arith.constant 0 : index
    %420 = vector.load %arg13[%419, %c0_127] : memref<64x512xf32, #tpu.memory_space<vmem>>, vector<8x512xf32>
    %c0_128 = arith.constant 0 : index
    %c0_129 = arith.constant 0 : index
    %421 = vector.load %arg6[%c0_128, %c0_129] : memref<128x512xf32, #tpu.memory_space<vmem>>, vector<128x512xf32>
    %cst_130 = arith.constant dense<0.000000e+00> : vector<8x512xf32>
    %422 = tpu.matmul %416, %421, %cst_130 {dimension_numbers = #tpu.dot_dimension_numbers<[1], [0], [0], [1], [0, 0, 1, 1], [], []>} : vector<8x128xf32>, vector<128x512xf32>, vector<8x512xf32> -> vector<8x512xf32>
    %423 = arith.addf %420, %422 : vector<8x512xf32>
    %424 = vector.extract_strided_slice %423 {offsets = [0, 0], sizes = [8, 128], strides = [1, 1]} : vector<8x512xf32> to vector<8x128xf32>
    %425 = arith.negf %424 : vector<8x128xf32>
    %426 = math.exp %425 : vector<8x128xf32>
    %cst_131 = arith.constant 1.000000e+00 : f32
    %427 = vector.broadcast %cst_131 : f32 to vector<8x128xf32>
    %428 = arith.addf %427, %426 : vector<8x128xf32>
    %429 = arith.divf %427, %428 : vector<8x128xf32>
    %430 = vector.extract_strided_slice %423 {offsets = [0, 128], sizes = [8, 128], strides = [1, 1]} : vector<8x512xf32> to vector<8x128xf32>
    %431 = arith.negf %430 : vector<8x128xf32>
    %432 = math.exp %431 : vector<8x128xf32>
    %cst_132 = arith.constant 1.000000e+00 : f32
    %433 = vector.broadcast %cst_132 : f32 to vector<8x128xf32>
    %434 = arith.addf %433, %432 : vector<8x128xf32>
    %435 = arith.divf %433, %434 : vector<8x128xf32>
    %436 = vector.extract_strided_slice %423 {offsets = [0, 256], sizes = [8, 128], strides = [1, 1]} : vector<8x512xf32> to vector<8x128xf32>
    %437 = math.tanh %436 : vector<8x128xf32>
    %438 = vector.extract_strided_slice %423 {offsets = [0, 384], sizes = [8, 128], strides = [1, 1]} : vector<8x512xf32> to vector<8x128xf32>
    %439 = arith.negf %438 : vector<8x128xf32>
    %440 = math.exp %439 : vector<8x128xf32>
    %cst_133 = arith.constant 1.000000e+00 : f32
    %441 = vector.broadcast %cst_133 : f32 to vector<8x128xf32>
    %442 = arith.addf %441, %440 : vector<8x128xf32>
    %443 = arith.divf %441, %442 : vector<8x128xf32>
    %444 = arith.mulf %435, %414 : vector<8x128xf32>
    %445 = arith.mulf %429, %437 : vector<8x128xf32>
    %446 = arith.addf %444, %445 : vector<8x128xf32>
    %447 = math.tanh %446 : vector<8x128xf32>
    %448 = arith.mulf %443, %447 : vector<8x128xf32>
    %c5_i32_134 = arith.constant 5 : i32
    %c8_i32_135 = arith.constant 8 : i32
    %449 = arith.muli %c5_i32_134, %c8_i32_135 : i32
    %450 = tpu.assume_multiple %449, 8 : i32
    %451 = arith.index_cast %450 : i32 to index
    %c0_136 = arith.constant 0 : index
    %452 = vector.load %arg13[%451, %c0_136] : memref<64x512xf32, #tpu.memory_space<vmem>>, vector<8x512xf32>
    %c0_137 = arith.constant 0 : index
    %c0_138 = arith.constant 0 : index
    %453 = vector.load %arg6[%c0_137, %c0_138] : memref<128x512xf32, #tpu.memory_space<vmem>>, vector<128x512xf32>
    %cst_139 = arith.constant dense<0.000000e+00> : vector<8x512xf32>
    %454 = tpu.matmul %448, %453, %cst_139 {dimension_numbers = #tpu.dot_dimension_numbers<[1], [0], [0], [1], [0, 0, 1, 1], [], []>} : vector<8x128xf32>, vector<128x512xf32>, vector<8x512xf32> -> vector<8x512xf32>
    %455 = arith.addf %452, %454 : vector<8x512xf32>
    %456 = vector.extract_strided_slice %455 {offsets = [0, 0], sizes = [8, 128], strides = [1, 1]} : vector<8x512xf32> to vector<8x128xf32>
    %457 = arith.negf %456 : vector<8x128xf32>
    %458 = math.exp %457 : vector<8x128xf32>
    %cst_140 = arith.constant 1.000000e+00 : f32
    %459 = vector.broadcast %cst_140 : f32 to vector<8x128xf32>
    %460 = arith.addf %459, %458 : vector<8x128xf32>
    %461 = arith.divf %459, %460 : vector<8x128xf32>
    %462 = vector.extract_strided_slice %455 {offsets = [0, 128], sizes = [8, 128], strides = [1, 1]} : vector<8x512xf32> to vector<8x128xf32>
    %463 = arith.negf %462 : vector<8x128xf32>
    %464 = math.exp %463 : vector<8x128xf32>
    %cst_141 = arith.constant 1.000000e+00 : f32
    %465 = vector.broadcast %cst_141 : f32 to vector<8x128xf32>
    %466 = arith.addf %465, %464 : vector<8x128xf32>
    %467 = arith.divf %465, %466 : vector<8x128xf32>
    %468 = vector.extract_strided_slice %455 {offsets = [0, 256], sizes = [8, 128], strides = [1, 1]} : vector<8x512xf32> to vector<8x128xf32>
    %469 = math.tanh %468 : vector<8x128xf32>
    %470 = vector.extract_strided_slice %455 {offsets = [0, 384], sizes = [8, 128], strides = [1, 1]} : vector<8x512xf32> to vector<8x128xf32>
    %471 = arith.negf %470 : vector<8x128xf32>
    %472 = math.exp %471 : vector<8x128xf32>
    %cst_142 = arith.constant 1.000000e+00 : f32
    %473 = vector.broadcast %cst_142 : f32 to vector<8x128xf32>
    %474 = arith.addf %473, %472 : vector<8x128xf32>
    %475 = arith.divf %473, %474 : vector<8x128xf32>
    %476 = arith.mulf %467, %446 : vector<8x128xf32>
    %477 = arith.mulf %461, %469 : vector<8x128xf32>
    %478 = arith.addf %476, %477 : vector<8x128xf32>
    %479 = math.tanh %478 : vector<8x128xf32>
    %480 = arith.mulf %475, %479 : vector<8x128xf32>
    %c6_i32_143 = arith.constant 6 : i32
    %c8_i32_144 = arith.constant 8 : i32
    %481 = arith.muli %c6_i32_143, %c8_i32_144 : i32
    %482 = tpu.assume_multiple %481, 8 : i32
    %483 = arith.index_cast %482 : i32 to index
    %c0_145 = arith.constant 0 : index
    %484 = vector.load %arg13[%483, %c0_145] : memref<64x512xf32, #tpu.memory_space<vmem>>, vector<8x512xf32>
    %c0_146 = arith.constant 0 : index
    %c0_147 = arith.constant 0 : index
    %485 = vector.load %arg6[%c0_146, %c0_147] : memref<128x512xf32, #tpu.memory_space<vmem>>, vector<128x512xf32>
    %cst_148 = arith.constant dense<0.000000e+00> : vector<8x512xf32>
    %486 = tpu.matmul %480, %485, %cst_148 {dimension_numbers = #tpu.dot_dimension_numbers<[1], [0], [0], [1], [0, 0, 1, 1], [], []>} : vector<8x128xf32>, vector<128x512xf32>, vector<8x512xf32> -> vector<8x512xf32>
    %487 = arith.addf %484, %486 : vector<8x512xf32>
    %488 = vector.extract_strided_slice %487 {offsets = [0, 0], sizes = [8, 128], strides = [1, 1]} : vector<8x512xf32> to vector<8x128xf32>
    %489 = arith.negf %488 : vector<8x128xf32>
    %490 = math.exp %489 : vector<8x128xf32>
    %cst_149 = arith.constant 1.000000e+00 : f32
    %491 = vector.broadcast %cst_149 : f32 to vector<8x128xf32>
    %492 = arith.addf %491, %490 : vector<8x128xf32>
    %493 = arith.divf %491, %492 : vector<8x128xf32>
    %494 = vector.extract_strided_slice %487 {offsets = [0, 128], sizes = [8, 128], strides = [1, 1]} : vector<8x512xf32> to vector<8x128xf32>
    %495 = arith.negf %494 : vector<8x128xf32>
    %496 = math.exp %495 : vector<8x128xf32>
    %cst_150 = arith.constant 1.000000e+00 : f32
    %497 = vector.broadcast %cst_150 : f32 to vector<8x128xf32>
    %498 = arith.addf %497, %496 : vector<8x128xf32>
    %499 = arith.divf %497, %498 : vector<8x128xf32>
    %500 = vector.extract_strided_slice %487 {offsets = [0, 256], sizes = [8, 128], strides = [1, 1]} : vector<8x512xf32> to vector<8x128xf32>
    %501 = math.tanh %500 : vector<8x128xf32>
    %502 = vector.extract_strided_slice %487 {offsets = [0, 384], sizes = [8, 128], strides = [1, 1]} : vector<8x512xf32> to vector<8x128xf32>
    %503 = arith.negf %502 : vector<8x128xf32>
    %504 = math.exp %503 : vector<8x128xf32>
    %cst_151 = arith.constant 1.000000e+00 : f32
    %505 = vector.broadcast %cst_151 : f32 to vector<8x128xf32>
    %506 = arith.addf %505, %504 : vector<8x128xf32>
    %507 = arith.divf %505, %506 : vector<8x128xf32>
    %508 = arith.mulf %499, %478 : vector<8x128xf32>
    %509 = arith.mulf %493, %501 : vector<8x128xf32>
    %510 = arith.addf %508, %509 : vector<8x128xf32>
    %511 = math.tanh %510 : vector<8x128xf32>
    %512 = arith.mulf %507, %511 : vector<8x128xf32>
    %c7_i32_152 = arith.constant 7 : i32
    %c8_i32_153 = arith.constant 8 : i32
    %513 = arith.muli %c7_i32_152, %c8_i32_153 : i32
    %514 = tpu.assume_multiple %513, 8 : i32
    %515 = arith.index_cast %514 : i32 to index
    %c0_154 = arith.constant 0 : index
    %516 = vector.load %arg13[%515, %c0_154] : memref<64x512xf32, #tpu.memory_space<vmem>>, vector<8x512xf32>
    %c0_155 = arith.constant 0 : index
    %c0_156 = arith.constant 0 : index
    %517 = vector.load %arg6[%c0_155, %c0_156] : memref<128x512xf32, #tpu.memory_space<vmem>>, vector<128x512xf32>
    %cst_157 = arith.constant dense<0.000000e+00> : vector<8x512xf32>
    %518 = tpu.matmul %512, %517, %cst_157 {dimension_numbers = #tpu.dot_dimension_numbers<[1], [0], [0], [1], [0, 0, 1, 1], [], []>} : vector<8x128xf32>, vector<128x512xf32>, vector<8x512xf32> -> vector<8x512xf32>
    %519 = arith.addf %516, %518 : vector<8x512xf32>
    %520 = vector.extract_strided_slice %519 {offsets = [0, 0], sizes = [8, 128], strides = [1, 1]} : vector<8x512xf32> to vector<8x128xf32>
    %521 = arith.negf %520 : vector<8x128xf32>
    %522 = math.exp %521 : vector<8x128xf32>
    %cst_158 = arith.constant 1.000000e+00 : f32
    %523 = vector.broadcast %cst_158 : f32 to vector<8x128xf32>
    %524 = arith.addf %523, %522 : vector<8x128xf32>
    %525 = arith.divf %523, %524 : vector<8x128xf32>
    %526 = vector.extract_strided_slice %519 {offsets = [0, 128], sizes = [8, 128], strides = [1, 1]} : vector<8x512xf32> to vector<8x128xf32>
    %527 = arith.negf %526 : vector<8x128xf32>
    %528 = math.exp %527 : vector<8x128xf32>
    %cst_159 = arith.constant 1.000000e+00 : f32
    %529 = vector.broadcast %cst_159 : f32 to vector<8x128xf32>
    %530 = arith.addf %529, %528 : vector<8x128xf32>
    %531 = arith.divf %529, %530 : vector<8x128xf32>
    %532 = vector.extract_strided_slice %519 {offsets = [0, 256], sizes = [8, 128], strides = [1, 1]} : vector<8x512xf32> to vector<8x128xf32>
    %533 = math.tanh %532 : vector<8x128xf32>
    %534 = vector.extract_strided_slice %519 {offsets = [0, 384], sizes = [8, 128], strides = [1, 1]} : vector<8x512xf32> to vector<8x128xf32>
    %535 = arith.negf %534 : vector<8x128xf32>
    %536 = math.exp %535 : vector<8x128xf32>
    %cst_160 = arith.constant 1.000000e+00 : f32
    %537 = vector.broadcast %cst_160 : f32 to vector<8x128xf32>
    %538 = arith.addf %537, %536 : vector<8x128xf32>
    %539 = arith.divf %537, %538 : vector<8x128xf32>
    %540 = arith.mulf %531, %510 : vector<8x128xf32>
    %541 = arith.mulf %525, %533 : vector<8x128xf32>
    %542 = arith.addf %540, %541 : vector<8x128xf32>
    %543 = math.tanh %542 : vector<8x128xf32>
    %544 = arith.mulf %539, %543 : vector<8x128xf32>
    %c8_i32_161 = arith.constant 8 : i32
    %c0_162 = arith.constant 0 : index
    %c0_163 = arith.constant 0 : index
    %545 = vector.load %arg8[%c0_162, %c0_163] : memref<128x128xf32, #tpu.memory_space<vmem>>, vector<128x128xf32>
    %cst_164 = arith.constant dense<0.000000e+00> : vector<8x128xf32>
    %546 = tpu.matmul %544, %545, %cst_164 {dimension_numbers = #tpu.dot_dimension_numbers<[1], [0], [0], [1], [0, 0, 1, 1], [], []>} : vector<8x128xf32>, vector<128x128xf32>, vector<8x128xf32> -> vector<8x128xf32>
    %c0_165 = arith.constant 0 : index
    %c0_166 = arith.constant 0 : index
    %547 = vector.load %arg9[%c0_165, %c0_166] : memref<1x128xf32, #tpu.memory_space<vmem>>, vector<1x128xf32>
    %548 = vector.broadcast %547 : vector<1x128xf32> to vector<8x128xf32>
    %549 = arith.addf %546, %548 : vector<8x128xf32>
    %cst_167 = arith.constant 0.000000e+00 : f32
    %550 = vector.broadcast %cst_167 : f32 to vector<8x128xf32>
    %551 = arith.maximumf %549, %550 : vector<8x128xf32>
    %c0_168 = arith.constant 0 : index
    %c0_169 = arith.constant 0 : index
    %552 = vector.load %arg10[%c0_168, %c0_169] : memref<128x8xf32, #tpu.memory_space<vmem>>, vector<128x8xf32>
    %cst_170 = arith.constant dense<0.000000e+00> : vector<8x8xf32>
    %553 = tpu.matmul %551, %552, %cst_170 {dimension_numbers = #tpu.dot_dimension_numbers<[1], [0], [0], [1], [0, 0, 1, 1], [], []>} : vector<8x128xf32>, vector<128x8xf32>, vector<8x8xf32> -> vector<8x8xf32>
    %c0_171 = arith.constant 0 : index
    %c0_172 = arith.constant 0 : index
    %554 = vector.load %arg11[%c0_171, %c0_172] : memref<1x8xf32, #tpu.memory_space<vmem>>, vector<1x8xf32>
    %555 = vector.broadcast %554 : vector<1x8xf32> to vector<8x8xf32>
    %556 = arith.addf %553, %555 : vector<8x8xf32>
    %557 = vector.extract_strided_slice %556 {offsets = [0, 0], sizes = [2, 8], strides = [1, 1]} : vector<8x8xf32> to vector<2x8xf32>
    %c0_173 = arith.constant 0 : index
    %c0_174 = arith.constant 0 : index
    %558 = vector.load %arg12[%c0_173, %c0_174] : memref<2x8xf32, #tpu.memory_space<vmem>>, vector<2x8xf32>
    tpu.vector_store %arg12[%c0_173, %c0_174], %557 {strides = array<i32>} : memref<2x8xf32, #tpu.memory_space<vmem>>, vector<2x8xf32>,
    return
  }
  func.func @transform_0(%arg0: i32) -> (i32, i32) {
    %c0_i32 = arith.constant 0 : i32
    %c0_i32_0 = arith.constant 0 : i32
    %c0_i32_1 = arith.constant 0 : i32
    return %c0_i32, %c0_i32_0 : i32, i32
  }
  func.func @transform_1(%arg0: i32) -> (i32, i32) {
    %c0_i32 = arith.constant 0 : i32
    %c0_i32_0 = arith.constant 0 : i32
    %c0_i32_1 = arith.constant 0 : i32
    return %c0_i32, %c0_i32_0 : i32, i32
  }
  func.func @transform_2(%arg0: i32) -> (i32, i32) {
    %c0_i32 = arith.constant 0 : i32
    %c0_i32_0 = arith.constant 0 : i32
    %c0_i32_1 = arith.constant 0 : i32
    return %c0_i32, %c0_i32_0 : i32, i32
  }
  func.func @transform_3(%arg0: i32) -> (i32, i32) {
    %c0_i32 = arith.constant 0 : i32
    %c0_i32_0 = arith.constant 0 : i32
    %c0_i32_1 = arith.constant 0 : i32
    return %c0_i32, %c0_i32_0 : i32, i32
  }
  func.func @transform_4(%arg0: i32) -> (i32, i32) {
    %c0_i32 = arith.constant 0 : i32
    %c0_i32_0 = arith.constant 0 : i32
    %c0_i32_1 = arith.constant 0 : i32
    return %c0_i32, %c0_i32_0 : i32, i32
  }
  func.func @transform_5(%arg0: i32) -> (i32, i32) {
    %c0_i32 = arith.constant 0 : i32
    %c0_i32_0 = arith.constant 0 : i32
    %c0_i32_1 = arith.constant 0 : i32
    return %c0_i32, %c0_i32_0 : i32, i32
  }
  func.func @transform_6(%arg0: i32) -> (i32, i32) {
    %c0_i32 = arith.constant 0 : i32
    %c0_i32_0 = arith.constant 0 : i32
    %c0_i32_1 = arith.constant 0 : i32
    return %c0_i32, %c0_i32_0 : i32, i32
  }
  func.func @transform_7(%arg0: i32) -> (i32, i32) {
    %c0_i32 = arith.constant 0 : i32
    %c0_i32_0 = arith.constant 0 : i32
    %c0_i32_1 = arith.constant 0 : i32
    return %c0_i32, %c0_i32_0 : i32, i32
  }
  func.func @transform_8(%arg0: i32) -> (i32, i32) {
    %c0_i32 = arith.constant 0 : i32
    %c0_i32_0 = arith.constant 0 : i32
    %c0_i32_1 = arith.constant 0 : i32
    return %c0_i32, %c0_i32_0 : i32, i32
  }
  func.func @transform_9(%arg0: i32) -> (i32, i32) {
    %c0_i32 = arith.constant 0 : i32
    %c0_i32_0 = arith.constant 0 : i32
    %c0_i32_1 = arith.constant 0 : i32
    return %c0_i32, %c0_i32_0 : i32, i32
  }
  func.func @transform_10(%arg0: i32) -> (i32, i32) {
    %c0_i32 = arith.constant 0 : i32
    %c0_i32_0 = arith.constant 0 : i32
    %c0_i32_1 = arith.constant 0 : i32
    return %c0_i32, %c0_i32_0 : i32, i32
  }
  func.func @transform_11(%arg0: i32) -> (i32, i32) {
    %c0_i32 = arith.constant 0 : i32
    %c0_i32_0 = arith.constant 0 : i32
    %c0_i32_1 = arith.constant 0 : i32
    return %c0_i32, %c0_i32_0 : i32, i32
  }
}

</mosaic_0001>

<bundles_post_ra>
// kernel: tpu_custom_call.1
= control target key start
LH: loop header
LB: loop body
LE: loop exit
PB: predicated region body
PF: predicated region fallthrough
CT: control target
= control target key end

     0   :  { %16 = vsyncpa [#allocation5], 0  ;;  %s7561_s0 = inlined_call_operand.hbm [shape: f32[64,128], index: 0, kind: input, shape index: {}]   ;;  %s7562_s1 = inlined_call_operand.hbm [shape: f32[128,512], index: 1, kind: input, shape index: {}]   ;;  %s7563_s2 = inlined_call_operand.hbm [shape: f32[128,512], index: 2, kind: input, shape index: {}]   ;;  %s7564_s3 = inlined_call_operand.vmem [shape: f32[1,512], index: 3, kind: input, shape index: {}]   ;;  %s7565_s4 = inlined_call_operand.hbm [shape: f32[128,512], index: 4, kind: input, shape index: {}]   ;;  %s7566_s5 = inlined_call_operand.hbm [shape: f32[128,512], index: 5, kind: input, shape index: {}]   ;;  %s7567_s6 = inlined_call_operand.vmem [shape: f32[1,512], index: 6, kind: input, shape index: {}]   ;;  %s7568_s7 = inlined_call_operand.vmem [shape: f32[128,128], index: 7, kind: input, shape index: {}]   ;;  %s7569_s8 = inlined_call_operand.vmem [shape: f32[1,128], index: 8, kind: input, shape index: {}]   ;;  %s7570_s9 = inlined_call_operand.vmem [shape: f32[128,8], index: 9, kind: input, shape index: {}]   ;;  %s7571_s10 = inlined_call_operand.vmem [shape: f32[1,8], index: 10, kind: input, shape index: {}]   ;;  %s7572_s11 = inlined_call_operand.hbm [shape: f32[2,8], index: 11, kind: output, shape index: {}]  }
   0x1   :  { %17 = vsyncpa [#allocation8], 0 }
   0x2   :  { %18 = vsyncpa [#allocation11], 0 }
   0x3   :  { %19 = vsyncpa [#allocation6], 0  ;;  %s6314_s17 = smov [#allocation7]   ;;  %s6174_s21 = scalar_lea.hbm %s7562_s1, 8192 }
   0x4   :  { %s37_s18 = sshll.u32 %s6314_s17, 4  ;;  %p6175_p0 = scmp.ne.s32.totalorder %s7562_s1, %s6174_s21  ;;  %s38_s18 = int_to_ptr.vmem [resolvable:$true] %s37_s18 }
   0x5   :  { %p6178_p1 = scmp.lt.u32.totalorder %s6174_s21, %s7562_s1 }
   0x7   :  { %p6180_p2 = pnand %p6178_p1, %p6175_p0 }
   0x9   :  { %6183 = shalt.err (!%p6180_p2)
}
   0xa   :  { %s6184_s26 = scalar_lea.vmem %s38_s18, 8192  ;;  %p6189_p4 = scmp.lt.s32.totalorder %s38_s18, %s38_s18 }
   0xb   :  { %p6185_p3 = scmp.ne.s32.totalorder %s38_s18, %s6184_s26  ;;  %p6190_p5 = scmp.lt.s32.totalorder %s6184_s26, %s6184_s26 }
   0xd   :  { %p6191_p6 = por %p6190_p5, %p6189_p4 }
   0xf   :  { %p6192_p7 = pnand %p6191_p6, %p6185_p3 }
  0x11   :  { %6195 = shalt.err (!%p6192_p7)
}
  0x12   :  { %s6315_s27 = smov 512   ;;  %s6316_s28 = smov 32  }
  0x13   :  { %43 = dma.hbm_to_vmem [thread:$0]  %s7562_s1, 8192, %s38_s18, [#allocation8], %s6315_s27, %s6315_s27, %s6316_s28  }
  0x14   :  { %s6317_s12 = smov [#allocation10]   ;;  %s6318_s14 = smov [#allocation4]  }
  0x15   :  { %s63_s13 = sshll.u32 %s6317_s12, 4  ;;  %s25_s15 = sshll.u32 %s6318_s14, 4  ;;  %s64_s13 = int_to_ptr.vmem [resolvable:$true] %s63_s13  ;;  %s26_s15 = int_to_ptr.vmem [resolvable:$true] %s25_s15 }
  0x16   :  { %s6196_s19 = scalar_lea.hbm %s7565_s4, 8192 }
  0x17   :  { %p6197_p8 = scmp.ne.s32.totalorder %s7565_s4, %s6196_s19  ;;  %p6200_p9 = scmp.lt.u32.totalorder %s6196_s19, %s7565_s4 }
  0x19   :  { %p6202_p10 = pnand %p6200_p9, %p6197_p8 }
  0x1b   :  { %6205 = shalt.err (!%p6202_p10)
}
  0x1c   :  { %s6206_s1 = scalar_lea.vmem %s64_s13, 8192  ;;  %p6211_p12 = scmp.lt.s32.totalorder %s64_s13, %s64_s13 }
  0x1d   :  { %p6207_p11 = scmp.ne.s32.totalorder %s64_s13, %s6206_s1  ;;  %p6212_p13 = scmp.lt.s32.totalorder %s6206_s1, %s6206_s1 }
  0x1f   :  { %p6213_p0 = por %p6212_p13, %p6211_p12 }
  0x21   :  { %p6214_p1 = pnand %p6213_p0, %p6207_p11 }
  0x23   :  { %6217 = shalt.err (!%p6214_p1)
}
  0x24   :  { %69 = dma.hbm_to_vmem [thread:$0]  %s7565_s4, 8192, %s64_s13, [#allocation11], %s6315_s27, %s6315_s27, %s6316_s28  }
  0x25   :  { %s6218_s29 = scalar_lea.hbm %s7561_s0, 1024 }
  0x26   :  { %p6219_p2 = scmp.ne.s32.totalorder %s7561_s0, %s6218_s29  ;;  %p6222_p3 = scmp.lt.u32.totalorder %s6218_s29, %s7561_s0 }
  0x28   :  { %p6224_p4 = pnand %p6222_p3, %p6219_p2 }
  0x2a   :  { %6227 = shalt.err (!%p6224_p4)
}
  0x2b   :  { %s6228_s17 = scalar_lea.vmem %s26_s15, 1024  ;;  %p6233_p6 = scmp.lt.s32.totalorder %s26_s15, %s26_s15 }
  0x2c   :  { %p6229_p5 = scmp.ne.s32.totalorder %s26_s15, %s6228_s17  ;;  %p6234_p7 = scmp.lt.s32.totalorder %s6228_s17, %s6228_s17 }
  0x2e   :  { %p6235_p8 = por %p6234_p7, %p6233_p6 }
  0x30   :  { %p6236_p9 = pnand %p6235_p8, %p6229_p5 }
  0x32   :  { %6239 = shalt.err (!%p6236_p9)
}
  0x33   :  { %s6319_s4 = smov 128   ;;  %s6320_s13 = smov 8  }
  0x34   :  { %31 = dma.hbm_to_vmem [thread:$0]  %s7561_s0, 1024, %s26_s15, [#allocation5], %s6319_s4, %s6319_s4, %s6320_s13  }
  0x35   :  { %s6321_s21 = smov [#allocation9]   ;;  %s6322_s23 = smov [#allocation12]  }
  0x36   :  { %s49_s22 = sshll.u32 %s6321_s21, 4  ;;  %s75_s1 = sshll.u32 %s6322_s23, 4  ;;  %s50_s22 = int_to_ptr.vmem [resolvable:$true] %s49_s22  ;;  %s76_s1 = int_to_ptr.vmem [resolvable:$true] %s75_s1 }
  0x37   :  { %s6240_s25 = scalar_lea.hbm %s7563_s2, 8192 }
  0x38   :  { %p6241_p10 = scmp.ne.s32.totalorder %s7563_s2, %s6240_s25  ;;  %p6244_p11 = scmp.lt.u32.totalorder %s6240_s25, %s7563_s2 }
  0x3a   :  { %p6246_p12 = pnand %p6244_p11, %p6241_p10 }
  0x3c   :  { %6249 = shalt.err (!%p6246_p12)
}
  0x3d   :  { %s6250_s0 = scalar_lea.vmem %s50_s22, 8192  ;;  %p6255_p0 = scmp.lt.s32.totalorder %s50_s22, %s50_s22 }
  0x3e   :  { %p6251_p13 = scmp.ne.s32.totalorder %s50_s22, %s6250_s0  ;;  %p6256_p1 = scmp.lt.s32.totalorder %s6250_s0, %s6250_s0 }
  0x40   :  { %p6257_p2 = por %p6256_p1, %p6255_p0 }
  0x42   :  { %p6258_p3 = pnand %p6257_p2, %p6251_p13 }
  0x44   :  { %6261 = shalt.err (!%p6258_p3)
}
  0x45   :  { %55 = dma.hbm_to_vmem [thread:$0]  %s7563_s2, 8192, %s50_s22, [#allocation8], %s6315_s27, %s6315_s27, %s6316_s28  }
  0x46   :  { %s6262_s4 = scalar_lea.hbm %s7566_s5, 8192 }
  0x47   :  { %p6263_p4 = scmp.ne.s32.totalorder %s7566_s5, %s6262_s4  ;;  %p6266_p5 = scmp.lt.u32.totalorder %s6262_s4, %s7566_s5 }
  0x49   :  { %p6268_p6 = pnand %p6266_p5, %p6263_p4 }
  0x4b   :  { %6271 = shalt.err (!%p6268_p6)
}
  0x4c   :  { %s6272_s23 = scalar_lea.vmem %s76_s1, 8192  ;;  %p6277_p8 = scmp.lt.s32.totalorder %s76_s1, %s76_s1 }
  0x4d   :  { %p6273_p7 = scmp.ne.s32.totalorder %s76_s1, %s6272_s23  ;;  %p6278_p9 = scmp.lt.s32.totalorder %s6272_s23, %s6272_s23 }
  0x4f   :  { %p6279_p10 = por %p6278_p9, %p6277_p8 }
  0x51   :  { %p6280_p11 = pnand %p6279_p10, %p6273_p7 }
  0x53   :  { %6283 = shalt.err (!%p6280_p11)
}
  0x54   :  { %81 = dma.hbm_to_vmem [thread:$0]  %s7566_s5, 8192, %s76_s1, [#allocation11], %s6315_s27, %s6315_s27, %s6316_s28  }
  0x55   :  { %6306 = dma.done.wait [#allocation5], 1024  }
  0x56   :  { %6307 = vsyncadd [#allocation5], 4294966272 }
  0x57   :  { %6308 = dma.done.wait [#allocation8], 16384  }
  0x58   :  { %6309 = vsyncadd [#allocation8], 4294950912 }
  0x59   :  { %6310 = dma.done.wait [#allocation11], 16384  }
  0x5a   :  { %6311 = vsyncadd [#allocation11], 4294950912  ;;  %v6323_v0 = vmov 0.0   ;;  %v116_v1 = vld [vmem:[#allocation7 + $0x8] sm:$0xff]  ;;  %v118_v3 = vld [vmem:[#allocation7 + $0x18] sm:$0xff]  ;;  %vm6325_vm0 = vmmov 0  }
  0x5b   :  { %265 = vmatprep.mubr.f32.mxu0 %v6323_v0  ;;  %378 = vmatprep.mubr.f32.mxu1 %v6323_v0  ;;  %v120_v2 = vld [vmem:[#allocation7 + $0x28] sm:$0xff]  ;;  %v122_v5 = vld [vmem:[#allocation7 + $0x38] sm:$0xff]  ;;  %v115_v6 = vld [vmem:[#allocation7] sm:$0xff]  ;;  %s6326_s4 = smov [#allocation13]   ;;  %vm4397_vm1 = vcmask 58368  }
  0x5c   :  { %v4577_v4 = vpack.c.bf16 %v120_v2, %v116_v1  ;;  %v119_v7 = vld [vmem:[#allocation7 + $0x20] sm:$0xff]  ;;  %v4609_v8 = vpack.c.bf16 %v122_v5, %v118_v3  ;;  %v117_v10 = vld [vmem:[#allocation7 + $0x10] sm:$0xff]  ;;  %v124_v12 = vld [vmem:[#allocation7 + $0x48] sm:$0xff]  ;;  %s4405_s13 = sshll.u32 %s6326_s4, 4  ;;  %s4406_s13 = int_to_ptr.vmem [resolvable:$true] %s4405_s13 }
  0x5d   :  { %v4579_v9 = vpack.c.bf16 %v119_v7, %v115_v6  ;;  %v121_v11 = vld [vmem:[#allocation7 + $0x30] sm:$0xff]  ;;  %v128_v14 = vld [vmem:[#allocation7 + $0x68] sm:$0xff]  ;;  %v126_v15 = vld [vmem:[#allocation7 + $0x58] sm:$0xff]  ;;  %p6289_p13 = scmp.lt.s32.totalorder %s4406_s13, %s4406_s13 }
  0x5e   :  { %4578 = vmatprep.subr.bf16.mxu0 %v4577_v4  ;;  %v4611_v13 = vpack.c.bf16 %v121_v11, %v117_v10  ;;  %v130_v16 = vld [vmem:[#allocation7 + $0x78] sm:$0xff]  ;;  %4610 = vmatprep.subr.bf16.mxu1 %v4609_v8  ;;  %v4581_v17 = vpack.c.bf16 %v128_v14, %v124_v12  ;;  %v123_v19 = vld [vmem:[#allocation7 + $0x40] sm:$0xff]  ;;  %v125_v21 = vld [vmem:[#allocation7 + $0x50] sm:$0xff] }
  0x5f   :  { %4580 = vmatpush1.bf16.msra.mxu0 %v4579_v9  ;;  %v4613_v18 = vpack.c.bf16 %v130_v16, %v126_v15  ;;  %v127_v20 = vld [vmem:[#allocation7 + $0x60] sm:$0xff]  ;;  %v129_v23 = vld [vmem:[#allocation7 + $0x70] sm:$0xff]  ;;  %v132_v24 = vld [vmem:[#allocation7 + $0x88] sm:$0xff] }
  0x60   :  { %4612 = vmatpush1.bf16.msra.mxu1 %v4611_v13  ;;  %v4583_v22 = vpack.c.bf16 %v127_v20, %v123_v19  ;;  %v136_v25 = vld [vmem:[#allocation7 + $0xa8] sm:$0xff]  ;;  %4582 = vmatprep.subr.bf16.mxu0 %v4581_v17  ;;  %v4615_v26 = vpack.c.bf16 %v129_v23, %v125_v21  ;;  %v134_v28 = vld [vmem:[#allocation7 + $0x98] sm:$0xff]  ;;  %v131_v30 = vld [vmem:[#allocation7 + $0x80] sm:$0xff] }
  0x61   :  { %4614 = vmatprep.subr.bf16.mxu1 %v4613_v18  ;;  %v4585_v27 = vpack.c.bf16 %v136_v25, %v132_v24  ;;  %v138_v29 = vld [vmem:[#allocation7 + $0xb8] sm:$0xff]  ;;  %v135_v32 = vld [vmem:[#allocation7 + $0xa0] sm:$0xff]  ;;  %v133_v33 = vld [vmem:[#allocation7 + $0x90] sm:$0xff] }
  0x62   :  { %v4617_v31 = vpack.c.bf16 %v138_v29, %v134_v28  ;;  %v137_v34 = vld [vmem:[#allocation7 + $0xb0] sm:$0xff]  ;;  %v4587_v35 = vpack.c.bf16 %v135_v32, %v131_v30  ;;  %v140_v36 = vld [vmem:[#allocation7 + $0xc8] sm:$0xff]  ;;  %v142_v38 = vld [vmem:[#allocation7 + $0xd8] sm:$0xff] }
  0x63   :  { %4584 = vmatpush1.bf16.msra.mxu0 %v4583_v22  ;;  %v144_v37 = vld [vmem:[#allocation7 + $0xe8] sm:$0xff]  ;;  %v4619_v39 = vpack.c.bf16 %v137_v34, %v133_v33  ;;  %v146_v41 = vld [vmem:[#allocation7 + $0xf8] sm:$0xff]  ;;  %v139_v42 = vld [vmem:[#allocation7 + $0xc0] sm:$0xff] }
  0x64   :  { %4616 = vmatpush1.bf16.msra.mxu1 %v4615_v26  ;;  %4586 = vmatprep.subr.bf16.mxu0 %v4585_v27  ;;  %v4589_v40 = vpack.c.bf16 %v144_v37, %v140_v36  ;;  %v143_v43 = vld [vmem:[#allocation7 + $0xe0] sm:$0xff]  ;;  %v4621_v44 = vpack.c.bf16 %v146_v41, %v142_v38  ;;  %v141_v45 = vld [vmem:[#allocation7 + $0xd0] sm:$0xff]  ;;  %v148_v47 = vld [vmem:[#allocation7 + $0x108] sm:$0xff] }
  0x65   :  { %4618 = vmatprep.subr.bf16.mxu1 %v4617_v31  ;;  %v145_v46 = vld [vmem:[#allocation7 + $0xf0] sm:$0xff]  ;;  %v152_v48 = vld [vmem:[#allocation7 + $0x128] sm:$0xff]  ;;  %v150_v49 = vld [vmem:[#allocation7 + $0x118] sm:$0xff]  ;;  %v4591_v51 = vpack.c.bf16 %v143_v43, %v139_v42 }
  0x66   :  { %v154_v50 = vld [vmem:[#allocation7 + $0x138] sm:$0xff]  ;;  %v4623_v52 = vpack.c.bf16 %v145_v46, %v141_v45  ;;  %v4593_v53 = vpack.c.bf16 %v152_v48, %v148_v47  ;;  %v147_v54 = vld [vmem:[#allocation7 + $0x100] sm:$0xff]  ;;  %v149_v56 = vld [vmem:[#allocation7 + $0x110] sm:$0xff] }
  0x67   :  { %4588 = vmatpush1.bf16.msra.mxu0 %v4587_v35  ;;  %v151_v55 = vld [vmem:[#allocation7 + $0x120] sm:$0xff]  ;;  %v4625_v57 = vpack.c.bf16 %v154_v50, %v150_v49  ;;  %v153_v58 = vld [vmem:[#allocation7 + $0x130] sm:$0xff]  ;;  %v156_v59 = vld [vmem:[#allocation7 + $0x148] sm:$0xff] }
  0x68   :  { %4620 = vmatpush1.bf16.msra.mxu1 %v4619_v39  ;;  %4590 = vmatprep.subr.bf16.mxu0 %v4589_v40  ;;  %v160_v60 = vld [vmem:[#allocation7 + $0x168] sm:$0xff]  ;;  %v158_v61 = vld [vmem:[#allocation7 + $0x158] sm:$0xff]  ;;  %v4595_v63 = vpack.c.bf16 %v151_v55, %v147_v54  ;;  %v4627_v1 = vpack.c.bf16 %v153_v58, %v149_v56  ;;  %v155_v3 = vld [vmem:[#allocation7 + $0x140] sm:$0xff] }
  0x69   :  { %4622 = vmatprep.subr.bf16.mxu1 %v4621_v44  ;;  %v162_v62 = vld [vmem:[#allocation7 + $0x178] sm:$0xff]  ;;  %v4597_v2 = vpack.c.bf16 %v160_v60, %v156_v59  ;;  %v159_v4 = vld [vmem:[#allocation7 + $0x160] sm:$0xff]  ;;  %v157_v5 = vld [vmem:[#allocation7 + $0x150] sm:$0xff] }
  0x6a   :  { %v4629_v6 = vpack.c.bf16 %v162_v62, %v158_v61  ;;  %v161_v7 = vld [vmem:[#allocation7 + $0x170] sm:$0xff]  ;;  %v164_v8 = vld [vmem:[#allocation7 + $0x188] sm:$0xff]  ;;  %v166_v10 = vld [vmem:[#allocation7 + $0x198] sm:$0xff]  ;;  %v4599_v12 = vpack.c.bf16 %v159_v4, %v155_v3 }
  0x6b   :  { %4592 = vmatpush1.bf16.msra.mxu0 %v4591_v51  ;;  %v168_v9 = vld [vmem:[#allocation7 + $0x1a8] sm:$0xff]  ;;  %v170_v11 = vld [vmem:[#allocation7 + $0x1b8] sm:$0xff]  ;;  %v4631_v13 = vpack.c.bf16 %v161_v7, %v157_v5  ;;  %v163_v15 = vld [vmem:[#allocation7 + $0x180] sm:$0xff] }
  0x6c   :  { %4624 = vmatpush1.bf16.msra.mxu1 %v4623_v52  ;;  %4594 = vmatprep.subr.bf16.mxu0 %v4593_v53  ;;  %v4601_v14 = vpack.c.bf16 %v168_v9, %v164_v8  ;;  %v167_v16 = vld [vmem:[#allocation7 + $0x1a0] sm:$0xff]  ;;  %v165_v17 = vld [vmem:[#allocation7 + $0x190] sm:$0xff]  ;;  %v4633_v18 = vpack.c.bf16 %v170_v11, %v166_v10  ;;  %v172_v20 = vld [vmem:[#allocation7 + $0x1c8] sm:$0xff] }
  0x6d   :  { %4626 = vmatprep.subr.bf16.mxu1 %v4625_v57  ;;  %v169_v19 = vld [vmem:[#allocation7 + $0x1b0] sm:$0xff]  ;;  %v176_v21 = vld [vmem:[#allocation7 + $0x1e8] sm:$0xff]  ;;  %v174_v22 = vld [vmem:[#allocation7 + $0x1d8] sm:$0xff]  ;;  %v4603_v24 = vpack.c.bf16 %v167_v16, %v163_v15 }
  0x6e   :  { %v178_v23 = vld [vmem:[#allocation7 + $0x1f8] sm:$0xff]  ;;  %v4635_v25 = vpack.c.bf16 %v169_v19, %v165_v17  ;;  %v4605_v26 = vpack.c.bf16 %v176_v21, %v172_v20  ;;  %v171_v27 = vld [vmem:[#allocation7 + $0x1c0] sm:$0xff]  ;;  %v173_v29 = vld [vmem:[#allocation7 + $0x1d0] sm:$0xff] }
  0x6f   :  { %4596 = vmatpush1.bf16.msra.mxu0 %v4595_v63  ;;  %v175_v28 = vld [vmem:[#allocation7 + $0x1e0] sm:$0xff]  ;;  %v4637_v30 = vpack.c.bf16 %v178_v23, %v174_v22  ;;  %v177_v31 = vld [vmem:[#allocation7 + $0x1f0] sm:$0xff]  ;;  %v467_v32 = vld [vmem:[#allocation9 + $0x8] sm:$0xff] }
  0x70   :  { %4628 = vmatpush1.bf16.msra.mxu1 %v4627_v1  ;;  %4598 = vmatprep.subr.bf16.mxu0 %v4597_v2  ;;  %v471_v33 = vld [vmem:[#allocation9 + $0x28] sm:$0xff]  ;;  %v469_v34 = vld [vmem:[#allocation9 + $0x18] sm:$0xff]  ;;  %v4607_v36 = vpack.c.bf16 %v175_v28, %v171_v27  ;;  %v4639_v37 = vpack.c.bf16 %v177_v31, %v173_v29  ;;  %v466_v39 = vld [vmem:[#allocation9] sm:$0xff] }
  0x71   :  { %4630 = vmatprep.subr.bf16.mxu1 %v4629_v6  ;;  %v473_v35 = vld [vmem:[#allocation9 + $0x38] sm:$0xff]  ;;  %v6461_v38 = vpack.c.bf16 %v471_v33, %v467_v32  ;;  %v470_v40 = vld [vmem:[#allocation9 + $0x20] sm:$0xff]  ;;  %v468_v42 = vld [vmem:[#allocation9 + $0x10] sm:$0xff] }
  0x72   :  { %v6463_v41 = vpack.c.bf16 %v473_v35, %v469_v34  ;;  %v472_v43 = vld [vmem:[#allocation9 + $0x30] sm:$0xff]  ;;  %v475_v44 = vld [vmem:[#allocation9 + $0x48] sm:$0xff]  ;;  %v107_v46 = vld [vmem:[#allocation4] sm:$0xff]  ;;  %v6465_v47 = vpack.c.bf16 %v470_v40, %v466_v39 }
  0x73   :  { %4600 = vmatpush1.bf16.msra.mxu0 %v4599_v12  ;;  %v479_v45 = vld [vmem:[#allocation9 + $0x68] sm:$0xff]  ;;  %v477_v48 = vld [vmem:[#allocation9 + $0x58] sm:$0xff]  ;;  %v6468_v50 = vpack.c.bf16 %v472_v43, %v468_v42  ;;  %v474_v51 = vld [vmem:[#allocation9 + $0x40] sm:$0xff] }
  0x74   :  { %4632 = vmatpush1.bf16.msra.mxu1 %v4631_v13  ;;  %4602 = vmatprep.subr.bf16.mxu0 %v4601_v14  ;;  %v481_v49 = vld [vmem:[#allocation9 + $0x78] sm:$0xff]  ;;  %v478_v52 = vld [vmem:[#allocation9 + $0x60] sm:$0xff]  ;;  %v6471_v53 = vpack.c.bf16 %v479_v45, %v475_v44  ;;  %v476_v54 = vld [vmem:[#allocation9 + $0x50] sm:$0xff] }
  0x75   :  { %4634 = vmatprep.subr.bf16.mxu1 %v4633_v18  ;;  %v480_v55 = vld [vmem:[#allocation9 + $0x70] sm:$0xff]  ;;  %v6473_v56 = vpack.c.bf16 %v481_v49, %v477_v48  ;;  %v483_v57 = vld [vmem:[#allocation9 + $0x88] sm:$0xff]  ;;  %v6476_v60 = vpack.c.bf16 %v478_v52, %v474_v51  ;;  %v485_v61 = vld [vmem:[#allocation9 + $0x98] sm:$0xff] }
  0x76   :  { %v487_v58 = vld [vmem:[#allocation9 + $0xa8] sm:$0xff]  ;;  %v489_v62 = vld [vmem:[#allocation9 + $0xb8] sm:$0xff]  ;;  %v6480_v63 = vpack.c.bf16 %v480_v55, %v476_v54  ;;  %v482_v1 = vld [vmem:[#allocation9 + $0x80] sm:$0xff] }
  0x77   :  { %4604 = vmatpush1.bf16.msra.mxu0 %v4603_v24  ;;  %v108_v59 = vld [vmem:[#allocation4 + $0x8] sm:$0xff]  ;;  %v486_v2 = vld [vmem:[#allocation9 + $0xa0] sm:$0xff]  ;;  %v6484_v3 = vpack.c.bf16 %v487_v58, %v483_v57  ;;  %v484_v4 = vld [vmem:[#allocation9 + $0x90] sm:$0xff]  ;;  %v6487_v6 = vpack.c.bf16 %v489_v62, %v485_v61 }
  0x78   :  { %4636 = vmatpush1.bf16.msra.mxu1 %v4635_v25  ;;  %4606 = vmatprep.subr.bf16.mxu0 %v4605_v26  ;;  %v488_v5 = vld [vmem:[#allocation9 + $0xb0] sm:$0xff]  ;;  %v491_v7 = vld [vmem:[#allocation9 + $0xc8] sm:$0xff]  ;;  %v6490_v10 = vpack.c.bf16 %v486_v2, %v482_v1  ;;  %v493_v11 = vld [vmem:[#allocation9 + $0xd8] sm:$0xff] }
  0x79   :  { %4638 = vmatprep.subr.bf16.mxu1 %v4637_v30  ;;  %v495_v8 = vld [vmem:[#allocation9 + $0xe8] sm:$0xff]  ;;  %v109_v9 = vld [vmem:[#allocation4 + $0x10] sm:$0xff]  ;;  %v497_v12 = vld [vmem:[#allocation9 + $0xf8] sm:$0xff]  ;;  %v6494_v13 = vpack.c.bf16 %v488_v5, %v484_v4 }
  0x7a   :  { %v490_v14 = vld [vmem:[#allocation9 + $0xc0] sm:$0xff]  ;;  %v6498_v16 = vpack.c.bf16 %v495_v8, %v491_v7  ;;  %v492_v17 = vld [vmem:[#allocation9 + $0xd0] sm:$0xff]  ;;  %v6501_v19 = vpack.c.bf16 %v497_v12, %v493_v11  ;;  %v499_v20 = vld [vmem:[#allocation9 + $0x108] sm:$0xff] }
  0x7b   :  { %4608 = vmatpush1.bf16.msra.mxu0 %v4607_v36  ;;  %v494_v15 = vld [vmem:[#allocation9 + $0xe0] sm:$0xff]  ;;  %v496_v18 = vld [vmem:[#allocation9 + $0xf0] sm:$0xff]  ;;  %v503_v21 = vld [vmem:[#allocation9 + $0x128] sm:$0xff] }
  0x7c   :  { %4640 = vmatpush1.bf16.msra.mxu1 %v4639_v37  ;;  %4642 = vmatprep.subr.bf16.mxu0 %v6461_v38  ;;  %v110_v22 = vld [vmem:[#allocation4 + $0x18] sm:$0xff]  ;;  %v6504_v23 = vpack.c.bf16 %v494_v15, %v490_v14  ;;  %v6508_v26 = vpack.c.bf16 %v496_v18, %v492_v17  ;;  %v498_v27 = vld [vmem:[#allocation9 + $0x100] sm:$0xff]  ;;  %v6512_v29 = vpack.c.bf16 %v503_v21, %v499_v20  ;;  %v500_v30 = vld [vmem:[#allocation9 + $0x110] sm:$0xff] }
  0x7d   :  { %4674 = vmatprep.subr.bf16.mxu1 %v6463_v41  ;;  %v501_v24 = vld [vmem:[#allocation9 + $0x118] sm:$0xff]  ;;  %v502_v28 = vld [vmem:[#allocation9 + $0x120] sm:$0xff]  ;;  %v504_v31 = vld [vmem:[#allocation9 + $0x130] sm:$0xff] }
  0x7e   :  { %266 = vmatmul.mubr.f32.vlgmr.msra.gmra.mrb[0].mxu0 %v107_v46  ;;  %v505_v25 = vld [vmem:[#allocation9 + $0x138] sm:$0xff]  ;;  %v507_v33 = vld [vmem:[#allocation9 + $0x148] sm:$0xff]  ;;  %v111_v35 = vld [vmem:[#allocation4 + $0x20] sm:$0xff]  ;;  %v6518_v36 = vpack.c.bf16 %v502_v28, %v498_v27  ;;  %v6522_v40 = vpack.c.bf16 %v504_v31, %v500_v30  ;;  %v181_v28 = vlaneseq }
  0x7f   :  { %379 = vmatmul.mubr.f32.vlgmr.msra.gmra.mrb[0].mxu1 %v107_v46  ;;  %4644 = vmatpush1.bf16.msra.mxu0 %v6465_v47  ;;  %v6515_v32 = vpack.c.bf16 %v505_v25, %v501_v24  ;;  %v511_v34 = vld [vmem:[#allocation9 + $0x168] sm:$0xff]  ;;  %v509_v37 = vld [vmem:[#allocation9 + $0x158] sm:$0xff]  ;;  %v506_v42 = vld [vmem:[#allocation9 + $0x140] sm:$0xff] }
  0x80   :  { %4676 = vmatpush1.bf16.msra.mxu1 %v6468_v50  ;;  %271 = vmatprep.mubr.f32.mxu0 %v6323_v0  ;;  %v513_v39 = vld [vmem:[#allocation9 + $0x178] sm:$0xff]  ;;  %v510_v43 = vld [vmem:[#allocation9 + $0x160] sm:$0xff]  ;;  %v6526_v44 = vpack.c.bf16 %v511_v34, %v507_v33  ;;  %v508_v45 = vld [vmem:[#allocation9 + $0x150] sm:$0xff]  ;;  %v6611_v30 = vshrl.u32 %v181_v28, 7 }
  0x81   :  { %384 = vmatprep.mubr.f32.mxu1 %v6323_v0  ;;  %4646 = vmatprep.subr.bf16.mxu0 %v6471_v53  ;;  %v512_v46 = vld [vmem:[#allocation9 + $0x170] sm:$0xff]  ;;  %v6529_v48 = vpack.c.bf16 %v513_v39, %v509_v37  ;;  %v515_v49 = vld [vmem:[#allocation9 + $0x188] sm:$0xff]  ;;  %v6532_v54 = vpack.c.bf16 %v510_v43, %v506_v42  ;;  %v517_v55 = vld [vmem:[#allocation9 + $0x198] sm:$0xff] }
  0x82   :  { %272 = vmatmul.mubr.f32.gmra.mrb[2].mxu0 %v108_v59  ;;  %4678 = vmatprep.subr.bf16.mxu1 %v6473_v56  ;;  %v519_v51 = vld [vmem:[#allocation9 + $0x1a8] sm:$0xff]  ;;  %v521_v57 = vld [vmem:[#allocation9 + $0x1b8] sm:$0xff]  ;;  %v6536_v58 = vpack.c.bf16 %v512_v46, %v508_v45  ;;  %v518_v61 = vld [vmem:[#allocation9 + $0x1a0] sm:$0xff]  ;;  %v183_v31 = vsub.s32 0, %v6611_v30  ;;  %v187_v34 = vsub.s32 1, %v6611_v30  ;;  %v195_v37 = vsub.s32 3, %v6611_v30 }
  0x83   :  { %385 = vmatmul.mubr.f32.gmra.mrb[2].mxu1 %v108_v59  ;;  %4648 = vmatpush1.bf16.msra.mxu0 %v6476_v60  ;;  %v112_v52 = vld [vmem:[#allocation4 + $0x28] sm:$0xff]  ;;  %v514_v59 = vld [vmem:[#allocation9 + $0x180] sm:$0xff]  ;;  %v6540_v62 = vpack.c.bf16 %v519_v51, %v515_v49  ;;  %v516_v1 = vld [vmem:[#allocation9 + $0x190] sm:$0xff]  ;;  %v6543_v4 = vpack.c.bf16 %v521_v57, %v517_v55  ;;  %v191_v55 = vsub.s32 2, %v6611_v30 }
  0x84   :  { %4680 = vmatpush1.bf16.msra.mxu1 %v6480_v63  ;;  %277 = vmatprep.mubr.f32.mxu0 %v6323_v0  ;;  %v520_v2 = vld [vmem:[#allocation9 + $0x1b0] sm:$0xff]  ;;  %v523_v5 = vld [vmem:[#allocation9 + $0x1c8] sm:$0xff]  ;;  %v525_v11 = vld [vmem:[#allocation9 + $0x1d8] sm:$0xff] }
  0x85   :  { %390 = vmatprep.mubr.f32.mxu1 %v6323_v0  ;;  %4650 = vmatprep.subr.bf16.mxu0 %v6484_v3  ;;  %v527_v7 = vld [vmem:[#allocation9 + $0x1e8] sm:$0xff]  ;;  %v113_v8 = vld [vmem:[#allocation4 + $0x30] sm:$0xff]  ;;  %v529_v12 = vld [vmem:[#allocation9 + $0x1f8] sm:$0xff]  ;;  %v6550_v14 = vpack.c.bf16 %v520_v2, %v516_v1 }
  0x86   :  { %278 = vmatmul.mubr.f32.gmra.mrb[4].mxu0 %v109_v9  ;;  %4682 = vmatprep.subr.bf16.mxu1 %v6487_v6  ;;  %v522_v15 = vld [vmem:[#allocation9 + $0x1c0] sm:$0xff]  ;;  %v6554_v18 = vpack.c.bf16 %v527_v7, %v523_v5  ;;  %v524_v20 = vld [vmem:[#allocation9 + $0x1d0] sm:$0xff]  ;;  %v114_v24 = vld [vmem:[#allocation4 + $0x38] sm:$0xff] }
  0x87   :  { %391 = vmatmul.mubr.f32.gmra.mrb[4].mxu1 %v109_v9  ;;  %4652 = vmatpush1.bf16.msra.mxu0 %v6490_v10  ;;  %v6546_v9 = vpack.c.bf16 %v518_v61, %v514_v59  ;;  %v526_v17 = vld [vmem:[#allocation9 + $0x1e0] sm:$0xff]  ;;  %v528_v21 = vld [vmem:[#allocation9 + $0x1f0] sm:$0xff] }
  0x88   :  { %4684 = vmatpush1.bf16.msra.mxu1 %v6494_v13  ;;  %283 = vmatprep.mubr.f32.mxu0 %v6323_v0  ;;  %v6560_v25 = vpack.c.bf16 %v526_v17, %v522_v15  ;;  %v6564_v27 = vpack.c.bf16 %v528_v21, %v524_v20  ;;  %v179_v33 = vld [vmem:[%s7564_s3] sm:$0xf] }
  0x89   :  { %396 = vmatprep.mubr.f32.mxu1 %v6323_v0  ;;  %4654 = vmatprep.subr.bf16.mxu0 %v6498_v16  ;;  %v6637_v59 = vrot.slane %v179_v33, %v191_v55 }
  0x8a   :  { %284 = vmatmul.mubr.f32.gmra.mrb[6].mxu0 %v110_v22  ;;  %4686 = vmatprep.subr.bf16.mxu1 %v6501_v19 }
  0x8b   :  { %397 = vmatmul.mubr.f32.gmra.mrb[6].mxu1 %v110_v22  ;;  %4656 = vmatpush1.bf16.msra.mxu0 %v6504_v23  ;;  %v6557_v22 = vpack.c.bf16 %v529_v12, %v525_v11 }
  0x8c   :  { %4688 = vmatpush1.bf16.msra.mxu1 %v6508_v26  ;;  %289 = vmatprep.mubr.f32.mxu0 %v6323_v0 }
  0x8d   :  { %402 = vmatprep.mubr.f32.mxu1 %v6323_v0  ;;  %4658 = vmatprep.subr.bf16.mxu0 %v6512_v29 }
  0x8e   :  { %290 = vmatmul.mubr.f32.gmra.mrb[8].mxu0 %v111_v35  ;;  %4690 = vmatprep.subr.bf16.mxu1 %v6515_v32 }
  0x8f   :  { %403 = vmatmul.mubr.f32.gmra.mrb[8].mxu1 %v111_v35  ;;  %4660 = vmatpush1.bf16.msra.mxu0 %v6518_v36  ;;  %v6620_v35 = vrot.slane %v179_v33, %v183_v31 }
  0x90   :  { %4692 = vmatpush1.bf16.msra.mxu1 %v6522_v40  ;;  %295 = vmatprep.mubr.f32.mxu0 %v6323_v0 }
  0x91   :  { %408 = vmatprep.mubr.f32.mxu1 %v6323_v0  ;;  %4662 = vmatprep.subr.bf16.mxu0 %v6526_v44 }
  0x92   :  { %296 = vmatmul.mubr.f32.gmra.mrb[10].mxu0 %v112_v52  ;;  %4694 = vmatprep.subr.bf16.mxu1 %v6529_v48 }
  0x93   :  { %409 = vmatmul.mubr.f32.gmra.mrb[10].mxu1 %v112_v52  ;;  %4664 = vmatpush1.bf16.msra.mxu0 %v6532_v54  ;;  %v6631_v52 = vrot.slane %v179_v33, %v195_v37 }
  0x94   :  { %4696 = vmatpush1.bf16.msra.mxu1 %v6536_v58  ;;  %301 = vmatprep.mubr.f32.mxu0 %v6323_v0 }
  0x95   :  { %414 = vmatprep.mubr.f32.mxu1 %v6323_v0  ;;  %4666 = vmatprep.subr.bf16.mxu0 %v6540_v62 }
  0x96   :  { %302 = vmatmul.mubr.f32.gmra.mrb[12].mxu0 %v113_v8  ;;  %4698 = vmatprep.subr.bf16.mxu1 %v6543_v4 }
  0x97   :  { %415 = vmatmul.mubr.f32.gmra.mrb[12].mxu1 %v113_v8  ;;  %4668 = vmatpush1.bf16.msra.mxu0 %v6546_v9 }
  0x98   :  { %4700 = vmatpush1.bf16.msra.mxu1 %v6550_v14  ;;  %307 = vmatprep.mubr.f32.mxu0 %v6323_v0 }
  0x99   :  { %420 = vmatprep.mubr.f32.mxu1 %v6323_v0  ;;  %4670 = vmatprep.subr.bf16.mxu0 %v6554_v18 }
  0x9a   :  { %308 = vmatmul.mubr.f32.gmra.mrb[14].mxu0 %v114_v24  ;;  %4702 = vmatprep.subr.bf16.mxu1 %v6557_v22 }
  0x9b   :  { %421 = vmatmul.mubr.f32.gmra.mrb[14].mxu1 %v114_v24  ;;  %4672 = vmatpush1.bf16.msra.mxu0 %v6560_v25 }
  0x9c   :  { %4704 = vmatpush1.bf16.msra.mxu1 %v6564_v27  ;;  %594 = vmatprep.mubr.f32.mxu0 %v6323_v0 }
  0x9d   :  { %665 = vmatprep.mubr.f32.mxu1 %v6323_v0  ;;  %4706 = vmatprep.subr.bf16.mxu0 %v6461_v38 }
  0x9e   :  { %595 = vmatmul.mubr.f32.vlgmr.msra.gmra.mrb[0].mxu0 %v6323_v0  ;;  %4738 = vmatprep.subr.bf16.mxu1 %v6463_v41 }
  0x9f   :  { %666 = vmatmul.mubr.f32.vlgmr.msra.gmra.mrb[0].mxu1 %v6323_v0  ;;  %4708 = vmatpush1.bf16.msra.mxu0 %v6465_v47 }
  0xa0   :  { %4740 = vmatpush1.bf16.msra.mxu1 %v6468_v50  ;;  %4710 = vmatprep.subr.bf16.mxu0 %v6471_v53 }
  0xa1   :  { %4742 = vmatprep.subr.bf16.mxu1 %v6473_v56  ;;  %836 = vmatprep.mubr.f32.mxu0 %v6323_v0 }
  0xa2   :  { %907 = vmatprep.mubr.f32.mxu1 %v6323_v0 }
  0xa3   :  { %4712 = vmatpush1.bf16.msra.mxu0 %v6476_v60 }
  0xa4   :  { %4744 = vmatpush1.bf16.msra.mxu1 %v6480_v63  ;;  %4714 = vmatprep.subr.bf16.mxu0 %v6484_v3 }
  0xa5   :  { %4746 = vmatprep.subr.bf16.mxu1 %v6487_v6 }
  0xa7   :  { %4716 = vmatpush1.bf16.msra.mxu0 %v6490_v10 }
  0xa8   :  { %4748 = vmatpush1.bf16.msra.mxu1 %v6494_v13  ;;  %4718 = vmatprep.subr.bf16.mxu0 %v6498_v16 }
  0xa9   :  { %4750 = vmatprep.subr.bf16.mxu1 %v6501_v19 }
  0xab   :  { %4720 = vmatpush1.bf16.msra.mxu0 %v6504_v23 }
  0xac   :  { %4752 = vmatpush1.bf16.msra.mxu1 %v6508_v26  ;;  %4722 = vmatprep.subr.bf16.mxu0 %v6512_v29 }
  0xad   :  { %4754 = vmatprep.subr.bf16.mxu1 %v6515_v32 }
  0xaf   :  { %4724 = vmatpush1.bf16.msra.mxu0 %v6518_v36 }
  0xb0   :  { %4756 = vmatpush1.bf16.msra.mxu1 %v6522_v40  ;;  %4726 = vmatprep.subr.bf16.mxu0 %v6526_v44 }
  0xb1   :  { %4758 = vmatprep.subr.bf16.mxu1 %v6529_v48 }
  0xb3   :  { %4728 = vmatpush1.bf16.msra.mxu0 %v6532_v54 }
  0xb4   :  { %4760 = vmatpush1.bf16.msra.mxu1 %v6536_v58  ;;  %4730 = vmatprep.subr.bf16.mxu0 %v6540_v62 }
  0xb5   :  { %4762 = vmatprep.subr.bf16.mxu1 %v6543_v4 }
  0xb7   :  { %4732 = vmatpush1.bf16.msra.mxu0 %v6546_v9 }
  0xb8   :  { %4764 = vmatpush1.bf16.msra.mxu1 %v6550_v14  ;;  %4734 = vmatprep.subr.bf16.mxu0 %v6554_v18 }
  0xb9   :  { %4766 = vmatprep.subr.bf16.mxu1 %v6557_v22 }
  0xbb   :  { %4736 = vmatpush1.bf16.msra.mxu0 %v6560_v25 }
  0xbc   :  { %4768 = vmatpush1.bf16.msra.mxu1 %v6564_v27  ;;  %4770 = vmatprep.subr.bf16.mxu0 %v6461_v38  ;;  %v6624_v38 = vrot.slane %v179_v33, %v187_v34 }
  0xbd   :  { %4802 = vmatprep.subr.bf16.mxu1 %v6463_v41 }
 0x171   :  { %v596_v41 = vpop.f32.mrb[0].mxu0 }
 0x172   :  { %v5777_v39 = vadd.f32 %v596_v41, %v6620_v35  ;;  %v667_v42 = vpop.f32.mrb[0].mxu1  ;;  %v598_v43 = vpop.f32.mrb[1].mxu0 }
 0x173   :  { %v5778_v45 = vadd.f32 %v598_v43, %v6624_v38  ;;  %v669_v46 = vpop.f32.mrb[1].mxu1  ;;  %v5793_v1 = vadd.f32 %v667_v42, %v6637_v59 }
 0x174   :  { %v4423_v49 = vmul.f32 -1.442695, %v5777_v39  ;;  %v5794_v57 = vadd.f32 %v669_v46, %v6631_v52 }
 0x175   :  { %v4424_v51 = vmul.f32 -1.442695, %v5778_v45 }
 0x176   :  { %5918 = vpow2.f32 %v4423_v49  ;;  %v4425_v61 = vmul.f32 -1.442695, %v5794_v57 }
 0x177   :  { %5920 = vpow2.f32 %v4424_v51 }
 0x178   :  { %5922 = vpow2.f32 %v4425_v61 }
 0x179   :  { %5924 = vtanh.f32 %v5793_v1 }
 0x180   :  { %v5919_v2 = vpop.eup %5918 }
 0x181   :  { %v5921_v5 = vpop.eup %5920  ;;  %v679_v7 = vadd.f32 1.0, %v5919_v2 }
 0x182   :  { %v685_v8 = vadd.f32 1.0, %v5921_v5  ;;  %v5923_v11 = vpop.eup %5922 }
 0x183   :  { %5926 = vrcp.f32 %v679_v7  ;;  %v5925_v12 = vpop.eup %5924  ;;  %v692_v21 = vadd.f32 1.0, %v5923_v11 }
 0x184   :  { %5928 = vrcp.f32 %v685_v8 }
 0x185   :  { %5930 = vrcp.f32 %v692_v21 }
 0x18d   :  { %v5927_v15 = vpop.eup %5926 }
 0x18e   :  { %v5929_v17 = vpop.eup %5928  ;;  %v696_v20 = vmul.f32 %v5927_v15, %v5925_v12 }
 0x18f   :  { %v695_v24 = vmul.f32 0.0, %v5929_v17  ;;  %v5931_v33 = vpop.eup %5930 }
 0x191   :  { %v6640_v28 = vadd.f32 %v696_v20, %v695_v24 }
 0x193   :  { %5932 = vtanh.f32 %v6640_v28 }
 0x19d   :  { %v5933_v41 = vpop.eup %5932 }
 0x19e   :  { %v6643_v39 = vmul.f32 %v5933_v41, %v5931_v33  ;;  %v1195_v33 = vld [vmem:[#allocation9 + $0x8] sm:$0xff] }
 0x19f   :  { %v1199_v41 = vld [vmem:[#allocation9 + $0x28] sm:$0xff] }
 0x1a0   :  { %837 = vmatmul.mubr.f32.vlgmr.msra.gmra.mrb[2].mxu0 %v6643_v39  ;;  %908 = vmatmul.mubr.f32.vlgmr.msra.gmra.mrb[2].mxu1 %v6643_v39 }
 0x1a1   :  { %4772 = vmatpush1.bf16.msra.mxu0 %v6465_v47  ;;  %4804 = vmatpush1.bf16.msra.mxu1 %v6468_v50 }
 0x1a2   :  { %4774 = vmatprep.subr.bf16.mxu0 %v6471_v53  ;;  %4806 = vmatprep.subr.bf16.mxu1 %v6473_v56 }
 0x1a3   :  { %1079 = vmatprep.mubr.f32.mxu0 %v6323_v0  ;;  %1150 = vmatprep.mubr.f32.mxu1 %v6323_v0 }
 0x1a5   :  { %4776 = vmatpush1.bf16.msra.mxu0 %v6476_v60  ;;  %4808 = vmatpush1.bf16.msra.mxu1 %v6480_v63 }
 0x1a6   :  { %4778 = vmatprep.subr.bf16.mxu0 %v6484_v3  ;;  %4810 = vmatprep.subr.bf16.mxu1 %v6487_v6 }
 0x1a9   :  { %4780 = vmatpush1.bf16.msra.mxu0 %v6490_v10  ;;  %4812 = vmatpush1.bf16.msra.mxu1 %v6494_v13 }
 0x1aa   :  { %4782 = vmatprep.subr.bf16.mxu0 %v6498_v16  ;;  %4814 = vmatprep.subr.bf16.mxu1 %v6501_v19 }
 0x1ad   :  { %4784 = vmatpush1.bf16.msra.mxu0 %v6504_v23  ;;  %4816 = vmatpush1.bf16.msra.mxu1 %v6508_v26 }
 0x1ae   :  { %4786 = vmatprep.subr.bf16.mxu0 %v6512_v29  ;;  %4818 = vmatprep.subr.bf16.mxu1 %v6515_v32 }
 0x1b1   :  { %4788 = vmatpush1.bf16.msra.mxu0 %v6518_v36  ;;  %4820 = vmatpush1.bf16.msra.mxu1 %v6522_v40 }
 0x1b2   :  { %4790 = vmatprep.subr.bf16.mxu0 %v6526_v44  ;;  %4822 = vmatprep.subr.bf16.mxu1 %v6529_v48 }
 0x1b5   :  { %4792 = vmatpush1.bf16.msra.mxu0 %v6532_v54  ;;  %4824 = vmatpush1.bf16.msra.mxu1 %v6536_v58 }
 0x1b6   :  { %4794 = vmatprep.subr.bf16.mxu0 %v6540_v62  ;;  %4826 = vmatprep.subr.bf16.mxu1 %v6543_v4 }
 0x1b9   :  { %4796 = vmatpush1.bf16.msra.mxu0 %v6546_v9  ;;  %4828 = vmatpush1.bf16.msra.mxu1 %v6550_v14 }
 0x1ba   :  { %4798 = vmatprep.subr.bf16.mxu0 %v6554_v18  ;;  %4830 = vmatprep.subr.bf16.mxu1 %v6557_v22 }
 0x1bd   :  { %4800 = vmatpush1.bf16.msra.mxu0 %v6560_v25  ;;  %4832 = vmatpush1.bf16.msra.mxu1 %v6564_v27 }
 0x273   :  { %v838_v47 = vpop.f32.mrb[2].mxu0  ;;  %v909_v50 = vpop.f32.mrb[2].mxu1 }
 0x274   :  { %v5779_v53 = vadd.f32 %v838_v47, %v6620_v35  ;;  %v840_v56 = vpop.f32.mrb[3].mxu0  ;;  %v911_v60 = vpop.f32.mrb[3].mxu1  ;;  %v5795_v49 = vadd.f32 %v909_v50, %v6637_v59  ;;  %v6693_v47 = vpack.c.bf16 %v1199_v41, %v1195_v33  ;;  %v1201_v50 = vld [vmem:[#allocation9 + $0x38] sm:$0xff] }
 0x275   :  { %v5780_v63 = vadd.f32 %v840_v56, %v6624_v38  ;;  %v5796_v45 = vadd.f32 %v911_v60, %v6631_v52  ;;  %v1198_v56 = vld [vmem:[#allocation9 + $0x20] sm:$0xff]  ;;  %v1456_v33 = vld [vmem:[#allocation9 + $0x98] sm:$0xff] }
 0x276   :  { %v4426_v42 = vmul.f32 -1.442695, %v5779_v53  ;;  %v1194_v53 = vld [vmem:[#allocation9] sm:$0xff]  ;;  %4834 = vmatprep.subr.bf16.mxu0 %v6693_v47 }
 0x277   :  { %v4427_v43 = vmul.f32 -1.442695, %v5780_v63  ;;  %v4428_v46 = vmul.f32 -1.442695, %v5796_v45  ;;  %v6697_v63 = vpack.c.bf16 %v1198_v56, %v1194_v53  ;;  %v1457_v53 = vld [vmem:[#allocation9 + $0xa0] sm:$0xff] }
 0x278   :  { %5934 = vpow2.f32 %v4426_v42  ;;  %v1196_v42 = vld [vmem:[#allocation9 + $0x10] sm:$0xff] }
 0x279   :  { %5936 = vpow2.f32 %v4427_v43  ;;  %v1200_v43 = vld [vmem:[#allocation9 + $0x30] sm:$0xff] }
 0x27a   :  { %5938 = vpow2.f32 %v4428_v46  ;;  %v6700_v45 = vpack.c.bf16 %v1200_v43, %v1196_v42  ;;  %v1203_v46 = vld [vmem:[#allocation9 + $0x48] sm:$0xff]  ;;  %v1455_v43 = vld [vmem:[#allocation9 + $0x90] sm:$0xff] }
 0x27b   :  { %5940 = vtanh.f32 %v5795_v49  ;;  %v1207_v49 = vld [vmem:[#allocation9 + $0x68] sm:$0xff] }
 0x282   :  { %v5935_v51 = vpop.eup %5934 }
 0x283   :  { %v5937_v57 = vpop.eup %5936  ;;  %v921_v61 = vadd.f32 1.0, %v5935_v51  ;;  %v1205_v51 = vld [vmem:[#allocation9 + $0x58] sm:$0xff] }
 0x284   :  { %v927_v1 = vadd.f32 1.0, %v5937_v57  ;;  %v5939_v2 = vpop.eup %5938  ;;  %v6705_v57 = vpack.c.bf16 %v1207_v49, %v1203_v46  ;;  %v1459_v46 = vld [vmem:[#allocation9 + $0xb0] sm:$0xff] }
 0x285   :  { %5942 = vrcp.f32 %v921_v61  ;;  %v5941_v5 = vpop.eup %5940  ;;  %v934_v12 = vadd.f32 1.0, %v5939_v2  ;;  %v1209_v61 = vld [vmem:[#allocation9 + $0x78] sm:$0xff]  ;;  %v1206_v2 = vld [vmem:[#allocation9 + $0x60] sm:$0xff]  ;;  %v6770_v49 = vpack.c.bf16 %v1459_v46, %v1455_v43  ;;  %v1490_v46 = vld [vmem:[#allocation9 + $0x1a8] sm:$0xff] }
 0x286   :  { %5944 = vrcp.f32 %v927_v1  ;;  %v1202_v1 = vld [vmem:[#allocation9 + $0x40] sm:$0xff] }
 0x287   :  { %5946 = vrcp.f32 %v934_v12 }
 0x28f   :  { %v5943_v7 = vpop.eup %5942 }
 0x290   :  { %v5945_v8 = vpop.eup %5944  ;;  %v938_v11 = vmul.f32 %v5943_v7, %v5941_v5  ;;  %v6707_v5 = vpack.c.bf16 %v1209_v61, %v1205_v51  ;;  %v6709_v7 = vpack.c.bf16 %v1206_v2, %v1202_v1  ;;  %v1462_v51 = vld [vmem:[#allocation9 + $0xc8] sm:$0xff]  ;;  %v1464_v1 = vld [vmem:[#allocation9 + $0xd8] sm:$0xff] }
 0x291   :  { %v937_v15 = vmul.f32 %v5945_v8, %v6640_v28  ;;  %v5947_v20 = vpop.eup %5946  ;;  %v1197_v28 = vld [vmem:[#allocation9 + $0x18] sm:$0xff]  ;;  %v1204_v8 = vld [vmem:[#allocation9 + $0x50] sm:$0xff]  ;;  %v1466_v61 = vld [vmem:[#allocation9 + $0xe8] sm:$0xff] }
 0x292   :  { %v6695_v60 = vpack.c.bf16 %v1201_v50, %v1197_v28  ;;  %v1460_v28 = vld [vmem:[#allocation9 + $0xb8] sm:$0xff]  ;;  %v1453_v50 = vld [vmem:[#allocation9 + $0x80] sm:$0xff]  ;;  %v6775_v2 = vpack.c.bf16 %v1466_v61, %v1462_v51 }
 0x293   :  { %v6684_v17 = vadd.f32 %v938_v11, %v937_v15  ;;  %v1208_v11 = vld [vmem:[#allocation9 + $0x70] sm:$0xff]  ;;  %v6765_v56 = vpack.c.bf16 %v1460_v28, %v1456_v33  ;;  %v6767_v42 = vpack.c.bf16 %v1457_v53, %v1453_v50  ;;  %v1486_v53 = vld [vmem:[#allocation9 + $0x188] sm:$0xff]  ;;  %v1488_v51 = vld [vmem:[#allocation9 + $0x198] sm:$0xff] }
 0x294   :  { %4866 = vmatprep.subr.bf16.mxu1 %v6695_v60  ;;  %v6712_v12 = vpack.c.bf16 %v1208_v11, %v1204_v8  ;;  %v1468_v8 = vld [vmem:[#allocation9 + $0xf8] sm:$0xff]  ;;  %v1461_v11 = vld [vmem:[#allocation9 + $0xc0] sm:$0xff]  ;;  %v1479_v28 = vld [vmem:[#allocation9 + $0x150] sm:$0xff] }
 0x295   :  { %5948 = vtanh.f32 %v6684_v17  ;;  %v1483_v50 = vld [vmem:[#allocation9 + $0x170] sm:$0xff]  ;;  %v1492_v61 = vld [vmem:[#allocation9 + $0x1b8] sm:$0xff] }
 0x296   :  { %v6806_v43 = vpack.c.bf16 %v1483_v50, %v1479_v28 }
 0x29f   :  { %v5949_v21 = vpop.eup %5948 }
 0x2a0   :  { %v6687_v24 = vmul.f32 %v5949_v21, %v5947_v20  ;;  %v1458_v21 = vld [vmem:[#allocation9 + $0xa8] sm:$0xff] }
 0x2a2   :  { %1080 = vmatmul.mubr.f32.vlgmr.msra.gmra.mrb[4].mxu0 %v6687_v24  ;;  %1151 = vmatmul.mubr.f32.vlgmr.msra.gmra.mrb[4].mxu1 %v6687_v24 }
 0x2a3   :  { %1322 = vmatprep.mubr.f32.mxu0 %v6323_v0  ;;  %1393 = vmatprep.mubr.f32.mxu1 %v6323_v0 }
 0x2a4   :  { %4836 = vmatpush1.bf16.msra.mxu0 %v6697_v63  ;;  %4868 = vmatpush1.bf16.msra.mxu1 %v6700_v45 }
 0x2a5   :  { %4838 = vmatprep.subr.bf16.mxu0 %v6705_v57  ;;  %4870 = vmatprep.subr.bf16.mxu1 %v6707_v5 }
 0x2a8   :  { %4840 = vmatpush1.bf16.msra.mxu0 %v6709_v7  ;;  %4872 = vmatpush1.bf16.msra.mxu1 %v6712_v12 }
 0x2a9   :  { %4842 = vmatprep.subr.bf16.mxu0 %v6484_v3  ;;  %4874 = vmatprep.subr.bf16.mxu1 %v6487_v6 }
 0x2ac   :  { %4844 = vmatpush1.bf16.msra.mxu0 %v6490_v10  ;;  %4876 = vmatpush1.bf16.msra.mxu1 %v6494_v13 }
 0x2ad   :  { %4846 = vmatprep.subr.bf16.mxu0 %v6498_v16  ;;  %4878 = vmatprep.subr.bf16.mxu1 %v6501_v19 }
 0x2b0   :  { %4848 = vmatpush1.bf16.msra.mxu0 %v6504_v23  ;;  %4880 = vmatpush1.bf16.msra.mxu1 %v6508_v26 }
 0x2b1   :  { %4850 = vmatprep.subr.bf16.mxu0 %v6512_v29  ;;  %4882 = vmatprep.subr.bf16.mxu1 %v6515_v32 }
 0x2b4   :  { %4852 = vmatpush1.bf16.msra.mxu0 %v6518_v36  ;;  %4884 = vmatpush1.bf16.msra.mxu1 %v6522_v40 }
 0x2b5   :  { %4854 = vmatprep.subr.bf16.mxu0 %v6526_v44  ;;  %4886 = vmatprep.subr.bf16.mxu1 %v6529_v48 }
 0x2b8   :  { %4856 = vmatpush1.bf16.msra.mxu0 %v6532_v54  ;;  %4888 = vmatpush1.bf16.msra.mxu1 %v6536_v58 }
 0x2b9   :  { %4858 = vmatprep.subr.bf16.mxu0 %v6540_v62  ;;  %4890 = vmatprep.subr.bf16.mxu1 %v6543_v4 }
 0x2bc   :  { %4860 = vmatpush1.bf16.msra.mxu0 %v6546_v9  ;;  %4892 = vmatpush1.bf16.msra.mxu1 %v6550_v14 }
 0x2bd   :  { %4862 = vmatprep.subr.bf16.mxu0 %v6554_v18  ;;  %4894 = vmatprep.subr.bf16.mxu1 %v6557_v22 }
 0x2c0   :  { %4864 = vmatpush1.bf16.msra.mxu0 %v6560_v25  ;;  %4896 = vmatpush1.bf16.msra.mxu1 %v6564_v27 }
 0x2c1   :  { %4898 = vmatprep.subr.bf16.mxu0 %v6693_v47  ;;  %4930 = vmatprep.subr.bf16.mxu1 %v6695_v60 }
 0x375   :  { %v1081_v3 = vpop.f32.mrb[4].mxu0  ;;  %v1152_v6 = vpop.f32.mrb[4].mxu1 }
 0x376   :  { %v5781_v10 = vadd.f32 %v1081_v3, %v6620_v35  ;;  %v1083_v13 = vpop.f32.mrb[5].mxu0  ;;  %v1154_v16 = vpop.f32.mrb[5].mxu1  ;;  %v5797_v36 = vadd.f32 %v1152_v6, %v6637_v59  ;;  %v1465_v3 = vld [vmem:[#allocation9 + $0xe0] sm:$0xff]  ;;  %v6777_v6 = vpack.c.bf16 %v1468_v8, %v1464_v1  ;;  %v6809_v1 = vpack.c.bf16 %v1490_v46, %v1486_v53 }
 0x377   :  { %v5782_v19 = vadd.f32 %v1083_v13, %v6624_v38  ;;  %v5798_v29 = vadd.f32 %v1154_v16, %v6631_v52  ;;  %v1463_v13 = vld [vmem:[#allocation9 + $0xd0] sm:$0xff]  ;;  %v6811_v8 = vpack.c.bf16 %v1492_v61, %v1488_v51 }
 0x378   :  { %v4429_v23 = vmul.f32 -1.442695, %v5781_v10  ;;  %v6779_v10 = vpack.c.bf16 %v1465_v3, %v1461_v11  ;;  %v1467_v16 = vld [vmem:[#allocation9 + $0xf0] sm:$0xff]  ;;  %v1485_v11 = vld [vmem:[#allocation9 + $0x180] sm:$0xff] }
 0x379   :  { %v4430_v26 = vmul.f32 -1.442695, %v5782_v19  ;;  %v4431_v32 = vmul.f32 -1.442695, %v5798_v29  ;;  %v6782_v19 = vpack.c.bf16 %v1467_v16, %v1463_v13  ;;  %v1472_v29 = vld [vmem:[#allocation9 + $0x118] sm:$0xff]  ;;  %v1489_v3 = vld [vmem:[#allocation9 + $0x1a0] sm:$0xff] }
 0x37a   :  { %5950 = vpow2.f32 %v4429_v23  ;;  %v1470_v23 = vld [vmem:[#allocation9 + $0x108] sm:$0xff]  ;;  %v1487_v13 = vld [vmem:[#allocation9 + $0x190] sm:$0xff]  ;;  %v6814_v16 = vpack.c.bf16 %v1489_v3, %v1485_v11 }
 0x37b   :  { %5952 = vpow2.f32 %v4430_v26  ;;  %v1474_v26 = vld [vmem:[#allocation9 + $0x128] sm:$0xff] }
 0x37c   :  { %5954 = vpow2.f32 %v4431_v32  ;;  %v6787_v32 = vpack.c.bf16 %v1474_v26, %v1470_v23  ;;  %v1491_v23 = vld [vmem:[#allocation9 + $0x1b0] sm:$0xff]  ;;  %v1494_v26 = vld [vmem:[#allocation9 + $0x1c8] sm:$0xff] }
 0x37d   :  { %5956 = vtanh.f32 %v5797_v36  ;;  %v1476_v36 = vld [vmem:[#allocation9 + $0x138] sm:$0xff] }
 0x384   :  { %v5951_v40 = vpop.eup %5950 }
 0x385   :  { %v5953_v44 = vpop.eup %5952  ;;  %v1164_v48 = vadd.f32 1.0, %v5951_v40  ;;  %v1469_v40 = vld [vmem:[#allocation9 + $0x100] sm:$0xff] }
 0x386   :  { %v1170_v54 = vadd.f32 1.0, %v5953_v44  ;;  %v5955_v58 = vpop.eup %5954  ;;  %v1473_v44 = vld [vmem:[#allocation9 + $0x120] sm:$0xff] }
 0x387   :  { %5958 = vrcp.f32 %v1164_v48  ;;  %v5957_v62 = vpop.eup %5956  ;;  %v1177_v18 = vadd.f32 1.0, %v5955_v58  ;;  %v6789_v48 = vpack.c.bf16 %v1476_v36, %v1472_v29  ;;  %v1471_v58 = vld [vmem:[#allocation9 + $0x110] sm:$0xff]  ;;  %v1498_v29 = vld [vmem:[#allocation9 + $0x1e8] sm:$0xff]  ;;  %v6818_v36 = vpack.c.bf16 %v1491_v23, %v1487_v13 }
 0x388   :  { %5960 = vrcp.f32 %v1170_v54  ;;  %v6791_v54 = vpack.c.bf16 %v1473_v44, %v1469_v40  ;;  %v6820_v40 = vpack.c.bf16 %v1498_v29, %v1494_v26  ;;  %v1496_v44 = vld [vmem:[#allocation9 + $0x1d8] sm:$0xff] }
 0x389   :  { %5962 = vrcp.f32 %v1177_v18  ;;  %v1480_v18 = vld [vmem:[#allocation9 + $0x158] sm:$0xff] }
 0x391   :  { %v5959_v4 = vpop.eup %5958 }
 0x392   :  { %v5961_v9 = vpop.eup %5960  ;;  %v1181_v14 = vmul.f32 %v5959_v4, %v5957_v62  ;;  %v1475_v62 = vld [vmem:[#allocation9 + $0x130] sm:$0xff] }
 0x393   :  { %v1180_v22 = vmul.f32 %v5961_v9, %v6684_v17  ;;  %v5963_v27 = vpop.eup %5962  ;;  %v1454_v17 = vld [vmem:[#allocation9 + $0x88] sm:$0xff]  ;;  %v6794_v4 = vpack.c.bf16 %v1475_v62, %v1471_v58  ;;  %v1500_v58 = vld [vmem:[#allocation9 + $0x1f8] sm:$0xff]  ;;  %v1493_v62 = vld [vmem:[#allocation9 + $0x1c0] sm:$0xff] }
 0x394   :  { %v6763_v41 = vpack.c.bf16 %v1458_v21, %v1454_v17  ;;  %v1478_v9 = vld [vmem:[#allocation9 + $0x148] sm:$0xff]  ;;  %v1481_v17 = vld [vmem:[#allocation9 + $0x160] sm:$0xff] }
 0x395   :  { %v6748_v25 = vadd.f32 %v1181_v14, %v1180_v22  ;;  %v1482_v14 = vld [vmem:[#allocation9 + $0x168] sm:$0xff] }
 0x396   :  { %v6798_v22 = vpack.c.bf16 %v1482_v14, %v1478_v9  ;;  %v6823_v9 = vpack.c.bf16 %v1500_v58, %v1496_v44  ;;  %v1497_v14 = vld [vmem:[#allocation9 + $0x1e0] sm:$0xff] }
 0x397   :  { %5964 = vtanh.f32 %v6748_v25 }
 0x3a1   :  { %v5965_v15 = vpop.eup %5964 }
 0x3a2   :  { %v6751_v20 = vmul.f32 %v5965_v15, %v5963_v27  ;;  %v1484_v27 = vld [vmem:[#allocation9 + $0x178] sm:$0xff]  ;;  %v1477_v15 = vld [vmem:[#allocation9 + $0x140] sm:$0xff] }
 0x3a3   :  { %v6801_v21 = vpack.c.bf16 %v1484_v27, %v1480_v18  ;;  %v6803_v33 = vpack.c.bf16 %v1481_v17, %v1477_v15  ;;  %v1495_v18 = vld [vmem:[#allocation9 + $0x1d0] sm:$0xff]  ;;  %v6826_v15 = vpack.c.bf16 %v1497_v14, %v1493_v62 }
 0x3a4   :  { %1323 = vmatmul.mubr.f32.vlgmr.msra.gmra.mrb[6].mxu0 %v6751_v20  ;;  %1394 = vmatmul.mubr.f32.vlgmr.msra.gmra.mrb[6].mxu1 %v6751_v20  ;;  %v1499_v27 = vld [vmem:[#allocation9 + $0x1f0] sm:$0xff] }
 0x3a5   :  { %4900 = vmatpush1.bf16.msra.mxu0 %v6697_v63  ;;  %4932 = vmatpush1.bf16.msra.mxu1 %v6700_v45  ;;  %v6830_v17 = vpack.c.bf16 %v1499_v27, %v1495_v18 }
 0x3a6   :  { %4902 = vmatprep.subr.bf16.mxu0 %v6705_v57  ;;  %4934 = vmatprep.subr.bf16.mxu1 %v6707_v5 }
 0x3a7   :  { %1565 = vmatprep.mubr.f32.mxu0 %v6323_v0  ;;  %1636 = vmatprep.mubr.f32.mxu1 %v6323_v0 }
 0x3a9   :  { %4904 = vmatpush1.bf16.msra.mxu0 %v6709_v7  ;;  %4936 = vmatpush1.bf16.msra.mxu1 %v6712_v12 }
 0x3aa   :  { %4906 = vmatprep.subr.bf16.mxu0 %v6763_v41  ;;  %4938 = vmatprep.subr.bf16.mxu1 %v6765_v56 }
 0x3ad   :  { %4908 = vmatpush1.bf16.msra.mxu0 %v6767_v42  ;;  %4940 = vmatpush1.bf16.msra.mxu1 %v6770_v49 }
 0x3ae   :  { %4910 = vmatprep.subr.bf16.mxu0 %v6775_v2  ;;  %4942 = vmatprep.subr.bf16.mxu1 %v6777_v6 }
 0x3b1   :  { %4912 = vmatpush1.bf16.msra.mxu0 %v6779_v10  ;;  %4944 = vmatpush1.bf16.msra.mxu1 %v6782_v19 }
 0x3b2   :  { %4914 = vmatprep.subr.bf16.mxu0 %v6787_v32  ;;  %4946 = vmatprep.subr.bf16.mxu1 %v6789_v48 }
 0x3b5   :  { %4916 = vmatpush1.bf16.msra.mxu0 %v6791_v54  ;;  %4948 = vmatpush1.bf16.msra.mxu1 %v6794_v4 }
 0x3b6   :  { %4918 = vmatprep.subr.bf16.mxu0 %v6798_v22  ;;  %4950 = vmatprep.subr.bf16.mxu1 %v6801_v21 }
 0x3b9   :  { %4920 = vmatpush1.bf16.msra.mxu0 %v6803_v33  ;;  %4952 = vmatpush1.bf16.msra.mxu1 %v6806_v43 }
 0x3ba   :  { %4922 = vmatprep.subr.bf16.mxu0 %v6809_v1  ;;  %4954 = vmatprep.subr.bf16.mxu1 %v6811_v8 }
 0x3bd   :  { %4924 = vmatpush1.bf16.msra.mxu0 %v6814_v16  ;;  %4956 = vmatpush1.bf16.msra.mxu1 %v6818_v36 }
 0x3be   :  { %4926 = vmatprep.subr.bf16.mxu0 %v6820_v40  ;;  %4958 = vmatprep.subr.bf16.mxu1 %v6823_v9 }
 0x3c1   :  { %4928 = vmatpush1.bf16.msra.mxu0 %v6826_v15  ;;  %4960 = vmatpush1.bf16.msra.mxu1 %v6830_v17 }
 0x3c2   :  { %4962 = vmatprep.subr.bf16.mxu0 %v6693_v47  ;;  %4994 = vmatprep.subr.bf16.mxu1 %v6695_v60 }
 0x477   :  { %v1324_v28 = vpop.f32.mrb[6].mxu0  ;;  %v1395_v50 = vpop.f32.mrb[6].mxu1 }
 0x478   :  { %v5783_v53 = vadd.f32 %v1324_v28, %v6620_v35  ;;  %v1326_v46 = vpop.f32.mrb[7].mxu0  ;;  %v1397_v51 = vpop.f32.mrb[7].mxu1  ;;  %v5799_v26 = vadd.f32 %v1395_v50, %v6637_v59 }
 0x479   :  { %v5784_v61 = vadd.f32 %v1326_v46, %v6624_v38  ;;  %v5800_v13 = vadd.f32 %v1397_v51, %v6631_v52 }
 0x47a   :  { %v4432_v11 = vmul.f32 -1.442695, %v5783_v53 }
 0x47b   :  { %v4433_v3 = vmul.f32 -1.442695, %v5784_v61  ;;  %v4434_v23 = vmul.f32 -1.442695, %v5800_v13 }
 0x47c   :  { %5966 = vpow2.f32 %v4432_v11 }
 0x47d   :  { %5968 = vpow2.f32 %v4433_v3 }
 0x47e   :  { %5970 = vpow2.f32 %v4434_v23 }
 0x47f   :  { %5972 = vtanh.f32 %v5799_v26 }
 0x486   :  { %v5967_v29 = vpop.eup %5966 }
 0x487   :  { %v5969_v44 = vpop.eup %5968  ;;  %v1407_v58 = vadd.f32 1.0, %v5967_v29 }
 0x488   :  { %v1413_v62 = vadd.f32 1.0, %v5969_v44  ;;  %v5971_v14 = vpop.eup %5970 }
 0x489   :  { %5974 = vrcp.f32 %v1407_v58  ;;  %v5973_v18 = vpop.eup %5972  ;;  %v1420_v46 = vadd.f32 1.0, %v5971_v14 }
 0x48a   :  { %5976 = vrcp.f32 %v1413_v62 }
 0x48b   :  { %5978 = vrcp.f32 %v1420_v46 }
 0x493   :  { %v5975_v27 = vpop.eup %5974 }
 0x494   :  { %v5977_v28 = vpop.eup %5976  ;;  %v1424_v53 = vmul.f32 %v5975_v27, %v5973_v18 }
 0x495   :  { %v1423_v61 = vmul.f32 %v5977_v28, %v6748_v25  ;;  %v5979_v50 = vpop.eup %5978 }
 0x497   :  { %v6842_v51 = vadd.f32 %v1424_v53, %v1423_v61 }
 0x499   :  { %5980 = vtanh.f32 %v6842_v51 }
 0x4a3   :  { %v5981_v11 = vpop.eup %5980 }
 0x4a4   :  { %v6845_v3 = vmul.f32 %v5981_v11, %v5979_v50 }
 0x4a6   :  { %1566 = vmatmul.mubr.f32.vlgmr.msra.gmra.mrb[8].mxu0 %v6845_v3  ;;  %1637 = vmatmul.mubr.f32.vlgmr.msra.gmra.mrb[8].mxu1 %v6845_v3 }
 0x4a7   :  { %4964 = vmatpush1.bf16.msra.mxu0 %v6697_v63  ;;  %4996 = vmatpush1.bf16.msra.mxu1 %v6700_v45 }
 0x4a8   :  { %4966 = vmatprep.subr.bf16.mxu0 %v6705_v57  ;;  %4998 = vmatprep.subr.bf16.mxu1 %v6707_v5 }
 0x4a9   :  { %1808 = vmatprep.mubr.f32.mxu0 %v6323_v0  ;;  %1879 = vmatprep.mubr.f32.mxu1 %v6323_v0 }
 0x4ab   :  { %4968 = vmatpush1.bf16.msra.mxu0 %v6709_v7  ;;  %5000 = vmatpush1.bf16.msra.mxu1 %v6712_v12 }
 0x4ac   :  { %4970 = vmatprep.subr.bf16.mxu0 %v6763_v41  ;;  %5002 = vmatprep.subr.bf16.mxu1 %v6765_v56 }
 0x4af   :  { %4972 = vmatpush1.bf16.msra.mxu0 %v6767_v42  ;;  %5004 = vmatpush1.bf16.msra.mxu1 %v6770_v49 }
 0x4b0   :  { %4974 = vmatprep.subr.bf16.mxu0 %v6775_v2  ;;  %5006 = vmatprep.subr.bf16.mxu1 %v6777_v6 }
 0x4b3   :  { %4976 = vmatpush1.bf16.msra.mxu0 %v6779_v10  ;;  %5008 = vmatpush1.bf16.msra.mxu1 %v6782_v19 }
 0x4b4   :  { %4978 = vmatprep.subr.bf16.mxu0 %v6787_v32  ;;  %5010 = vmatprep.subr.bf16.mxu1 %v6789_v48 }
 0x4b7   :  { %4980 = vmatpush1.bf16.msra.mxu0 %v6791_v54  ;;  %5012 = vmatpush1.bf16.msra.mxu1 %v6794_v4 }
 0x4b8   :  { %4982 = vmatprep.subr.bf16.mxu0 %v6798_v22  ;;  %5014 = vmatprep.subr.bf16.mxu1 %v6801_v21 }
 0x4bb   :  { %4984 = vmatpush1.bf16.msra.mxu0 %v6803_v33  ;;  %5016 = vmatpush1.bf16.msra.mxu1 %v6806_v43 }
 0x4bc   :  { %4986 = vmatprep.subr.bf16.mxu0 %v6809_v1  ;;  %5018 = vmatprep.subr.bf16.mxu1 %v6811_v8 }
 0x4bf   :  { %4988 = vmatpush1.bf16.msra.mxu0 %v6814_v16  ;;  %5020 = vmatpush1.bf16.msra.mxu1 %v6818_v36 }
 0x4c0   :  { %4990 = vmatprep.subr.bf16.mxu0 %v6820_v40  ;;  %5022 = vmatprep.subr.bf16.mxu1 %v6823_v9 }
 0x4c3   :  { %4992 = vmatpush1.bf16.msra.mxu0 %v6826_v15  ;;  %5024 = vmatpush1.bf16.msra.mxu1 %v6830_v17 }
 0x4c4   :  { %5026 = vmatprep.subr.bf16.mxu0 %v6693_v47  ;;  %5058 = vmatprep.subr.bf16.mxu1 %v6695_v60 }
 0x579   :  { %v1567_v25 = vpop.f32.mrb[8].mxu0  ;;  %v1638_v13 = vpop.f32.mrb[8].mxu1 }
 0x57a   :  { %v5785_v23 = vadd.f32 %v1567_v25, %v6620_v35  ;;  %v1569_v26 = vpop.f32.mrb[9].mxu0  ;;  %v1640_v29 = vpop.f32.mrb[9].mxu1  ;;  %v5801_v27 = vadd.f32 %v1638_v13, %v6637_v59 }
 0x57b   :  { %v5786_v44 = vadd.f32 %v1569_v26, %v6624_v38  ;;  %v5802_v14 = vadd.f32 %v1640_v29, %v6631_v52 }
 0x57c   :  { %v4435_v58 = vmul.f32 -1.442695, %v5785_v23 }
 0x57d   :  { %v4436_v62 = vmul.f32 -1.442695, %v5786_v44  ;;  %v4437_v18 = vmul.f32 -1.442695, %v5802_v14 }
 0x57e   :  { %5982 = vpow2.f32 %v4435_v58 }
 0x57f   :  { %5984 = vpow2.f32 %v4436_v62 }
 0x580   :  { %5986 = vpow2.f32 %v4437_v18 }
 0x581   :  { %5988 = vtanh.f32 %v5801_v27 }
 0x588   :  { %v5983_v47 = vpop.eup %5982 }
 0x589   :  { %v5985_v28 = vpop.eup %5984  ;;  %v1650_v60 = vadd.f32 1.0, %v5983_v47 }
 0x58a   :  { %v1656_v53 = vadd.f32 1.0, %v5985_v28  ;;  %v5987_v46 = vpop.eup %5986 }
 0x58b   :  { %5990 = vrcp.f32 %v1650_v60  ;;  %v5989_v61 = vpop.eup %5988  ;;  %v1663_v23 = vadd.f32 1.0, %v5987_v46 }
 0x58c   :  { %5992 = vrcp.f32 %v1656_v53 }
 0x58d   :  { %5994 = vrcp.f32 %v1663_v23 }
 0x595   :  { %v5991_v50 = vpop.eup %5990 }
 0x596   :  { %v5993_v11 = vpop.eup %5992  ;;  %v1667_v25 = vmul.f32 %v5991_v50, %v5989_v61 }
 0x597   :  { %v1666_v26 = vmul.f32 %v5993_v11, %v6842_v51  ;;  %v5995_v13 = vpop.eup %5994 }
 0x599   :  { %v6888_v29 = vadd.f32 %v1667_v25, %v1666_v26 }
 0x59b   :  { %5996 = vtanh.f32 %v6888_v29 }
 0x5a5   :  { %v5997_v44 = vpop.eup %5996 }
 0x5a6   :  { %v6891_v58 = vmul.f32 %v5997_v44, %v5995_v13 }
 0x5a8   :  { %1809 = vmatmul.mubr.f32.vlgmr.msra.gmra.mrb[10].mxu0 %v6891_v58  ;;  %1880 = vmatmul.mubr.f32.vlgmr.msra.gmra.mrb[10].mxu1 %v6891_v58 }
 0x5a9   :  { %5028 = vmatpush1.bf16.msra.mxu0 %v6697_v63  ;;  %5060 = vmatpush1.bf16.msra.mxu1 %v6700_v45 }
 0x5aa   :  { %5030 = vmatprep.subr.bf16.mxu0 %v6705_v57  ;;  %5062 = vmatprep.subr.bf16.mxu1 %v6707_v5 }
 0x5ab   :  { %2051 = vmatprep.mubr.f32.mxu0 %v6323_v0  ;;  %2122 = vmatprep.mubr.f32.mxu1 %v6323_v0 }
 0x5ad   :  { %5032 = vmatpush1.bf16.msra.mxu0 %v6709_v7  ;;  %5064 = vmatpush1.bf16.msra.mxu1 %v6712_v12 }
 0x5ae   :  { %5034 = vmatprep.subr.bf16.mxu0 %v6763_v41  ;;  %5066 = vmatprep.subr.bf16.mxu1 %v6765_v56 }
 0x5b1   :  { %5036 = vmatpush1.bf16.msra.mxu0 %v6767_v42  ;;  %5068 = vmatpush1.bf16.msra.mxu1 %v6770_v49 }
 0x5b2   :  { %5038 = vmatprep.subr.bf16.mxu0 %v6775_v2  ;;  %5070 = vmatprep.subr.bf16.mxu1 %v6777_v6 }
 0x5b5   :  { %5040 = vmatpush1.bf16.msra.mxu0 %v6779_v10  ;;  %5072 = vmatpush1.bf16.msra.mxu1 %v6782_v19 }
 0x5b6   :  { %5042 = vmatprep.subr.bf16.mxu0 %v6787_v32  ;;  %5074 = vmatprep.subr.bf16.mxu1 %v6789_v48 }
 0x5b9   :  { %5044 = vmatpush1.bf16.msra.mxu0 %v6791_v54  ;;  %5076 = vmatpush1.bf16.msra.mxu1 %v6794_v4 }
 0x5ba   :  { %5046 = vmatprep.subr.bf16.mxu0 %v6798_v22  ;;  %5078 = vmatprep.subr.bf16.mxu1 %v6801_v21 }
 0x5bd   :  { %5048 = vmatpush1.bf16.msra.mxu0 %v6803_v33  ;;  %5080 = vmatpush1.bf16.msra.mxu1 %v6806_v43 }
 0x5be   :  { %5050 = vmatprep.subr.bf16.mxu0 %v6809_v1  ;;  %5082 = vmatprep.subr.bf16.mxu1 %v6811_v8 }
 0x5c1   :  { %5052 = vmatpush1.bf16.msra.mxu0 %v6814_v16  ;;  %5084 = vmatpush1.bf16.msra.mxu1 %v6818_v36 }
 0x5c2   :  { %5054 = vmatprep.subr.bf16.mxu0 %v6820_v40  ;;  %5086 = vmatprep.subr.bf16.mxu1 %v6823_v9 }
 0x5c5   :  { %5056 = vmatpush1.bf16.msra.mxu0 %v6826_v15  ;;  %5088 = vmatpush1.bf16.msra.mxu1 %v6830_v17 }
 0x67b   :  { %v1810_v63 = vpop.f32.mrb[10].mxu0  ;;  %v1881_v45 = vpop.f32.mrb[10].mxu1 }
 0x67c   :  { %v5787_v57 = vadd.f32 %v1810_v63, %v6620_v35  ;;  %v1812_v5 = vpop.f32.mrb[11].mxu0  ;;  %v1883_v7 = vpop.f32.mrb[11].mxu1  ;;  %v5803_v27 = vadd.f32 %v1881_v45, %v6637_v59 }
 0x67d   :  { %v5788_v12 = vadd.f32 %v1812_v5, %v6624_v38  ;;  %v5804_v14 = vadd.f32 %v1883_v7, %v6631_v52  ;;  %v2171_v5 = vld [vmem:[#allocation9 + $0x28] sm:$0xff] }
 0x67e   :  { %v4438_v51 = vmul.f32 -1.442695, %v5787_v57  ;;  %v2167_v57 = vld [vmem:[#allocation9 + $0x8] sm:$0xff] }
 0x67f   :  { %v4439_v62 = vmul.f32 -1.442695, %v5788_v12  ;;  %v4440_v18 = vmul.f32 -1.442695, %v5804_v14  ;;  %v5089_v7 = vpack.c.bf16 %v2171_v5, %v2167_v57  ;;  %v2173_v12 = vld [vmem:[#allocation9 + $0x38] sm:$0xff] }
 0x680   :  { %5998 = vpow2.f32 %v4438_v51  ;;  %v2166_v51 = vld [vmem:[#allocation9] sm:$0xff] }
 0x681   :  { %6000 = vpow2.f32 %v4439_v62  ;;  %v2170_v62 = vld [vmem:[#allocation9 + $0x20] sm:$0xff]  ;;  %5090 = vmatprep.subr.bf16.mxu0 %v5089_v7 }
 0x682   :  { %6002 = vpow2.f32 %v4440_v18  ;;  %v5091_v18 = vpack.c.bf16 %v2170_v62, %v2166_v51  ;;  %v2410_v62 = vld [vmem:[#allocation10] sm:$0xff] }
 0x683   :  { %6004 = vtanh.f32 %v5803_v27  ;;  %v2168_v27 = vld [vmem:[#allocation9 + $0x10] sm:$0xff] }
 0x68a   :  { %v5999_v47 = vpop.eup %5998 }
 0x68b   :  { %v6001_v28 = vpop.eup %6000  ;;  %v1893_v60 = vadd.f32 1.0, %v5999_v47  ;;  %v2172_v47 = vld [vmem:[#allocation9 + $0x30] sm:$0xff] }
 0x68c   :  { %v1899_v53 = vadd.f32 1.0, %v6001_v28  ;;  %v6003_v46 = vpop.eup %6002  ;;  %v5123_v28 = vpack.c.bf16 %v2172_v47, %v2168_v27  ;;  %v2416_v27 = vld [vmem:[#allocation10 + $0x30] sm:$0xff]  ;;  %v2419_v47 = vld [vmem:[#allocation10 + $0x48] sm:$0xff] }
 0x68d   :  { %6006 = vrcp.f32 %v1893_v60  ;;  %v6005_v61 = vpop.eup %6004  ;;  %v1906_v23 = vadd.f32 1.0, %v6003_v46  ;;  %v2175_v60 = vld [vmem:[#allocation9 + $0x48] sm:$0xff]  ;;  %v2177_v46 = vld [vmem:[#allocation9 + $0x58] sm:$0xff] }
 0x68e   :  { %6008 = vrcp.f32 %v1899_v53  ;;  %v2179_v53 = vld [vmem:[#allocation9 + $0x68] sm:$0xff] }
 0x68f   :  { %6010 = vrcp.f32 %v1906_v23 }
 0x697   :  { %v6007_v50 = vpop.eup %6006 }
 0x698   :  { %v6009_v11 = vpop.eup %6008  ;;  %v1910_v25 = vmul.f32 %v6007_v50, %v6005_v61  ;;  %v5093_v61 = vpack.c.bf16 %v2179_v53, %v2175_v60  ;;  %v2181_v50 = vld [vmem:[#allocation9 + $0x78] sm:$0xff] }
 0x699   :  { %v1909_v26 = vmul.f32 %v6009_v11, %v6888_v29  ;;  %v6011_v44 = vpop.eup %6010  ;;  %v2169_v29 = vld [vmem:[#allocation9 + $0x18] sm:$0xff]  ;;  %v2174_v11 = vld [vmem:[#allocation9 + $0x40] sm:$0xff]  ;;  %v5125_v23 = vpack.c.bf16 %v2181_v50, %v2177_v46 }
 0x69a   :  { %v5121_v14 = vpack.c.bf16 %v2173_v12, %v2169_v29  ;;  %v2421_v60 = vld [vmem:[#allocation10 + $0x58] sm:$0xff] }
 0x69b   :  { %v6932_v13 = vadd.f32 %v1910_v25, %v1909_v26  ;;  %v2178_v25 = vld [vmem:[#allocation9 + $0x60] sm:$0xff]  ;;  %v2425_v53 = vld [vmem:[#allocation10 + $0x78] sm:$0xff] }
 0x69c   :  { %5122 = vmatprep.subr.bf16.mxu1 %v5121_v14  ;;  %v5095_v26 = vpack.c.bf16 %v2178_v25, %v2174_v11  ;;  %v2414_v14 = vld [vmem:[#allocation10 + $0x20] sm:$0xff] }
 0x69d   :  { %6012 = vtanh.f32 %v6932_v13  ;;  %v5155_v50 = vpack.c.bf16 %v2414_v14, %v2410_v62  ;;  %v2418_v25 = vld [vmem:[#allocation10 + $0x40] sm:$0xff] }
 0x6a7   :  { %v6013_v63 = vpop.eup %6012 }
 0x6a8   :  { %v6935_v45 = vmul.f32 %v6013_v63, %v6011_v44  ;;  %v2176_v44 = vld [vmem:[#allocation9 + $0x50] sm:$0xff] }
 0x6a9   :  { %v2180_v63 = vld [vmem:[#allocation9 + $0x70] sm:$0xff] }
 0x6aa   :  { %2052 = vmatmul.mubr.f32.vlgmr.msra.gmra.mrb[12].mxu0 %v6935_v45  ;;  %2123 = vmatmul.mubr.f32.vlgmr.msra.gmra.mrb[12].mxu1 %v6935_v45  ;;  %v5127_v57 = vpack.c.bf16 %v2180_v63, %v2176_v44  ;;  %v5189_v44 = vpack.c.bf16 %v2425_v53, %v2421_v60  ;;  %v2420_v63 = vld [vmem:[#allocation10 + $0x50] sm:$0xff] }
 0x6ab   :  { %2294 = vmatprep.mubr.f32.mxu0 %v6323_v0  ;;  %2365 = vmatprep.mubr.f32.mxu1 %v6323_v0  ;;  %v2444_v60 = vld [vmem:[#allocation10 + $0x110] sm:$0xff] }
 0x6ac   :  { %5092 = vmatpush1.bf16.msra.mxu0 %v5091_v18  ;;  %5124 = vmatpush1.bf16.msra.mxu1 %v5123_v28  ;;  %v2412_v18 = vld [vmem:[#allocation10 + $0x10] sm:$0xff]  ;;  %v2423_v28 = vld [vmem:[#allocation10 + $0x68] sm:$0xff] }
 0x6ad   :  { %5094 = vmatprep.subr.bf16.mxu0 %v5093_v61  ;;  %5126 = vmatprep.subr.bf16.mxu1 %v5125_v23  ;;  %v5187_v11 = vpack.c.bf16 %v2416_v27, %v2412_v18  ;;  %v2422_v23 = vld [vmem:[#allocation10 + $0x60] sm:$0xff]  ;;  %v2448_v53 = vld [vmem:[#allocation10 + $0x130] sm:$0xff] }
 0x6ae   :  { %v2442_v18 = vld [vmem:[#allocation10 + $0x100] sm:$0xff] }
 0x6af   :  { %v2446_v27 = vld [vmem:[#allocation10 + $0x120] sm:$0xff] }
 0x6b0   :  { %5096 = vmatpush1.bf16.msra.mxu0 %v5095_v26  ;;  %5128 = vmatpush1.bf16.msra.mxu1 %v5127_v57  ;;  %v5157_v26 = vpack.c.bf16 %v2423_v28, %v2419_v47  ;;  %v2424_v57 = vld [vmem:[#allocation10 + $0x70] sm:$0xff] }
 0x6b1   :  { %5098 = vmatprep.subr.bf16.mxu0 %v6763_v41  ;;  %5130 = vmatprep.subr.bf16.mxu1 %v6765_v56  ;;  %v2411_v41 = vld [vmem:[#allocation10 + $0x8] sm:$0xff] }
 0x6b2   :  { %v2415_v56 = vld [vmem:[#allocation10 + $0x28] sm:$0xff] }
 0x6b4   :  { %5100 = vmatpush1.bf16.msra.mxu0 %v6767_v42  ;;  %5132 = vmatpush1.bf16.msra.mxu1 %v6770_v49  ;;  %v2413_v42 = vld [vmem:[#allocation10 + $0x18] sm:$0xff] }
 0x6b5   :  { %5102 = vmatprep.subr.bf16.mxu0 %v6775_v2  ;;  %5134 = vmatprep.subr.bf16.mxu1 %v6777_v6  ;;  %v2417_v49 = vld [vmem:[#allocation10 + $0x38] sm:$0xff]  ;;  %v5153_v2 = vpack.c.bf16 %v2415_v56, %v2411_v41  ;;  %v2427_v41 = vld [vmem:[#allocation10 + $0x88] sm:$0xff] }
 0x6b6   :  { %v5185_v6 = vpack.c.bf16 %v2417_v49, %v2413_v42  ;;  %v2431_v56 = vld [vmem:[#allocation10 + $0xa8] sm:$0xff]  ;;  %v2429_v42 = vld [vmem:[#allocation10 + $0x98] sm:$0xff] }
 0x6b7   :  { %v2433_v49 = vld [vmem:[#allocation10 + $0xb8] sm:$0xff] }
 0x6b8   :  { %5104 = vmatpush1.bf16.msra.mxu0 %v6779_v10  ;;  %5136 = vmatpush1.bf16.msra.mxu1 %v6782_v19 }
 0x6b9   :  { %5106 = vmatprep.subr.bf16.mxu0 %v6787_v32  ;;  %5138 = vmatprep.subr.bf16.mxu1 %v6789_v48 }
 0x6bc   :  { %5108 = vmatpush1.bf16.msra.mxu0 %v6791_v54  ;;  %5140 = vmatpush1.bf16.msra.mxu1 %v6794_v4 }
 0x6bd   :  { %5110 = vmatprep.subr.bf16.mxu0 %v6798_v22  ;;  %5142 = vmatprep.subr.bf16.mxu1 %v6801_v21 }
 0x6c0   :  { %5112 = vmatpush1.bf16.msra.mxu0 %v6803_v33  ;;  %5144 = vmatpush1.bf16.msra.mxu1 %v6806_v43 }
 0x6c1   :  { %5114 = vmatprep.subr.bf16.mxu0 %v6809_v1  ;;  %5146 = vmatprep.subr.bf16.mxu1 %v6811_v8 }
 0x6c4   :  { %5116 = vmatpush1.bf16.msra.mxu0 %v6814_v16  ;;  %5148 = vmatpush1.bf16.msra.mxu1 %v6818_v36 }
 0x6c5   :  { %5118 = vmatprep.subr.bf16.mxu0 %v6820_v40  ;;  %5150 = vmatprep.subr.bf16.mxu1 %v6823_v9 }
 0x6c8   :  { %5120 = vmatpush1.bf16.msra.mxu0 %v6826_v15  ;;  %5152 = vmatpush1.bf16.msra.mxu1 %v6830_v17 }
 0x6c9   :  { %5154 = vmatprep.subr.bf16.mxu0 %v5153_v2  ;;  %5186 = vmatprep.subr.bf16.mxu1 %v5185_v6  ;;  %v5159_v2 = vpack.c.bf16 %v2422_v23, %v2418_v25  ;;  %v5191_v6 = vpack.c.bf16 %v2424_v57, %v2420_v63  ;;  %v5171_v25 = vpack.c.bf16 %v2446_v27, %v2442_v18  ;;  %v2760_v27 = vld [vmem:[#allocation12 + $0x10] sm:$0xff] }
 0x6ca   :  { %v5203_v23 = vpack.c.bf16 %v2448_v53, %v2444_v60  ;;  %v2771_v60 = vld [vmem:[#allocation12 + $0x68] sm:$0xff]  ;;  %v2769_v53 = vld [vmem:[#allocation12 + $0x58] sm:$0xff] }
 0x77d   :  { %v2053_v10 = vpop.f32.mrb[12].mxu0  ;;  %v2124_v19 = vpop.f32.mrb[12].mxu1 }
 0x77e   :  { %v5789_v32 = vadd.f32 %v2053_v10, %v6620_v35  ;;  %v2055_v48 = vpop.f32.mrb[13].mxu0  ;;  %v2126_v54 = vpop.f32.mrb[13].mxu1  ;;  %v5805_v1 = vadd.f32 %v2124_v19, %v6637_v59  ;;  %v2426_v10 = vld [vmem:[#allocation10 + $0x80] sm:$0xff] }
 0x77f   :  { %v5790_v4 = vadd.f32 %v2055_v48, %v6624_v38  ;;  %v5806_v33 = vadd.f32 %v2126_v54, %v6631_v52  ;;  %v2430_v19 = vld [vmem:[#allocation10 + $0xa0] sm:$0xff]  ;;  %v5193_v48 = vpack.c.bf16 %v2433_v49, %v2429_v42  ;;  %v2428_v54 = vld [vmem:[#allocation10 + $0x90] sm:$0xff]  ;;  %v2459_v42 = vld [vmem:[#allocation10 + $0x188] sm:$0xff] }
 0x780   :  { %v4441_v22 = vmul.f32 -1.442695, %v5789_v32  ;;  %v5161_v32 = vpack.c.bf16 %v2431_v56, %v2427_v41  ;;  %v2452_v41 = vld [vmem:[#allocation10 + $0x150] sm:$0xff]  ;;  %v2463_v49 = vld [vmem:[#allocation10 + $0x1a8] sm:$0xff] }
 0x781   :  { %v4442_v21 = vmul.f32 -1.442695, %v5790_v4  ;;  %v4443_v43 = vmul.f32 -1.442695, %v5806_v33  ;;  %v2432_v4 = vld [vmem:[#allocation10 + $0xb0] sm:$0xff]  ;;  %v2437_v33 = vld [vmem:[#allocation10 + $0xd8] sm:$0xff] }
 0x782   :  { %6014 = vpow2.f32 %v4441_v22  ;;  %v2435_v22 = vld [vmem:[#allocation10 + $0xc8] sm:$0xff]  ;;  %v2456_v56 = vld [vmem:[#allocation10 + $0x170] sm:$0xff] }
 0x783   :  { %6016 = vpow2.f32 %v4442_v21  ;;  %v2439_v21 = vld [vmem:[#allocation10 + $0xe8] sm:$0xff] }
 0x784   :  { %6018 = vpow2.f32 %v4443_v43  ;;  %v2441_v43 = vld [vmem:[#allocation10 + $0xf8] sm:$0xff] }
 0x785   :  { %6020 = vtanh.f32 %v5805_v1  ;;  %v5163_v1 = vpack.c.bf16 %v2430_v19, %v2426_v10  ;;  %v5207_v19 = vpack.c.bf16 %v2456_v56, %v2452_v41  ;;  %v2779_v41 = vld [vmem:[#allocation12 + $0xa8] sm:$0xff]  ;;  %v2777_v56 = vld [vmem:[#allocation12 + $0x98] sm:$0xff] }
 0x78c   :  { %v6015_v8 = vpop.eup %6014 }
 0x78d   :  { %v6017_v16 = vpop.eup %6016  ;;  %v2136_v36 = vadd.f32 1.0, %v6015_v8  ;;  %v5195_v8 = vpack.c.bf16 %v2432_v4, %v2428_v54  ;;  %v5177_v54 = vpack.c.bf16 %v2463_v49, %v2459_v42  ;;  %v2781_v49 = vld [vmem:[#allocation12 + $0xb8] sm:$0xff] }
 0x78e   :  { %v2142_v40 = vadd.f32 1.0, %v6017_v16  ;;  %v6019_v9 = vpop.eup %6018  ;;  %v2434_v16 = vld [vmem:[#allocation10 + $0xc0] sm:$0xff] }
 0x78f   :  { %6022 = vrcp.f32 %v2136_v36  ;;  %v6021_v15 = vpop.eup %6020  ;;  %v2149_v7 = vadd.f32 1.0, %v6019_v9  ;;  %v2438_v36 = vld [vmem:[#allocation10 + $0xe0] sm:$0xff]  ;;  %v5197_v9 = vpack.c.bf16 %v2441_v43, %v2437_v33  ;;  %v2467_v33 = vld [vmem:[#allocation10 + $0x1c8] sm:$0xff] }
 0x790   :  { %6024 = vrcp.f32 %v2142_v40  ;;  %v5165_v40 = vpack.c.bf16 %v2439_v21, %v2435_v22  ;;  %v5167_v62 = vpack.c.bf16 %v2438_v36, %v2434_v16  ;;  %v2460_v22 = vld [vmem:[#allocation10 + $0x190] sm:$0xff]  ;;  %v2471_v43 = vld [vmem:[#allocation10 + $0x1e8] sm:$0xff] }
 0x791   :  { %6026 = vrcp.f32 %v2149_v7  ;;  %v2445_v7 = vld [vmem:[#allocation10 + $0x118] sm:$0xff]  ;;  %v2464_v21 = vld [vmem:[#allocation10 + $0x1b0] sm:$0xff] }
 0x792   :  { %v5211_v36 = vpack.c.bf16 %v2464_v21, %v2460_v22  ;;  %v2787_v22 = vld [vmem:[#allocation12 + $0xe8] sm:$0xff]  ;;  %v2785_v21 = vld [vmem:[#allocation12 + $0xd8] sm:$0xff] }
 0x799   :  { %v6023_v17 = vpop.eup %6022 }
 0x79a   :  { %v6025_v5 = vpop.eup %6024  ;;  %v2153_v29 = vmul.f32 %v6023_v17, %v6021_v15  ;;  %v2436_v15 = vld [vmem:[#allocation10 + $0xd0] sm:$0xff] }
 0x79b   :  { %v2152_v12 = vmul.f32 %v6025_v5, %v6932_v13  ;;  %v6027_v46 = vpop.eup %6026  ;;  %v2440_v17 = vld [vmem:[#allocation10 + $0xf0] sm:$0xff]  ;;  %v2443_v5 = vld [vmem:[#allocation10 + $0x108] sm:$0xff] }
 0x79c   :  { %v5199_v14 = vpack.c.bf16 %v2440_v17, %v2436_v15  ;;  %v2470_v17 = vld [vmem:[#allocation10 + $0x1e0] sm:$0xff] }
 0x79d   :  { %v6970_v51 = vadd.f32 %v2153_v29, %v2152_v12  ;;  %v2447_v29 = vld [vmem:[#allocation10 + $0x128] sm:$0xff]  ;;  %v2449_v12 = vld [vmem:[#allocation10 + $0x138] sm:$0xff] }
 0x79e   :  { %v5169_v47 = vpack.c.bf16 %v2447_v29, %v2443_v5  ;;  %v5201_v28 = vpack.c.bf16 %v2449_v12, %v2445_v7  ;;  %v2468_v5 = vld [vmem:[#allocation10 + $0x1d0] sm:$0xff] }
 0x79f   :  { %6028 = vtanh.f32 %v6970_v51  ;;  %v2472_v29 = vld [vmem:[#allocation10 + $0x1f0] sm:$0xff] }
 0x7a0   :  { %v5215_v12 = vpack.c.bf16 %v2472_v29, %v2468_v5  ;;  %v2795_v5 = vld [vmem:[#allocation12 + $0x128] sm:$0xff]  ;;  %v2793_v29 = vld [vmem:[#allocation12 + $0x118] sm:$0xff] }
 0x7a9   :  { %v6029_v61 = vpop.eup %6028 }
 0x7aa   :  { %v6973_v13 = vmul.f32 %v6029_v61, %v6027_v46  ;;  %v2451_v46 = vld [vmem:[#allocation10 + $0x148] sm:$0xff] }
 0x7ab   :  { %v2455_v61 = vld [vmem:[#allocation10 + $0x168] sm:$0xff] }
 0x7ac   :  { %2295 = vmatmul.mubr.f32.vlgmr.msra.gmra.mrb[14].mxu0 %v6973_v13  ;;  %2366 = vmatmul.mubr.f32.vlgmr.msra.gmra.mrb[14].mxu1 %v6973_v13  ;;  %v5173_v63 = vpack.c.bf16 %v2455_v61, %v2451_v46  ;;  %v2773_v61 = vld [vmem:[#allocation12 + $0x78] sm:$0xff] }
 0x7ad   :  { %5156 = vmatpush1.bf16.msra.mxu0 %v5155_v50  ;;  %5188 = vmatpush1.bf16.msra.mxu1 %v5187_v11  ;;  %v2453_v50 = vld [vmem:[#allocation10 + $0x158] sm:$0xff] }
 0x7ae   :  { %5158 = vmatprep.subr.bf16.mxu0 %v5157_v26  ;;  %5190 = vmatprep.subr.bf16.mxu1 %v5189_v44  ;;  %v2457_v11 = vld [vmem:[#allocation10 + $0x178] sm:$0xff]  ;;  %v2450_v26 = vld [vmem:[#allocation10 + $0x140] sm:$0xff] }
 0x7af   :  { %2560 = vmatprep.mubr.f32.mxu0 %v6323_v0  ;;  %2673 = vmatprep.mubr.f32.mxu1 %v6323_v0  ;;  %v2454_v44 = vld [vmem:[#allocation10 + $0x160] sm:$0xff]  ;;  %v5205_v57 = vpack.c.bf16 %v2457_v11, %v2453_v50 }
 0x7b0   :  { %v5175_v10 = vpack.c.bf16 %v2454_v44, %v2450_v26  ;;  %v2766_v50 = vld [vmem:[#allocation12 + $0x40] sm:$0xff]  ;;  %v2768_v26 = vld [vmem:[#allocation12 + $0x50] sm:$0xff] }
 0x7b1   :  { %5160 = vmatpush1.bf16.msra.mxu0 %v5159_v2  ;;  %5192 = vmatpush1.bf16.msra.mxu1 %v5191_v6  ;;  %v2461_v2 = vld [vmem:[#allocation10 + $0x198] sm:$0xff]  ;;  %v2770_v11 = vld [vmem:[#allocation12 + $0x60] sm:$0xff]  ;;  %v2772_v44 = vld [vmem:[#allocation12 + $0x70] sm:$0xff] }
 0x7b2   :  { %5162 = vmatprep.subr.bf16.mxu0 %v5161_v32  ;;  %5194 = vmatprep.subr.bf16.mxu1 %v5193_v48  ;;  %v2465_v6 = vld [vmem:[#allocation10 + $0x1b8] sm:$0xff]  ;;  %v2458_v32 = vld [vmem:[#allocation10 + $0x180] sm:$0xff] }
 0x7b3   :  { %v2462_v48 = vld [vmem:[#allocation10 + $0x1a0] sm:$0xff]  ;;  %v5209_v4 = vpack.c.bf16 %v2465_v6, %v2461_v2 }
 0x7b4   :  { %v5179_v16 = vpack.c.bf16 %v2462_v48, %v2458_v32  ;;  %v2774_v2 = vld [vmem:[#allocation12 + $0x80] sm:$0xff]  ;;  %v2776_v32 = vld [vmem:[#allocation12 + $0x90] sm:$0xff] }
 0x7b5   :  { %5164 = vmatpush1.bf16.msra.mxu0 %v5163_v1  ;;  %5196 = vmatpush1.bf16.msra.mxu1 %v5195_v8  ;;  %v2469_v1 = vld [vmem:[#allocation10 + $0x1d8] sm:$0xff]  ;;  %v2778_v6 = vld [vmem:[#allocation12 + $0xa0] sm:$0xff]  ;;  %v2780_v48 = vld [vmem:[#allocation12 + $0xb0] sm:$0xff] }
 0x7b6   :  { %5166 = vmatprep.subr.bf16.mxu0 %v5165_v40  ;;  %5198 = vmatprep.subr.bf16.mxu1 %v5197_v9  ;;  %v2473_v8 = vld [vmem:[#allocation10 + $0x1f8] sm:$0xff]  ;;  %v2466_v40 = vld [vmem:[#allocation10 + $0x1c0] sm:$0xff]  ;;  %v5181_v9 = vpack.c.bf16 %v2471_v43, %v2467_v33 }
 0x7b7   :  { %v5213_v15 = vpack.c.bf16 %v2473_v8, %v2469_v1  ;;  %v5183_v7 = vpack.c.bf16 %v2470_v17, %v2466_v40  ;;  %v2789_v43 = vld [vmem:[#allocation12 + $0xf8] sm:$0xff]  ;;  %v2782_v1 = vld [vmem:[#allocation12 + $0xc0] sm:$0xff]  ;;  %v2784_v40 = vld [vmem:[#allocation12 + $0xd0] sm:$0xff] }
 0x7b8   :  { %v2786_v8 = vld [vmem:[#allocation12 + $0xe0] sm:$0xff] }
 0x7b9   :  { %5168 = vmatpush1.bf16.msra.mxu0 %v5167_v62  ;;  %5200 = vmatpush1.bf16.msra.mxu1 %v5199_v14  ;;  %v2758_v62 = vld [vmem:[#allocation12] sm:$0xff] }
 0x7ba   :  { %5170 = vmatprep.subr.bf16.mxu0 %v5169_v47  ;;  %5202 = vmatprep.subr.bf16.mxu1 %v5201_v28  ;;  %v2764_v47 = vld [vmem:[#allocation12 + $0x30] sm:$0xff]  ;;  %v2767_v28 = vld [vmem:[#allocation12 + $0x48] sm:$0xff] }
 0x7bb   :  { %v7019_v46 = vpack.c.bf16 %v2771_v60, %v2767_v28 }
 0x7bd   :  { %5172 = vmatpush1.bf16.msra.mxu0 %v5171_v25  ;;  %5204 = vmatpush1.bf16.msra.mxu1 %v5203_v23  ;;  %v7021_v25 = vpack.c.bf16 %v2773_v61, %v2769_v53  ;;  %v7023_v23 = vpack.c.bf16 %v2770_v11, %v2766_v50  ;;  %v2801_v53 = vld [vmem:[#allocation12 + $0x158] sm:$0xff]  ;;  %v2798_v50 = vld [vmem:[#allocation12 + $0x140] sm:$0xff] }
 0x7be   :  { %5174 = vmatprep.subr.bf16.mxu0 %v5173_v63  ;;  %5206 = vmatprep.subr.bf16.mxu1 %v5205_v57  ;;  %v7026_v63 = vpack.c.bf16 %v2772_v44, %v2768_v26  ;;  %v2775_v57 = vld [vmem:[#allocation12 + $0x88] sm:$0xff]  ;;  %v2805_v61 = vld [vmem:[#allocation12 + $0x178] sm:$0xff]  ;;  %v2802_v26 = vld [vmem:[#allocation12 + $0x160] sm:$0xff] }
 0x7bf   :  { %v7031_v42 = vpack.c.bf16 %v2779_v41, %v2775_v57  ;;  %v7067_v11 = vpack.c.bf16 %v2805_v61, %v2801_v53  ;;  %v2800_v44 = vld [vmem:[#allocation12 + $0x150] sm:$0xff]  ;;  %v7070_v41 = vpack.c.bf16 %v2802_v26, %v2798_v50 }
 0x7c0   :  { %v2804_v57 = vld [vmem:[#allocation12 + $0x170] sm:$0xff] }
 0x7c1   :  { %5176 = vmatpush1.bf16.msra.mxu0 %v5175_v10  ;;  %5208 = vmatpush1.bf16.msra.mxu1 %v5207_v19  ;;  %v7033_v10 = vpack.c.bf16 %v2781_v49, %v2777_v56  ;;  %v7035_v19 = vpack.c.bf16 %v2778_v6, %v2774_v2  ;;  %v2807_v56 = vld [vmem:[#allocation12 + $0x188] sm:$0xff]  ;;  %v2809_v2 = vld [vmem:[#allocation12 + $0x198] sm:$0xff]  ;;  %v7074_v6 = vpack.c.bf16 %v2804_v57, %v2800_v44 }
 0x7c2   :  { %5178 = vmatprep.subr.bf16.mxu0 %v5177_v54  ;;  %5210 = vmatprep.subr.bf16.mxu1 %v5209_v4  ;;  %v7038_v54 = vpack.c.bf16 %v2780_v48, %v2776_v32  ;;  %v2783_v4 = vld [vmem:[#allocation12 + $0xc8] sm:$0xff]  ;;  %v2813_v48 = vld [vmem:[#allocation12 + $0x1b8] sm:$0xff] }
 0x7c3   :  { %v7043_v33 = vpack.c.bf16 %v2787_v22, %v2783_v4  ;;  %v2811_v49 = vld [vmem:[#allocation12 + $0x1a8] sm:$0xff]  ;;  %v2806_v4 = vld [vmem:[#allocation12 + $0x180] sm:$0xff] }
 0x7c4   :  { %v7076_v32 = vpack.c.bf16 %v2811_v49, %v2807_v56  ;;  %v2810_v22 = vld [vmem:[#allocation12 + $0x1a0] sm:$0xff] }
 0x7c5   :  { %5180 = vmatpush1.bf16.msra.mxu0 %v5179_v16  ;;  %5212 = vmatpush1.bf16.msra.mxu1 %v5211_v36  ;;  %v7045_v16 = vpack.c.bf16 %v2789_v43, %v2785_v21  ;;  %v7047_v36 = vpack.c.bf16 %v2786_v8, %v2782_v1  ;;  %v7079_v21 = vpack.c.bf16 %v2813_v48, %v2809_v2  ;;  %v2808_v43 = vld [vmem:[#allocation12 + $0x190] sm:$0xff] }
 0x7c6   :  { %5182 = vmatprep.subr.bf16.mxu0 %v5181_v9  ;;  %5214 = vmatprep.subr.bf16.mxu1 %v5213_v15  ;;  %v2788_v9 = vld [vmem:[#allocation12 + $0xf0] sm:$0xff]  ;;  %v2791_v15 = vld [vmem:[#allocation12 + $0x108] sm:$0xff]  ;;  %v7082_v8 = vpack.c.bf16 %v2810_v22, %v2806_v4 }
 0x7c7   :  { %v7050_v17 = vpack.c.bf16 %v2788_v9, %v2784_v40  ;;  %v2812_v1 = vld [vmem:[#allocation12 + $0x1b0] sm:$0xff]  ;;  %v2815_v9 = vld [vmem:[#allocation12 + $0x1c8] sm:$0xff] }
 0x7c8   :  { %v7086_v40 = vpack.c.bf16 %v2812_v1, %v2808_v43 }
 0x7c9   :  { %5184 = vmatpush1.bf16.msra.mxu0 %v5183_v7  ;;  %5216 = vmatpush1.bf16.msra.mxu1 %v5215_v12  ;;  %v2797_v7 = vld [vmem:[#allocation12 + $0x138] sm:$0xff]  ;;  %v7054_v12 = vpack.c.bf16 %v2795_v5, %v2791_v15  ;;  %v2819_v15 = vld [vmem:[#allocation12 + $0x1e8] sm:$0xff] }
 0x7ca   :  { %v2817_v5 = vld [vmem:[#allocation12 + $0x1d8] sm:$0xff] }
 0x7cc   :  { %2561 = vmatmul.mubr.f32.vlgmr.msra.gmra.mrb[16].mxu0 %v6643_v39  ;;  %2674 = vmatmul.mubr.f32.vlgmr.msra.gmra.mrb[16].mxu1 %v6643_v39  ;;  %v2759_v39 = vld [vmem:[#allocation12 + $0x8] sm:$0xff] }
 0x7cd   :  { %2566 = vmatprep.mubr.f32.mxu0 %v6323_v0  ;;  %2679 = vmatprep.mubr.f32.mxu1 %v6323_v0 }
 0x7d0   :  { %2567 = vmatmul.mubr.f32.gmra.mrb[18].mxu0 %v6687_v24  ;;  %2680 = vmatmul.mubr.f32.gmra.mrb[18].mxu1 %v6687_v24  ;;  %v2763_v24 = vld [vmem:[#allocation12 + $0x28] sm:$0xff] }
 0x7d1   :  { %2572 = vmatprep.mubr.f32.mxu0 %v6323_v0  ;;  %2685 = vmatprep.mubr.f32.mxu1 %v6323_v0 }
 0x7d4   :  { %2573 = vmatmul.mubr.f32.gmra.mrb[20].mxu0 %v6751_v20  ;;  %2686 = vmatmul.mubr.f32.gmra.mrb[20].mxu1 %v6751_v20  ;;  %v2761_v20 = vld [vmem:[#allocation12 + $0x18] sm:$0xff] }
 0x7d5   :  { %2578 = vmatprep.mubr.f32.mxu0 %v6323_v0  ;;  %2691 = vmatprep.mubr.f32.mxu1 %v6323_v0 }
 0x7d8   :  { %2579 = vmatmul.mubr.f32.gmra.mrb[22].mxu0 %v6845_v3  ;;  %2692 = vmatmul.mubr.f32.gmra.mrb[22].mxu1 %v6845_v3  ;;  %v7007_v3 = vpack.c.bf16 %v2763_v24, %v2759_v39  ;;  %v7056_v39 = vpack.c.bf16 %v2797_v7, %v2793_v29  ;;  %v2790_v24 = vld [vmem:[#allocation12 + $0x100] sm:$0xff]  ;;  %v7091_v29 = vpack.c.bf16 %v2819_v15, %v2815_v9  ;;  %v2821_v7 = vld [vmem:[#allocation12 + $0x1f8] sm:$0xff] }
 0x7d9   :  { %2584 = vmatprep.mubr.f32.mxu0 %v6323_v0  ;;  %2697 = vmatprep.mubr.f32.mxu1 %v6323_v0 }
 0x7da   :  { %5218 = vmatprep.subr.bf16.mxu0 %v7007_v3 }
 0x7dc   :  { %2585 = vmatmul.mubr.f32.gmra.mrb[24].mxu0 %v6891_v58  ;;  %2698 = vmatmul.mubr.f32.gmra.mrb[24].mxu1 %v6891_v58  ;;  %v2765_v58 = vld [vmem:[#allocation12 + $0x38] sm:$0xff] }
 0x7dd   :  { %2590 = vmatprep.mubr.f32.mxu0 %v6323_v0  ;;  %2703 = vmatprep.mubr.f32.mxu1 %v6323_v0  ;;  %v7009_v14 = vpack.c.bf16 %v2765_v58, %v2761_v20  ;;  %v2794_v20 = vld [vmem:[#allocation12 + $0x120] sm:$0xff]  ;;  %v2792_v58 = vld [vmem:[#allocation12 + $0x110] sm:$0xff] }
 0x7df   :  { %5250 = vmatprep.subr.bf16.mxu1 %v7009_v14 }
 0x7e0   :  { %2591 = vmatmul.mubr.f32.gmra.mrb[26].mxu0 %v6935_v45  ;;  %2704 = vmatmul.mubr.f32.gmra.mrb[26].mxu1 %v6935_v45  ;;  %v2762_v45 = vld [vmem:[#allocation12 + $0x20] sm:$0xff] }
 0x7e1   :  { %2596 = vmatprep.mubr.f32.mxu0 %v6323_v0  ;;  %2709 = vmatprep.mubr.f32.mxu1 %v6323_v0  ;;  %v7011_v18 = vpack.c.bf16 %v2762_v45, %v2758_v62  ;;  %v7059_v62 = vpack.c.bf16 %v2794_v20, %v2790_v24  ;;  %v2796_v45 = vld [vmem:[#allocation12 + $0x130] sm:$0xff]  ;;  %v2814_v24 = vld [vmem:[#allocation12 + $0x1c0] sm:$0xff] }
 0x7e2   :  { %v7063_v28 = vpack.c.bf16 %v2796_v45, %v2792_v58  ;;  %v2818_v20 = vld [vmem:[#allocation12 + $0x1e0] sm:$0xff]  ;;  %v7093_v58 = vpack.c.bf16 %v2821_v7, %v2817_v5 }
 0x7e3   :  { %5220 = vmatpush1.bf16.msra.mxu0 %v7011_v18  ;;  %v7095_v45 = vpack.c.bf16 %v2818_v20, %v2814_v24 }
 0x7e4   :  { %2597 = vmatmul.mubr.f32.gmra.mrb[28].mxu0 %v6973_v13  ;;  %2710 = vmatmul.mubr.f32.gmra.mrb[28].mxu1 %v6973_v13  ;;  %v7014_v13 = vpack.c.bf16 %v2764_v47, %v2760_v27  ;;  %v2799_v27 = vld [vmem:[#allocation12 + $0x148] sm:$0xff] }
 0x7e5   :  { %2602 = vmatprep.mubr.f32.mxu0 %v6323_v0  ;;  %2715 = vmatprep.mubr.f32.mxu1 %v6323_v0  ;;  %v2803_v47 = vld [vmem:[#allocation12 + $0x168] sm:$0xff] }
 0x7e6   :  { %5252 = vmatpush1.bf16.msra.mxu1 %v7014_v13  ;;  %5222 = vmatprep.subr.bf16.mxu0 %v7019_v46  ;;  %v7065_v60 = vpack.c.bf16 %v2803_v47, %v2799_v27  ;;  %v2816_v27 = vld [vmem:[#allocation12 + $0x1d0] sm:$0xff] }
 0x7e7   :  { %5254 = vmatprep.subr.bf16.mxu1 %v7021_v25  ;;  %5224 = vmatpush1.bf16.msra.mxu0 %v7023_v23  ;;  %v2820_v47 = vld [vmem:[#allocation12 + $0x1f0] sm:$0xff] }
 0x7e8   :  { %5226 = vmatprep.subr.bf16.mxu0 %v7031_v42  ;;  %v7098_v53 = vpack.c.bf16 %v2820_v47, %v2816_v27 }
 0x7ea   :  { %5256 = vmatpush1.bf16.msra.mxu1 %v7026_v63 }
 0x7eb   :  { %5258 = vmatprep.subr.bf16.mxu1 %v7033_v10  ;;  %5228 = vmatpush1.bf16.msra.mxu0 %v7035_v19 }
 0x7ec   :  { %5230 = vmatprep.subr.bf16.mxu0 %v7043_v33 }
 0x7ee   :  { %5260 = vmatpush1.bf16.msra.mxu1 %v7038_v54 }
 0x7ef   :  { %5262 = vmatprep.subr.bf16.mxu1 %v7045_v16  ;;  %5232 = vmatpush1.bf16.msra.mxu0 %v7047_v36 }
 0x7f0   :  { %5234 = vmatprep.subr.bf16.mxu0 %v7054_v12 }
 0x7f2   :  { %5264 = vmatpush1.bf16.msra.mxu1 %v7050_v17 }
 0x7f3   :  { %5266 = vmatprep.subr.bf16.mxu1 %v7056_v39  ;;  %5236 = vmatpush1.bf16.msra.mxu0 %v7059_v62 }
 0x7f4   :  { %5238 = vmatprep.subr.bf16.mxu0 %v7065_v60 }
 0x7f6   :  { %5268 = vmatpush1.bf16.msra.mxu1 %v7063_v28 }
 0x7f7   :  { %5270 = vmatprep.subr.bf16.mxu1 %v7067_v11  ;;  %5240 = vmatpush1.bf16.msra.mxu0 %v7070_v41 }
 0x7f8   :  { %5242 = vmatprep.subr.bf16.mxu0 %v7076_v32 }
 0x7fa   :  { %5272 = vmatpush1.bf16.msra.mxu1 %v7074_v6 }
 0x7fb   :  { %5274 = vmatprep.subr.bf16.mxu1 %v7079_v21  ;;  %5244 = vmatpush1.bf16.msra.mxu0 %v7082_v8 }
 0x7fc   :  { %5246 = vmatprep.subr.bf16.mxu0 %v7091_v29 }
 0x7fe   :  { %5276 = vmatpush1.bf16.msra.mxu1 %v7086_v40 }
 0x7ff   :  { %5278 = vmatprep.subr.bf16.mxu1 %v7093_v58  ;;  %5248 = vmatpush1.bf16.msra.mxu0 %v7095_v45 }
 0x800   :  { %5282 = vmatprep.subr.bf16.mxu0 %v7007_v3 }
 0x802   :  { %5280 = vmatpush1.bf16.msra.mxu1 %v7098_v53 }
 0x803   :  { %5314 = vmatprep.subr.bf16.mxu1 %v7009_v14 }
 0x87f   :  { %v2296_v61 = vpop.f32.mrb[14].mxu0  ;;  %v2367_v50 = vpop.f32.mrb[14].mxu1 }
 0x880   :  { %v5791_v26 = vadd.f32 %v2296_v61, %v6620_v35  ;;  %v2298_v44 = vpop.f32.mrb[15].mxu0  ;;  %v2369_v57 = vpop.f32.mrb[15].mxu1  ;;  %v5807_v22 = vadd.f32 %v2367_v50, %v6637_v59 }
 0x881   :  { %v5792_v56 = vadd.f32 %v2298_v44, %v6624_v38  ;;  %v5808_v48 = vadd.f32 %v2369_v57, %v6631_v52 }
 0x882   :  { %v4444_v49 = vmul.f32 -1.442695, %v5791_v26 }
 0x883   :  { %v4445_v2 = vmul.f32 -1.442695, %v5792_v56  ;;  %v4446_v4 = vmul.f32 -1.442695, %v5808_v48 }
 0x884   :  { %6030 = vpow2.f32 %v4444_v49 }
 0x885   :  { %6032 = vpow2.f32 %v4445_v2 }
 0x886   :  { %6034 = vpow2.f32 %v4446_v4 }
 0x887   :  { %6036 = vtanh.f32 %v5807_v22 }
 0x88e   :  { %v6031_v43 = vpop.eup %6030 }
 0x88f   :  { %v6033_v1 = vpop.eup %6032  ;;  %v2379_v9 = vadd.f32 1.0, %v6031_v43 }
 0x890   :  { %v2385_v15 = vadd.f32 1.0, %v6033_v1  ;;  %v6035_v35 = vpop.eup %6034 }
 0x891   :  { %6038 = vrcp.f32 %v2379_v9  ;;  %v6037_v5 = vpop.eup %6036  ;;  %v2392_v20 = vadd.f32 1.0, %v6035_v35 }
 0x892   :  { %6040 = vrcp.f32 %v2385_v15 }
 0x893   :  { %6042 = vrcp.f32 %v2392_v20 }
 0x89b   :  { %v6039_v38 = vpop.eup %6038 }
 0x89c   :  { %v6041_v7 = vpop.eup %6040  ;;  %v2396_v24 = vmul.f32 %v6039_v38, %v6037_v5 }
 0x89d   :  { %v2395_v27 = vmul.f32 %v6041_v7, %v6970_v51  ;;  %v6043_v59 = vpop.eup %6042  ;;  %v2474_v51 = vld [vmem:[%s7567_s6] sm:$0xf] }
 0x89e   :  { %v7153_v50 = vrot.slane %v2474_v51, %v183_v31  ;;  %v7157_v26 = vrot.slane %v2474_v51, %v187_v34  ;;  %v7163_v43 = vrot.slane %v2474_v51, %v195_v37  ;;  %v7168_v34 = vrot.slane %v2474_v51, %v191_v55 }
 0x89f   :  { %v2397_v52 = vadd.f32 %v2396_v24, %v2395_v27 }
 0x8a1   :  { %6044 = vtanh.f32 %v2397_v52 }
 0x8ab   :  { %v6045_v47 = vpop.eup %6044 }
 0x8ac   :  { %v2399_v61 = vmul.f32 %v6045_v47, %v6043_v59 }
 0x8ae   :  { %2603 = vmatmul.mubr.f32.gmra.mrb[30].mxu0 %v2399_v61  ;;  %2716 = vmatmul.mubr.f32.gmra.mrb[30].mxu1 %v2399_v61 }
 0x8af   :  { %2886 = vmatprep.mubr.f32.mxu0 %v6323_v0  ;;  %2957 = vmatprep.mubr.f32.mxu1 %v6323_v0 }
 0x8b2   :  { %2887 = vmatmul.mubr.f32.vlgmr.msra.gmra.mrb[16].mxu0 %v6323_v0  ;;  %2958 = vmatmul.mubr.f32.vlgmr.msra.gmra.mrb[16].mxu1 %v6323_v0 }
 0x8b3   :  { %5284 = vmatpush1.bf16.msra.mxu0 %v7011_v18  ;;  %5316 = vmatpush1.bf16.msra.mxu1 %v7014_v13 }
 0x8b4   :  { %5286 = vmatprep.subr.bf16.mxu0 %v7019_v46  ;;  %5318 = vmatprep.subr.bf16.mxu1 %v7021_v25 }
 0x8b5   :  { %3060 = vmatprep.mubr.f32.mxu0 %v6323_v0  ;;  %3131 = vmatprep.mubr.f32.mxu1 %v6323_v0 }
 0x8b7   :  { %5288 = vmatpush1.bf16.msra.mxu0 %v7023_v23  ;;  %5320 = vmatpush1.bf16.msra.mxu1 %v7026_v63 }
 0x8b8   :  { %5290 = vmatprep.subr.bf16.mxu0 %v7031_v42  ;;  %5322 = vmatprep.subr.bf16.mxu1 %v7033_v10 }
 0x8bb   :  { %5292 = vmatpush1.bf16.msra.mxu0 %v7035_v19  ;;  %5324 = vmatpush1.bf16.msra.mxu1 %v7038_v54 }
 0x8bc   :  { %5294 = vmatprep.subr.bf16.mxu0 %v7043_v33  ;;  %5326 = vmatprep.subr.bf16.mxu1 %v7045_v16 }
 0x8bf   :  { %5296 = vmatpush1.bf16.msra.mxu0 %v7047_v36  ;;  %5328 = vmatpush1.bf16.msra.mxu1 %v7050_v17 }
 0x8c0   :  { %5298 = vmatprep.subr.bf16.mxu0 %v7054_v12  ;;  %5330 = vmatprep.subr.bf16.mxu1 %v7056_v39 }
 0x8c3   :  { %5300 = vmatpush1.bf16.msra.mxu0 %v7059_v62  ;;  %5332 = vmatpush1.bf16.msra.mxu1 %v7063_v28 }
 0x8c4   :  { %5302 = vmatprep.subr.bf16.mxu0 %v7065_v60  ;;  %5334 = vmatprep.subr.bf16.mxu1 %v7067_v11 }
 0x8c7   :  { %5304 = vmatpush1.bf16.msra.mxu0 %v7070_v41  ;;  %5336 = vmatpush1.bf16.msra.mxu1 %v7074_v6 }
 0x8c8   :  { %5306 = vmatprep.subr.bf16.mxu0 %v7076_v32  ;;  %5338 = vmatprep.subr.bf16.mxu1 %v7079_v21 }
 0x8cb   :  { %5308 = vmatpush1.bf16.msra.mxu0 %v7082_v8  ;;  %5340 = vmatpush1.bf16.msra.mxu1 %v7086_v40 }
 0x8cc   :  { %5310 = vmatprep.subr.bf16.mxu0 %v7091_v29  ;;  %5342 = vmatprep.subr.bf16.mxu1 %v7093_v58 }
 0x8cf   :  { %5312 = vmatpush1.bf16.msra.mxu0 %v7095_v45  ;;  %5344 = vmatpush1.bf16.msra.mxu1 %v7098_v53 }
 0x8d0   :  { %5346 = vmatprep.subr.bf16.mxu0 %v7007_v3  ;;  %5378 = vmatprep.subr.bf16.mxu1 %v7009_v14 }
 0x985   :  { %v2888_v44 = vpop.f32.mrb[16].mxu0  ;;  %v2959_v57 = vpop.f32.mrb[16].mxu1 }
 0x986   :  { %v5809_v56 = vadd.f32 %v2888_v44, %v7153_v50  ;;  %v2890_v49 = vpop.f32.mrb[17].mxu0  ;;  %v2961_v2 = vpop.f32.mrb[17].mxu1  ;;  %v5825_v9 = vadd.f32 %v2959_v57, %v7168_v34 }
 0x987   :  { %v5810_v48 = vadd.f32 %v2890_v49, %v7157_v26  ;;  %v5826_v31 = vadd.f32 %v2961_v2, %v7163_v43 }
 0x988   :  { %v4447_v4 = vmul.f32 -1.442695, %v5809_v56 }
 0x989   :  { %v4448_v22 = vmul.f32 -1.442695, %v5810_v48  ;;  %v4449_v1 = vmul.f32 -1.442695, %v5826_v31 }
 0x98a   :  { %6046 = vpow2.f32 %v4447_v4 }
 0x98b   :  { %6048 = vpow2.f32 %v4448_v22 }
 0x98c   :  { %6050 = vpow2.f32 %v4449_v1 }
 0x98d   :  { %6052 = vtanh.f32 %v5825_v9 }
 0x994   :  { %v6047_v15 = vpop.eup %6046 }
 0x995   :  { %v6049_v35 = vpop.eup %6048  ;;  %v2971_v5 = vadd.f32 1.0, %v6047_v15 }
 0x996   :  { %v2977_v38 = vadd.f32 1.0, %v6049_v35  ;;  %v6051_v37 = vpop.eup %6050 }
 0x997   :  { %6054 = vrcp.f32 %v2971_v5  ;;  %v6053_v7 = vpop.eup %6052  ;;  %v2984_v52 = vadd.f32 1.0, %v6051_v37 }
 0x998   :  { %6056 = vrcp.f32 %v2977_v38 }
 0x999   :  { %6058 = vrcp.f32 %v2984_v52 }
 0x9a1   :  { %v6055_v24 = vpop.eup %6054 }
 0x9a2   :  { %v6057_v20 = vpop.eup %6056  ;;  %v2988_v27 = vmul.f32 %v6055_v24, %v6053_v7 }
 0x9a3   :  { %v2987_v30 = vmul.f32 0.0, %v6057_v20  ;;  %v6059_v59 = vpop.eup %6058 }
 0x9a5   :  { %v7171_v55 = vadd.f32 %v2988_v27, %v2987_v30 }
 0x9a7   :  { %6060 = vtanh.f32 %v7171_v55 }
 0x9b1   :  { %v6061_v47 = vpop.eup %6060 }
 0x9b2   :  { %v2991_v61 = vmul.f32 %v6061_v47, %v6059_v59 }
 0x9b4   :  { %3061 = vmatmul.mubr.f32.vlgmr.msra.gmra.mrb[18].mxu0 %v2991_v61  ;;  %3132 = vmatmul.mubr.f32.vlgmr.msra.gmra.mrb[18].mxu1 %v2991_v61 }
 0x9b5   :  { %5348 = vmatpush1.bf16.msra.mxu0 %v7011_v18  ;;  %5380 = vmatpush1.bf16.msra.mxu1 %v7014_v13 }
 0x9b6   :  { %5350 = vmatprep.subr.bf16.mxu0 %v7019_v46  ;;  %5382 = vmatprep.subr.bf16.mxu1 %v7021_v25 }
 0x9b7   :  { %3234 = vmatprep.mubr.f32.mxu0 %v6323_v0  ;;  %3305 = vmatprep.mubr.f32.mxu1 %v6323_v0 }
 0x9b9   :  { %5352 = vmatpush1.bf16.msra.mxu0 %v7023_v23  ;;  %5384 = vmatpush1.bf16.msra.mxu1 %v7026_v63 }
 0x9ba   :  { %5354 = vmatprep.subr.bf16.mxu0 %v7031_v42  ;;  %5386 = vmatprep.subr.bf16.mxu1 %v7033_v10 }
 0x9bd   :  { %5356 = vmatpush1.bf16.msra.mxu0 %v7035_v19  ;;  %5388 = vmatpush1.bf16.msra.mxu1 %v7038_v54 }
 0x9be   :  { %5358 = vmatprep.subr.bf16.mxu0 %v7043_v33  ;;  %5390 = vmatprep.subr.bf16.mxu1 %v7045_v16 }
 0x9c1   :  { %5360 = vmatpush1.bf16.msra.mxu0 %v7047_v36  ;;  %5392 = vmatpush1.bf16.msra.mxu1 %v7050_v17 }
 0x9c2   :  { %5362 = vmatprep.subr.bf16.mxu0 %v7054_v12  ;;  %5394 = vmatprep.subr.bf16.mxu1 %v7056_v39 }
 0x9c5   :  { %5364 = vmatpush1.bf16.msra.mxu0 %v7059_v62  ;;  %5396 = vmatpush1.bf16.msra.mxu1 %v7063_v28 }
 0x9c6   :  { %5366 = vmatprep.subr.bf16.mxu0 %v7065_v60  ;;  %5398 = vmatprep.subr.bf16.mxu1 %v7067_v11 }
 0x9c9   :  { %5368 = vmatpush1.bf16.msra.mxu0 %v7070_v41  ;;  %5400 = vmatpush1.bf16.msra.mxu1 %v7074_v6 }
 0x9ca   :  { %5370 = vmatprep.subr.bf16.mxu0 %v7076_v32  ;;  %5402 = vmatprep.subr.bf16.mxu1 %v7079_v21 }
 0x9cd   :  { %5372 = vmatpush1.bf16.msra.mxu0 %v7082_v8  ;;  %5404 = vmatpush1.bf16.msra.mxu1 %v7086_v40 }
 0x9ce   :  { %5374 = vmatprep.subr.bf16.mxu0 %v7091_v29  ;;  %5406 = vmatprep.subr.bf16.mxu1 %v7093_v58 }
 0x9d1   :  { %5376 = vmatpush1.bf16.msra.mxu0 %v7095_v45  ;;  %5408 = vmatpush1.bf16.msra.mxu1 %v7098_v53 }
 0x9d2   :  { %5410 = vmatprep.subr.bf16.mxu0 %v7007_v3  ;;  %5442 = vmatprep.subr.bf16.mxu1 %v7009_v14 }
 0xa87   :  { %v3062_v51 = vpop.f32.mrb[18].mxu0  ;;  %v3133_v44 = vpop.f32.mrb[18].mxu1 }
 0xa88   :  { %v5811_v57 = vadd.f32 %v3062_v51, %v7153_v50  ;;  %v3064_v56 = vpop.f32.mrb[19].mxu0  ;;  %v3135_v49 = vpop.f32.mrb[19].mxu1  ;;  %v5827_v1 = vadd.f32 %v3133_v44, %v7168_v34 }
 0xa89   :  { %v5812_v2 = vadd.f32 %v3064_v56, %v7157_v26  ;;  %v5828_v22 = vadd.f32 %v3135_v49, %v7163_v43 }
 0xa8a   :  { %v4450_v48 = vmul.f32 -1.442695, %v5811_v57 }
 0xa8b   :  { %v4451_v4 = vmul.f32 -1.442695, %v5812_v2  ;;  %v4452_v31 = vmul.f32 -1.442695, %v5828_v22 }
 0xa8c   :  { %6062 = vpow2.f32 %v4450_v48 }
 0xa8d   :  { %6064 = vpow2.f32 %v4451_v4 }
 0xa8e   :  { %6066 = vpow2.f32 %v4452_v31 }
 0xa8f   :  { %6068 = vtanh.f32 %v5827_v1 }
 0xa96   :  { %v6063_v9 = vpop.eup %6062 }
 0xa97   :  { %v6065_v15 = vpop.eup %6064  ;;  %v3145_v35 = vadd.f32 1.0, %v6063_v9 }
 0xa98   :  { %v3151_v5 = vadd.f32 1.0, %v6065_v15  ;;  %v6067_v38 = vpop.eup %6066 }
 0xa99   :  { %6070 = vrcp.f32 %v3145_v35  ;;  %v6069_v37 = vpop.eup %6068  ;;  %v3158_v27 = vadd.f32 1.0, %v6067_v38 }
 0xa9a   :  { %6072 = vrcp.f32 %v3151_v5 }
 0xa9b   :  { %6074 = vrcp.f32 %v3158_v27 }
 0xaa3   :  { %v6071_v7 = vpop.eup %6070 }
 0xaa4   :  { %v6073_v24 = vpop.eup %6072  ;;  %v3162_v20 = vmul.f32 %v6071_v7, %v6069_v37 }
 0xaa5   :  { %v3161_v52 = vmul.f32 %v6073_v24, %v7171_v55  ;;  %v6075_v59 = vpop.eup %6074 }
 0xaa7   :  { %v7213_v30 = vadd.f32 %v3162_v20, %v3161_v52 }
 0xaa9   :  { %6076 = vtanh.f32 %v7213_v30 }
 0xab3   :  { %v6077_v47 = vpop.eup %6076 }
 0xab4   :  { %v3165_v61 = vmul.f32 %v6077_v47, %v6075_v59 }
 0xab6   :  { %3235 = vmatmul.mubr.f32.vlgmr.msra.gmra.mrb[20].mxu0 %v3165_v61  ;;  %3306 = vmatmul.mubr.f32.vlgmr.msra.gmra.mrb[20].mxu1 %v3165_v61 }
 0xab7   :  { %5412 = vmatpush1.bf16.msra.mxu0 %v7011_v18  ;;  %5444 = vmatpush1.bf16.msra.mxu1 %v7014_v13 }
 0xab8   :  { %5414 = vmatprep.subr.bf16.mxu0 %v7019_v46  ;;  %5446 = vmatprep.subr.bf16.mxu1 %v7021_v25 }
 0xab9   :  { %3408 = vmatprep.mubr.f32.mxu0 %v6323_v0  ;;  %3479 = vmatprep.mubr.f32.mxu1 %v6323_v0 }
 0xabb   :  { %5416 = vmatpush1.bf16.msra.mxu0 %v7023_v23  ;;  %5448 = vmatpush1.bf16.msra.mxu1 %v7026_v63 }
 0xabc   :  { %5418 = vmatprep.subr.bf16.mxu0 %v7031_v42  ;;  %5450 = vmatprep.subr.bf16.mxu1 %v7033_v10 }
 0xabf   :  { %5420 = vmatpush1.bf16.msra.mxu0 %v7035_v19  ;;  %5452 = vmatpush1.bf16.msra.mxu1 %v7038_v54 }
 0xac0   :  { %5422 = vmatprep.subr.bf16.mxu0 %v7043_v33  ;;  %5454 = vmatprep.subr.bf16.mxu1 %v7045_v16 }
 0xac3   :  { %5424 = vmatpush1.bf16.msra.mxu0 %v7047_v36  ;;  %5456 = vmatpush1.bf16.msra.mxu1 %v7050_v17 }
 0xac4   :  { %5426 = vmatprep.subr.bf16.mxu0 %v7054_v12  ;;  %5458 = vmatprep.subr.bf16.mxu1 %v7056_v39 }
 0xac7   :  { %5428 = vmatpush1.bf16.msra.mxu0 %v7059_v62  ;;  %5460 = vmatpush1.bf16.msra.mxu1 %v7063_v28 }
 0xac8   :  { %5430 = vmatprep.subr.bf16.mxu0 %v7065_v60  ;;  %5462 = vmatprep.subr.bf16.mxu1 %v7067_v11 }
 0xacb   :  { %5432 = vmatpush1.bf16.msra.mxu0 %v7070_v41  ;;  %5464 = vmatpush1.bf16.msra.mxu1 %v7074_v6 }
 0xacc   :  { %5434 = vmatprep.subr.bf16.mxu0 %v7076_v32  ;;  %5466 = vmatprep.subr.bf16.mxu1 %v7079_v21 }
 0xacf   :  { %5436 = vmatpush1.bf16.msra.mxu0 %v7082_v8  ;;  %5468 = vmatpush1.bf16.msra.mxu1 %v7086_v40 }
 0xad0   :  { %5438 = vmatprep.subr.bf16.mxu0 %v7091_v29  ;;  %5470 = vmatprep.subr.bf16.mxu1 %v7093_v58 }
 0xad3   :  { %5440 = vmatpush1.bf16.msra.mxu0 %v7095_v45  ;;  %5472 = vmatpush1.bf16.msra.mxu1 %v7098_v53 }
 0xad4   :  { %5474 = vmatprep.subr.bf16.mxu0 %v7007_v3  ;;  %5506 = vmatprep.subr.bf16.mxu1 %v7009_v14 }
 0xb89   :  { %v3236_v55 = vpop.f32.mrb[20].mxu0  ;;  %v3307_v51 = vpop.f32.mrb[20].mxu1 }
 0xb8a   :  { %v5813_v44 = vadd.f32 %v3236_v55, %v7153_v50  ;;  %v3238_v57 = vpop.f32.mrb[21].mxu0  ;;  %v3309_v56 = vpop.f32.mrb[21].mxu1  ;;  %v5829_v31 = vadd.f32 %v3307_v51, %v7168_v34 }
 0xb8b   :  { %v5814_v49 = vadd.f32 %v3238_v57, %v7157_v26  ;;  %v5830_v4 = vadd.f32 %v3309_v56, %v7163_v43 }
 0xb8c   :  { %v4453_v2 = vmul.f32 -1.442695, %v5813_v44 }
 0xb8d   :  { %v4454_v48 = vmul.f32 -1.442695, %v5814_v49  ;;  %v4455_v22 = vmul.f32 -1.442695, %v5830_v4 }
 0xb8e   :  { %6078 = vpow2.f32 %v4453_v2 }
 0xb8f   :  { %6080 = vpow2.f32 %v4454_v48 }
 0xb90   :  { %6082 = vpow2.f32 %v4455_v22 }
 0xb91   :  { %6084 = vtanh.f32 %v5829_v31 }
 0xb98   :  { %v6079_v1 = vpop.eup %6078 }
 0xb99   :  { %v6081_v9 = vpop.eup %6080  ;;  %v3319_v15 = vadd.f32 1.0, %v6079_v1 }
 0xb9a   :  { %v3325_v35 = vadd.f32 1.0, %v6081_v9  ;;  %v6083_v5 = vpop.eup %6082 }
 0xb9b   :  { %6086 = vrcp.f32 %v3319_v15  ;;  %v6085_v38 = vpop.eup %6084  ;;  %v3332_v20 = vadd.f32 1.0, %v6083_v5 }
 0xb9c   :  { %6088 = vrcp.f32 %v3325_v35 }
 0xb9d   :  { %6090 = vrcp.f32 %v3332_v20 }
 0xba5   :  { %v6087_v37 = vpop.eup %6086 }
 0xba6   :  { %v6089_v7 = vpop.eup %6088  ;;  %v3336_v24 = vmul.f32 %v6087_v37, %v6085_v38 }
 0xba7   :  { %v3335_v27 = vmul.f32 %v6089_v7, %v7213_v30  ;;  %v6091_v59 = vpop.eup %6090 }
 0xba9   :  { %v7255_v52 = vadd.f32 %v3336_v24, %v3335_v27 }
 0xbab   :  { %6092 = vtanh.f32 %v7255_v52 }
 0xbb5   :  { %v6093_v47 = vpop.eup %6092 }
 0xbb6   :  { %v3339_v61 = vmul.f32 %v6093_v47, %v6091_v59 }
 0xbb8   :  { %3409 = vmatmul.mubr.f32.vlgmr.msra.gmra.mrb[22].mxu0 %v3339_v61  ;;  %3480 = vmatmul.mubr.f32.vlgmr.msra.gmra.mrb[22].mxu1 %v3339_v61 }
 0xbb9   :  { %5476 = vmatpush1.bf16.msra.mxu0 %v7011_v18  ;;  %5508 = vmatpush1.bf16.msra.mxu1 %v7014_v13 }
 0xbba   :  { %5478 = vmatprep.subr.bf16.mxu0 %v7019_v46  ;;  %5510 = vmatprep.subr.bf16.mxu1 %v7021_v25 }
 0xbbb   :  { %3582 = vmatprep.mubr.f32.mxu0 %v6323_v0  ;;  %3653 = vmatprep.mubr.f32.mxu1 %v6323_v0 }
 0xbbd   :  { %5480 = vmatpush1.bf16.msra.mxu0 %v7023_v23  ;;  %5512 = vmatpush1.bf16.msra.mxu1 %v7026_v63 }
 0xbbe   :  { %5482 = vmatprep.subr.bf16.mxu0 %v7031_v42  ;;  %5514 = vmatprep.subr.bf16.mxu1 %v7033_v10 }
 0xbc1   :  { %5484 = vmatpush1.bf16.msra.mxu0 %v7035_v19  ;;  %5516 = vmatpush1.bf16.msra.mxu1 %v7038_v54 }
 0xbc2   :  { %5486 = vmatprep.subr.bf16.mxu0 %v7043_v33  ;;  %5518 = vmatprep.subr.bf16.mxu1 %v7045_v16 }
 0xbc5   :  { %5488 = vmatpush1.bf16.msra.mxu0 %v7047_v36  ;;  %5520 = vmatpush1.bf16.msra.mxu1 %v7050_v17 }
 0xbc6   :  { %5490 = vmatprep.subr.bf16.mxu0 %v7054_v12  ;;  %5522 = vmatprep.subr.bf16.mxu1 %v7056_v39 }
 0xbc9   :  { %5492 = vmatpush1.bf16.msra.mxu0 %v7059_v62  ;;  %5524 = vmatpush1.bf16.msra.mxu1 %v7063_v28 }
 0xbca   :  { %5494 = vmatprep.subr.bf16.mxu0 %v7065_v60  ;;  %5526 = vmatprep.subr.bf16.mxu1 %v7067_v11 }
 0xbcd   :  { %5496 = vmatpush1.bf16.msra.mxu0 %v7070_v41  ;;  %5528 = vmatpush1.bf16.msra.mxu1 %v7074_v6 }
 0xbce   :  { %5498 = vmatprep.subr.bf16.mxu0 %v7076_v32  ;;  %5530 = vmatprep.subr.bf16.mxu1 %v7079_v21 }
 0xbd1   :  { %5500 = vmatpush1.bf16.msra.mxu0 %v7082_v8  ;;  %5532 = vmatpush1.bf16.msra.mxu1 %v7086_v40 }
 0xbd2   :  { %5502 = vmatprep.subr.bf16.mxu0 %v7091_v29  ;;  %5534 = vmatprep.subr.bf16.mxu1 %v7093_v58 }
 0xbd5   :  { %5504 = vmatpush1.bf16.msra.mxu0 %v7095_v45  ;;  %5536 = vmatpush1.bf16.msra.mxu1 %v7098_v53 }
 0xbd6   :  { %5538 = vmatprep.subr.bf16.mxu0 %v7007_v3  ;;  %5570 = vmatprep.subr.bf16.mxu1 %v7009_v14 }
 0xc8b   :  { %v3410_v30 = vpop.f32.mrb[22].mxu0  ;;  %v3481_v55 = vpop.f32.mrb[22].mxu1 }
 0xc8c   :  { %v5815_v51 = vadd.f32 %v3410_v30, %v7153_v50  ;;  %v3412_v44 = vpop.f32.mrb[23].mxu0  ;;  %v3483_v57 = vpop.f32.mrb[23].mxu1  ;;  %v5831_v22 = vadd.f32 %v3481_v55, %v7168_v34 }
 0xc8d   :  { %v5816_v56 = vadd.f32 %v3412_v44, %v7157_v26  ;;  %v5832_v48 = vadd.f32 %v3483_v57, %v7163_v43 }
 0xc8e   :  { %v4456_v49 = vmul.f32 -1.442695, %v5815_v51 }
 0xc8f   :  { %v4457_v2 = vmul.f32 -1.442695, %v5816_v56  ;;  %v4458_v4 = vmul.f32 -1.442695, %v5832_v48 }
 0xc90   :  { %6094 = vpow2.f32 %v4456_v49 }
 0xc91   :  { %6096 = vpow2.f32 %v4457_v2 }
 0xc92   :  { %6098 = vpow2.f32 %v4458_v4 }
 0xc93   :  { %6100 = vtanh.f32 %v5831_v22 }
 0xc9a   :  { %v6095_v31 = vpop.eup %6094 }
 0xc9b   :  { %v6097_v1 = vpop.eup %6096  ;;  %v3493_v9 = vadd.f32 1.0, %v6095_v31 }
 0xc9c   :  { %v3499_v15 = vadd.f32 1.0, %v6097_v1  ;;  %v6099_v35 = vpop.eup %6098 }
 0xc9d   :  { %6102 = vrcp.f32 %v3493_v9  ;;  %v6101_v5 = vpop.eup %6100  ;;  %v3506_v24 = vadd.f32 1.0, %v6099_v35 }
 0xc9e   :  { %6104 = vrcp.f32 %v3499_v15 }
 0xc9f   :  { %6106 = vrcp.f32 %v3506_v24 }
 0xca7   :  { %v6103_v38 = vpop.eup %6102 }
 0xca8   :  { %v6105_v37 = vpop.eup %6104  ;;  %v3510_v7 = vmul.f32 %v6103_v38, %v6101_v5 }
 0xca9   :  { %v3509_v20 = vmul.f32 %v6105_v37, %v7255_v52  ;;  %v6107_v59 = vpop.eup %6106 }
 0xcab   :  { %v7297_v27 = vadd.f32 %v3510_v7, %v3509_v20 }
 0xcad   :  { %6108 = vtanh.f32 %v7297_v27 }
 0xcb7   :  { %v6109_v47 = vpop.eup %6108 }
 0xcb8   :  { %v3513_v61 = vmul.f32 %v6109_v47, %v6107_v59 }
 0xcba   :  { %3583 = vmatmul.mubr.f32.vlgmr.msra.gmra.mrb[24].mxu0 %v3513_v61  ;;  %3654 = vmatmul.mubr.f32.vlgmr.msra.gmra.mrb[24].mxu1 %v3513_v61 }
 0xcbb   :  { %5540 = vmatpush1.bf16.msra.mxu0 %v7011_v18  ;;  %5572 = vmatpush1.bf16.msra.mxu1 %v7014_v13 }
 0xcbc   :  { %5542 = vmatprep.subr.bf16.mxu0 %v7019_v46  ;;  %5574 = vmatprep.subr.bf16.mxu1 %v7021_v25 }
 0xcbd   :  { %3756 = vmatprep.mubr.f32.mxu0 %v6323_v0  ;;  %3827 = vmatprep.mubr.f32.mxu1 %v6323_v0 }
 0xcbf   :  { %5544 = vmatpush1.bf16.msra.mxu0 %v7023_v23  ;;  %5576 = vmatpush1.bf16.msra.mxu1 %v7026_v63 }
 0xcc0   :  { %5546 = vmatprep.subr.bf16.mxu0 %v7031_v42  ;;  %5578 = vmatprep.subr.bf16.mxu1 %v7033_v10 }
 0xcc3   :  { %5548 = vmatpush1.bf16.msra.mxu0 %v7035_v19  ;;  %5580 = vmatpush1.bf16.msra.mxu1 %v7038_v54 }
 0xcc4   :  { %5550 = vmatprep.subr.bf16.mxu0 %v7043_v33  ;;  %5582 = vmatprep.subr.bf16.mxu1 %v7045_v16 }
 0xcc7   :  { %5552 = vmatpush1.bf16.msra.mxu0 %v7047_v36  ;;  %5584 = vmatpush1.bf16.msra.mxu1 %v7050_v17 }
 0xcc8   :  { %5554 = vmatprep.subr.bf16.mxu0 %v7054_v12  ;;  %5586 = vmatprep.subr.bf16.mxu1 %v7056_v39 }
 0xccb   :  { %5556 = vmatpush1.bf16.msra.mxu0 %v7059_v62  ;;  %5588 = vmatpush1.bf16.msra.mxu1 %v7063_v28 }
 0xccc   :  { %5558 = vmatprep.subr.bf16.mxu0 %v7065_v60  ;;  %5590 = vmatprep.subr.bf16.mxu1 %v7067_v11 }
 0xccf   :  { %5560 = vmatpush1.bf16.msra.mxu0 %v7070_v41  ;;  %5592 = vmatpush1.bf16.msra.mxu1 %v7074_v6 }
 0xcd0   :  { %5562 = vmatprep.subr.bf16.mxu0 %v7076_v32  ;;  %5594 = vmatprep.subr.bf16.mxu1 %v7079_v21 }
 0xcd3   :  { %5564 = vmatpush1.bf16.msra.mxu0 %v7082_v8  ;;  %5596 = vmatpush1.bf16.msra.mxu1 %v7086_v40 }
 0xcd4   :  { %5566 = vmatprep.subr.bf16.mxu0 %v7091_v29  ;;  %5598 = vmatprep.subr.bf16.mxu1 %v7093_v58 }
 0xcd7   :  { %5568 = vmatpush1.bf16.msra.mxu0 %v7095_v45  ;;  %5600 = vmatpush1.bf16.msra.mxu1 %v7098_v53 }
 0xcd8   :  { %5602 = vmatprep.subr.bf16.mxu0 %v7007_v3  ;;  %5634 = vmatprep.subr.bf16.mxu1 %v7009_v14 }
 0xd8d   :  { %v3584_v52 = vpop.f32.mrb[24].mxu0  ;;  %v3655_v30 = vpop.f32.mrb[24].mxu1 }
 0xd8e   :  { %v5817_v55 = vadd.f32 %v3584_v52, %v7153_v50  ;;  %v3586_v51 = vpop.f32.mrb[25].mxu0  ;;  %v3657_v44 = vpop.f32.mrb[25].mxu1  ;;  %v5833_v4 = vadd.f32 %v3655_v30, %v7168_v34 }
 0xd8f   :  { %v5818_v57 = vadd.f32 %v3586_v51, %v7157_v26  ;;  %v5834_v2 = vadd.f32 %v3657_v44, %v7163_v43 }
 0xd90   :  { %v4459_v56 = vmul.f32 -1.442695, %v5817_v55 }
 0xd91   :  { %v4460_v49 = vmul.f32 -1.442695, %v5818_v57  ;;  %v4461_v48 = vmul.f32 -1.442695, %v5834_v2 }
 0xd92   :  { %6110 = vpow2.f32 %v4459_v56 }
 0xd93   :  { %6112 = vpow2.f32 %v4460_v49 }
 0xd94   :  { %6114 = vpow2.f32 %v4461_v48 }
 0xd95   :  { %6116 = vtanh.f32 %v5833_v4 }
 0xd9c   :  { %v6111_v22 = vpop.eup %6110 }
 0xd9d   :  { %v6113_v31 = vpop.eup %6112  ;;  %v3667_v1 = vadd.f32 1.0, %v6111_v22 }
 0xd9e   :  { %v3673_v9 = vadd.f32 1.0, %v6113_v31  ;;  %v6115_v15 = vpop.eup %6114 }
 0xd9f   :  { %6118 = vrcp.f32 %v3667_v1  ;;  %v6117_v35 = vpop.eup %6116  ;;  %v3680_v7 = vadd.f32 1.0, %v6115_v15 }
 0xda0   :  { %6120 = vrcp.f32 %v3673_v9 }
 0xda1   :  { %6122 = vrcp.f32 %v3680_v7 }
 0xda9   :  { %v6119_v5 = vpop.eup %6118 }
 0xdaa   :  { %v6121_v38 = vpop.eup %6120  ;;  %v3684_v37 = vmul.f32 %v6119_v5, %v6117_v35 }
 0xdab   :  { %v3683_v24 = vmul.f32 %v6121_v38, %v7297_v27  ;;  %v6123_v59 = vpop.eup %6122 }
 0xdad   :  { %v7339_v20 = vadd.f32 %v3684_v37, %v3683_v24 }
 0xdaf   :  { %6124 = vtanh.f32 %v7339_v20 }
 0xdb9   :  { %v6125_v47 = vpop.eup %6124 }
 0xdba   :  { %v3687_v61 = vmul.f32 %v6125_v47, %v6123_v59  ;;  %v4213_v47 = vld [vmem:[%s7568_s7 + $0x18] sm:$0xff] }
 0xdbc   :  { %3757 = vmatmul.mubr.f32.vlgmr.msra.gmra.mrb[26].mxu0 %v3687_v61  ;;  %3828 = vmatmul.mubr.f32.vlgmr.msra.gmra.mrb[26].mxu1 %v3687_v61 }
 0xdbd   :  { %5604 = vmatpush1.bf16.msra.mxu0 %v7011_v18  ;;  %5636 = vmatpush1.bf16.msra.mxu1 %v7014_v13 }
 0xdbe   :  { %5606 = vmatprep.subr.bf16.mxu0 %v7019_v46  ;;  %5638 = vmatprep.subr.bf16.mxu1 %v7021_v25 }
 0xdbf   :  { %3930 = vmatprep.mubr.f32.mxu0 %v6323_v0  ;;  %4001 = vmatprep.mubr.f32.mxu1 %v6323_v0 }
 0xdc1   :  { %5608 = vmatpush1.bf16.msra.mxu0 %v7023_v23  ;;  %5640 = vmatpush1.bf16.msra.mxu1 %v7026_v63 }
 0xdc2   :  { %5610 = vmatprep.subr.bf16.mxu0 %v7031_v42  ;;  %5642 = vmatprep.subr.bf16.mxu1 %v7033_v10 }
 0xdc5   :  { %5612 = vmatpush1.bf16.msra.mxu0 %v7035_v19  ;;  %5644 = vmatpush1.bf16.msra.mxu1 %v7038_v54 }
 0xdc6   :  { %5614 = vmatprep.subr.bf16.mxu0 %v7043_v33  ;;  %5646 = vmatprep.subr.bf16.mxu1 %v7045_v16 }
 0xdc9   :  { %5616 = vmatpush1.bf16.msra.mxu0 %v7047_v36  ;;  %5648 = vmatpush1.bf16.msra.mxu1 %v7050_v17 }
 0xdca   :  { %5618 = vmatprep.subr.bf16.mxu0 %v7054_v12  ;;  %5650 = vmatprep.subr.bf16.mxu1 %v7056_v39 }
 0xdcd   :  { %5620 = vmatpush1.bf16.msra.mxu0 %v7059_v62  ;;  %5652 = vmatpush1.bf16.msra.mxu1 %v7063_v28 }
 0xdce   :  { %5622 = vmatprep.subr.bf16.mxu0 %v7065_v60  ;;  %5654 = vmatprep.subr.bf16.mxu1 %v7067_v11 }
 0xdd1   :  { %5624 = vmatpush1.bf16.msra.mxu0 %v7070_v41  ;;  %5656 = vmatpush1.bf16.msra.mxu1 %v7074_v6 }
 0xdd2   :  { %5626 = vmatprep.subr.bf16.mxu0 %v7076_v32  ;;  %5658 = vmatprep.subr.bf16.mxu1 %v7079_v21 }
 0xdd5   :  { %5628 = vmatpush1.bf16.msra.mxu0 %v7082_v8  ;;  %5660 = vmatpush1.bf16.msra.mxu1 %v7086_v40 }
 0xdd6   :  { %5630 = vmatprep.subr.bf16.mxu0 %v7091_v29  ;;  %5662 = vmatprep.subr.bf16.mxu1 %v7093_v58 }
 0xdd9   :  { %5632 = vmatpush1.bf16.msra.mxu0 %v7095_v45  ;;  %5664 = vmatpush1.bf16.msra.mxu1 %v7098_v53 }
 0xdda   :  { %5666 = vmatprep.subr.bf16.mxu0 %v7007_v3  ;;  %5698 = vmatprep.subr.bf16.mxu1 %v7009_v14 }
 0xe8f   :  { %v3758_v27 = vpop.f32.mrb[26].mxu0  ;;  %v3829_v52 = vpop.f32.mrb[26].mxu1 }
 0xe90   :  { %v5819_v30 = vadd.f32 %v3758_v27, %v7153_v50  ;;  %v3760_v55 = vpop.f32.mrb[27].mxu0  ;;  %v3831_v51 = vpop.f32.mrb[27].mxu1  ;;  %v5835_v48 = vadd.f32 %v3829_v52, %v7168_v34  ;;  %v4214_v27 = vld [vmem:[%s7568_s7 + $0x20] sm:$0xff]  ;;  %v4215_v52 = vld [vmem:[%s7568_s7 + $0x28] sm:$0xff] }
 0xe91   :  { %v5820_v44 = vadd.f32 %v3760_v55, %v7157_v26  ;;  %v5836_v49 = vadd.f32 %v3831_v51, %v7163_v43  ;;  %v4216_v55 = vld [vmem:[%s7568_s7 + $0x30] sm:$0xff]  ;;  %v4217_v51 = vld [vmem:[%s7568_s7 + $0x38] sm:$0xff] }
 0xe92   :  { %v4462_v57 = vmul.f32 -1.442695, %v5819_v30  ;;  %v5736_v30 = vpack.c.bf16 %v4215_v52, %v4214_v27 }
 0xe93   :  { %v4463_v56 = vmul.f32 -1.442695, %v5820_v44  ;;  %v4464_v2 = vmul.f32 -1.442695, %v5836_v49  ;;  %v5739_v44 = vpack.c.bf16 %v4217_v51, %v4216_v55  ;;  %v4319_v55 = vld [vmem:[%s7570_s9 + $0x78] sm:$0xff] }
 0xe94   :  { %6126 = vpow2.f32 %v4462_v57  ;;  %v4218_v57 = vld [vmem:[%s7568_s7 + $0x40] sm:$0xff] }
 0xe95   :  { %6128 = vpow2.f32 %v4463_v56  ;;  %v4219_v56 = vld [vmem:[%s7568_s7 + $0x48] sm:$0xff] }
 0xe96   :  { %6130 = vpow2.f32 %v4464_v2  ;;  %v5742_v49 = vpack.c.bf16 %v4219_v56, %v4218_v57  ;;  %v4220_v2 = vld [vmem:[%s7568_s7 + $0x50] sm:$0xff] }
 0xe97   :  { %6132 = vtanh.f32 %v5835_v48  ;;  %v4221_v48 = vld [vmem:[%s7568_s7 + $0x58] sm:$0xff] }
 0xe9e   :  { %v6127_v3 = vpop.eup %6126 }
 0xe9f   :  { %v6129_v4 = vpop.eup %6128  ;;  %v3841_v14 = vadd.f32 1.0, %v6127_v3  ;;  %v4222_v3 = vld [vmem:[%s7568_s7 + $0x60] sm:$0xff] }
 0xea0   :  { %v3847_v22 = vadd.f32 1.0, %v6129_v4  ;;  %v6131_v31 = vpop.eup %6130  ;;  %v5745_v4 = vpack.c.bf16 %v4221_v48, %v4220_v2  ;;  %v4472_v2 = vld [vmem:[%s7571_s10] ss:$0 sm:$0xff] }
 0xea1   :  { %6134 = vrcp.f32 %v3841_v14  ;;  %v6133_v1 = vpop.eup %6132  ;;  %v3854_v5 = vadd.f32 1.0, %v6131_v31  ;;  %v4223_v14 = vld [vmem:[%s7568_s7 + $0x68] sm:$0xff]  ;;  %v4224_v31 = vld [vmem:[%s7568_s7 + $0x70] sm:$0xff] }
 0xea2   :  { %6136 = vrcp.f32 %v3847_v22  ;;  %v5748_v22 = vpack.c.bf16 %v4223_v14, %v4222_v3 }
 0xea3   :  { %6138 = vrcp.f32 %v3854_v5 }
 0xeab   :  { %v6135_v9 = vpop.eup %6134 }
 0xeac   :  { %v6137_v15 = vpop.eup %6136  ;;  %v3858_v35 = vmul.f32 %v6135_v9, %v6133_v1  ;;  %v4225_v1 = vld [vmem:[%s7568_s7 + $0x78] sm:$0xff] }
 0xead   :  { %v3857_v38 = vmul.f32 %v6137_v15, %v7339_v20  ;;  %v6139_v7 = vpop.eup %6138  ;;  %v4212_v20 = vld [vmem:[%s7568_s7 + $0x10] sm:$0xff]  ;;  %v5751_v9 = vpack.c.bf16 %v4225_v1, %v4224_v31  ;;  %v4305_v15 = vld [vmem:[%s7570_s9 + $0x8] sm:$0xff] }
 0xeae   :  { %v5733_v61 = vpack.c.bf16 %v4213_v47, %v4212_v20 }
 0xeaf   :  { %v7381_v37 = vadd.f32 %v3858_v35, %v3857_v38  ;;  %v4306_v35 = vld [vmem:[%s7570_s9 + $0x10] sm:$0xff]  ;;  %v4307_v38 = vld [vmem:[%s7570_s9 + $0x18] sm:$0xff] }
 0xeb1   :  { %6140 = vtanh.f32 %v7381_v37 }
 0xebb   :  { %v6141_v24 = vpop.eup %6140 }
 0xebc   :  { %v3861_v59 = vmul.f32 %v6141_v24, %v6139_v7  ;;  %v4308_v7 = vld [vmem:[%s7570_s9 + $0x20] sm:$0xff]  ;;  %v4309_v24 = vld [vmem:[%s7570_s9 + $0x28] sm:$0xff] }
 0xebe   :  { %3931 = vmatmul.mubr.f32.vlgmr.msra.gmra.mrb[28].mxu0 %v3861_v59  ;;  %4002 = vmatmul.mubr.f32.vlgmr.msra.gmra.mrb[28].mxu1 %v3861_v59  ;;  %v5760_v59 = vpack.c.bf16 %v4309_v24, %v4308_v7 }
 0xebf   :  { %5668 = vmatpush1.bf16.msra.mxu0 %v7011_v18  ;;  %5700 = vmatpush1.bf16.msra.mxu1 %v7014_v13 }
 0xec0   :  { %5670 = vmatprep.subr.bf16.mxu0 %v7019_v46  ;;  %5702 = vmatprep.subr.bf16.mxu1 %v7021_v25 }
 0xec1   :  { %4104 = vmatprep.mubr.f32.mxu0 %v6323_v0  ;;  %4175 = vmatprep.mubr.f32.mxu1 %v6323_v0 }
 0xec3   :  { %5672 = vmatpush1.bf16.msra.mxu0 %v7023_v23  ;;  %5704 = vmatpush1.bf16.msra.mxu1 %v7026_v63 }
 0xec4   :  { %5674 = vmatprep.subr.bf16.mxu0 %v7031_v42  ;;  %5706 = vmatprep.subr.bf16.mxu1 %v7033_v10 }
 0xec7   :  { %5676 = vmatpush1.bf16.msra.mxu0 %v7035_v19  ;;  %5708 = vmatpush1.bf16.msra.mxu1 %v7038_v54 }
 0xec8   :  { %5678 = vmatprep.subr.bf16.mxu0 %v7043_v33  ;;  %5710 = vmatprep.subr.bf16.mxu1 %v7045_v16 }
 0xecb   :  { %5680 = vmatpush1.bf16.msra.mxu0 %v7047_v36  ;;  %5712 = vmatpush1.bf16.msra.mxu1 %v7050_v17 }
 0xecc   :  { %5682 = vmatprep.subr.bf16.mxu0 %v7054_v12  ;;  %5714 = vmatprep.subr.bf16.mxu1 %v7056_v39 }
 0xecf   :  { %5684 = vmatpush1.bf16.msra.mxu0 %v7059_v62  ;;  %5716 = vmatpush1.bf16.msra.mxu1 %v7063_v28 }
 0xed0   :  { %5686 = vmatprep.subr.bf16.mxu0 %v7065_v60  ;;  %5718 = vmatprep.subr.bf16.mxu1 %v7067_v11 }
 0xed3   :  { %5688 = vmatpush1.bf16.msra.mxu0 %v7070_v41  ;;  %5720 = vmatpush1.bf16.msra.mxu1 %v7074_v6 }
 0xed4   :  { %5690 = vmatprep.subr.bf16.mxu0 %v7076_v32  ;;  %5722 = vmatprep.subr.bf16.mxu1 %v7079_v21 }
 0xed7   :  { %5692 = vmatpush1.bf16.msra.mxu0 %v7082_v8  ;;  %5724 = vmatpush1.bf16.msra.mxu1 %v7086_v40 }
 0xed8   :  { %5694 = vmatprep.subr.bf16.mxu0 %v7091_v29  ;;  %5726 = vmatprep.subr.bf16.mxu1 %v7093_v58  ;;  %v4210_v29 = vld [vmem:[%s7568_s7] sm:$0xff]  ;;  %v4211_v58 = vld [vmem:[%s7568_s7 + $0x8] sm:$0xff] }
 0xedb   :  { %5696 = vmatpush1.bf16.msra.mxu0 %v7095_v45  ;;  %5728 = vmatpush1.bf16.msra.mxu1 %v7098_v53  ;;  %v5730_v45 = vpack.c.bf16 %v4211_v58, %v4210_v29  ;;  %v6324_v53 = vmov 0.0|0.0  }
 0xedc   :  { %5729 = vmatprep.subr.bf16.mxu0 %v6324_v53  ;;  %5753 = vmatprep.subr.bf16.mxu1 %v6324_v53 }
 0xf91   :  { %v3932_v18 = vpop.f32.mrb[28].mxu0  ;;  %v4003_v13 = vpop.f32.mrb[28].mxu1 }
 0xf92   :  { %v5821_v46 = vadd.f32 %v3932_v18, %v7153_v50  ;;  %v3934_v25 = vpop.f32.mrb[29].mxu0  ;;  %v4005_v23 = vpop.f32.mrb[29].mxu1  ;;  %v5837_v33 = vadd.f32 %v4003_v13, %v7168_v34  ;;  %v4310_v18 = vld [vmem:[%s7570_s9 + $0x30] sm:$0xff]  ;;  %v4311_v13 = vld [vmem:[%s7570_s9 + $0x38] sm:$0xff] }
 0xf93   :  { %v5822_v63 = vadd.f32 %v3934_v25, %v7157_v26  ;;  %v5838_v19 = vadd.f32 %v4005_v23, %v7163_v43  ;;  %v4312_v25 = vld [vmem:[%s7570_s9 + $0x40] sm:$0xff]  ;;  %v4313_v23 = vld [vmem:[%s7570_s9 + $0x48] sm:$0xff] }
 0xf94   :  { %v4465_v42 = vmul.f32 -1.442695, %v5821_v46  ;;  %v5763_v46 = vpack.c.bf16 %v4311_v13, %v4310_v18 }
 0xf95   :  { %v4466_v10 = vmul.f32 -1.442695, %v5822_v63  ;;  %v4467_v54 = vmul.f32 -1.442695, %v5838_v19  ;;  %v5766_v63 = vpack.c.bf16 %v4313_v23, %v4312_v25 }
 0xf96   :  { %6142 = vpow2.f32 %v4465_v42  ;;  %v4314_v42 = vld [vmem:[%s7570_s9 + $0x50] sm:$0xff] }
 0xf97   :  { %6144 = vpow2.f32 %v4466_v10  ;;  %v4315_v10 = vld [vmem:[%s7570_s9 + $0x58] sm:$0xff] }
 0xf98   :  { %6146 = vpow2.f32 %v4467_v54  ;;  %v5769_v19 = vpack.c.bf16 %v4315_v10, %v4314_v42  ;;  %v4316_v54 = vld [vmem:[%s7570_s9 + $0x60] sm:$0xff] }
 0xf99   :  { %6148 = vtanh.f32 %v5837_v33  ;;  %v4317_v33 = vld [vmem:[%s7570_s9 + $0x68] sm:$0xff] }
 0xfa0   :  { %v6143_v16 = vpop.eup %6142 }
 0xfa1   :  { %v6145_v36 = vpop.eup %6144  ;;  %v4015_v17 = vadd.f32 1.0, %v6143_v16  ;;  %v5772_v16 = vpack.c.bf16 %v4317_v33, %v4316_v54 }
 0xfa2   :  { %v4021_v12 = vadd.f32 1.0, %v6145_v36  ;;  %v6147_v39 = vpop.eup %6146 }
 0xfa3   :  { %6150 = vrcp.f32 %v4015_v17  ;;  %v6149_v62 = vpop.eup %6148  ;;  %v4028_v41 = vadd.f32 1.0, %v6147_v39 }
 0xfa4   :  { %6152 = vrcp.f32 %v4021_v12 }
 0xfa5   :  { %6154 = vrcp.f32 %v4028_v41 }
 0xfad   :  { %v6151_v28 = vpop.eup %6150 }
 0xfae   :  { %v6153_v60 = vpop.eup %6152  ;;  %v4032_v11 = vmul.f32 %v6151_v28, %v6149_v62 }
 0xfaf   :  { %v4031_v6 = vmul.f32 %v6153_v60, %v7381_v37  ;;  %v6155_v21 = vpop.eup %6154  ;;  %v5757_v37 = vpack.c.bf16 %v4307_v38, %v4306_v35 }
 0xfb1   :  { %v7421_v32 = vadd.f32 %v4032_v11, %v4031_v6 }
 0xfb3   :  { %6156 = vtanh.f32 %v7421_v32 }
 0xfbd   :  { %v6157_v8 = vpop.eup %6156 }
 0xfbe   :  { %v4035_v40 = vmul.f32 %v6157_v8, %v6155_v21 }
 0xfc0   :  { %4105 = vmatmul.mubr.f32.vlgmr.msra.gmra.mrb[30].mxu0 %v4035_v40  ;;  %4176 = vmatmul.mubr.f32.vlgmr.msra.gmra.mrb[30].mxu1 %v4035_v40 }
 0xfc1   :  { %5731 = vmatpush3.bf16.msra.mxu0 %v5730_v45  ;;  %4539 = vmatprep.mubr.msk.f32.mxu0 %vm6325_vm0, %v6323_v0 }
 0xfc2   :  { %5732 = vmatprep.subr.bf16.mxu0 %v6324_v53  ;;  %4574 = vmatprep.mubr.msk.f32.mxu1 %vm6325_vm0, %v6323_v0  ;;  %v4304_v0 = vld [vmem:[%s7570_s9] sm:$0xff] }
 0xfc3   :  { %v5754_v5 = vpack.c.bf16 %v4305_v15, %v4304_v0 }
 0xfc5   :  { %5734 = vmatpush3.bf16.msra.mxu0 %v5733_v61  ;;  %5755 = vmatpush3.bf16.msra.mxu1 %v5754_v5 }
 0xfc6   :  { %5735 = vmatprep.subr.bf16.mxu0 %v6324_v53  ;;  %5756 = vmatprep.subr.bf16.mxu1 %v6324_v53 }
 0xfc9   :  { %5737 = vmatpush3.bf16.msra.mxu0 %v5736_v30  ;;  %5758 = vmatpush3.bf16.msra.mxu1 %v5757_v37  ;;  %v4318_v30 = vld [vmem:[%s7570_s9 + $0x70] sm:$0xff]  ;;  %s6284_s9 = scalar_lea.vmem %s4406_s13, 32 }
 0xfca   :  { %5738 = vmatprep.subr.bf16.mxu0 %v6324_v53  ;;  %5759 = vmatprep.subr.bf16.mxu1 %v6324_v53  ;;  %v5775_v51 = vpack.c.bf16 %v4319_v55, %v4318_v30  ;;  %p6285_p12 = scmp.ne.s32.totalorder %s4406_s13, %s6284_s9  ;;  %p6290_p0 = scmp.lt.s32.totalorder %s6284_s9, %s6284_s9 }
 0xfcc   :  { %p6291_p1 = por %p6290_p0, %p6289_p13 }
 0xfcd   :  { %5740 = vmatpush3.bf16.msra.mxu0 %v5739_v44  ;;  %5761 = vmatpush3.bf16.msra.mxu1 %v5760_v59 }
 0xfce   :  { %5741 = vmatprep.subr.bf16.mxu0 %v6324_v53  ;;  %5762 = vmatprep.subr.bf16.mxu1 %v6324_v53  ;;  %p6292_p2 = pnand %p6291_p1, %p6285_p12 }
 0xfd1   :  { %5743 = vmatpush3.bf16.msra.mxu0 %v5742_v49  ;;  %5764 = vmatpush3.bf16.msra.mxu1 %v5763_v46 }
 0xfd2   :  { %5744 = vmatprep.subr.bf16.mxu0 %v6324_v53  ;;  %5765 = vmatprep.subr.bf16.mxu1 %v6324_v53 }
 0xfd5   :  { %5746 = vmatpush3.bf16.msra.mxu0 %v5745_v4  ;;  %5767 = vmatpush3.bf16.msra.mxu1 %v5766_v63 }
 0xfd6   :  { %5747 = vmatprep.subr.bf16.mxu0 %v6324_v53  ;;  %5768 = vmatprep.subr.bf16.mxu1 %v6324_v53 }
 0xfd9   :  { %5749 = vmatpush3.bf16.msra.mxu0 %v5748_v22  ;;  %5770 = vmatpush3.bf16.msra.mxu1 %v5769_v19 }
 0xfda   :  { %5750 = vmatprep.subr.bf16.mxu0 %v6324_v53  ;;  %5771 = vmatprep.subr.bf16.mxu1 %v6324_v53 }
 0xfdd   :  { %5752 = vmatpush3.bf16.msra.mxu0 %v5751_v9  ;;  %5773 = vmatpush3.bf16.msra.mxu1 %v5772_v16 }
 0xfde   :  { %5774 = vmatprep.subr.bf16.mxu1 %v6324_v53 }
 0xfe1   :  { %5776 = vmatpush3.bf16.msra.mxu1 %v5775_v51 }
0x1093   :  { %v4106_v36 = vpop.f32.mrb[30].mxu0  ;;  %v4177_v17 = vpop.f32.mrb[30].mxu1 }
0x1094   :  { %v5823_v12 = vadd.f32 %v4106_v36, %v7153_v50  ;;  %v4108_v39 = vpop.f32.mrb[31].mxu0  ;;  %v4179_v62 = vpop.f32.mrb[31].mxu1  ;;  %v5839_v21 = vadd.f32 %v4177_v17, %v7168_v34 }
0x1095   :  { %v5824_v28 = vadd.f32 %v4108_v39, %v7157_v26  ;;  %v5840_v41 = vadd.f32 %v4179_v62, %v7163_v43 }
0x1096   :  { %v4468_v60 = vmul.f32 -1.442695, %v5823_v12 }
0x1097   :  { %v4469_v11 = vmul.f32 -1.442695, %v5824_v28  ;;  %v4470_v6 = vmul.f32 -1.442695, %v5840_v41 }
0x1098   :  { %6158 = vpow2.f32 %v4468_v60 }
0x1099   :  { %6160 = vpow2.f32 %v4469_v11 }
0x109a   :  { %6162 = vpow2.f32 %v4470_v6 }
0x109b   :  { %6164 = vtanh.f32 %v5839_v21 }
0x10a2   :  { %v6159_v8 = vpop.eup %6158 }
0x10a3   :  { %v6161_v40 = vpop.eup %6160  ;;  %v4189_v29 = vadd.f32 1.0, %v6159_v8 }
0x10a4   :  { %v4195_v58 = vadd.f32 1.0, %v6161_v40  ;;  %v6163_v50 = vpop.eup %6162 }
0x10a5   :  { %6166 = vrcp.f32 %v4189_v29  ;;  %v6165_v45 = vpop.eup %6164  ;;  %v4202_v47 = vadd.f32 1.0, %v6163_v50 }
0x10a6   :  { %6168 = vrcp.f32 %v4195_v58 }
0x10a7   :  { %6170 = vrcp.f32 %v4202_v47 }
0x10af   :  { %v6167_v26 = vpop.eup %6166 }
0x10b0   :  { %v6169_v53 = vpop.eup %6168  ;;  %v4206_v20 = vmul.f32 %v6167_v26, %v6165_v45 }
0x10b1   :  { %v4205_v61 = vmul.f32 %v6169_v53, %v7421_v32  ;;  %v6171_v34 = vpop.eup %6170  ;;  %v4471_v32 = vld [vmem:[%s7569_s8] ss:$0 sm:$0xff] }
0x10b3   :  { %v4207_v43 = vadd.f32 %v4206_v20, %v4205_v61 }
0x10b5   :  { %6172 = vtanh.f32 %v4207_v43 }
0x10bf   :  { %v6173_v27 = vpop.eup %6172 }
0x10c0   :  { %v4209_v52 = vmul.f32 %v6173_v27, %v6171_v34 }
0x10c2   :  { %4540 = vmatmul.mubr.f32.vlgmr.msra.gmra.mrb[32].mxu0 %v4209_v52 }
0x1195   :  { %v4299_v44 = vpop.f32.mrb[32].mxu0 }
0x1196   :  { %v4300_v57 = vadd.f32 %v4471_v32, %v4299_v44  ;;  %v4541_v56 = vpop.f32.mrb[33].mxu0 }
0x1198   :  { %v4303_v49 = vmax.f32 %v4300_v57, 0.0 }
0x119a   :  { %4575 = vmatmul.mubr.f32.vlgmr.msra.gmra.mrb[32].mxu1 %v4303_v49 }
0x126d   :  { %v4393_v48 = vpop.f32.mrb[32].mxu1 }
0x126e   :  { %v4394_v3 = vadd.f32 %v4472_v2, %v4393_v48  ;;  %v4576_v4 = vpop.f32.mrb[33].mxu1 }
0x1270   :  { %4398 = vst.msk [vmem:[#allocation13] sm:$0x3] %vm4397_vm1, %v4394_v3 }
0x1271   :  { %6295 = shalt.err (!%p6292_p2)
}
0x1272   :  { %s6296_s20 = scalar_lea.hbm %s7572_s11, 32 }
0x1273   :  { %p6297_p3 = scmp.ne.s32.totalorder %s7572_s11, %s6296_s20  ;;  %p6300_p4 = scmp.lt.u32.totalorder %s6296_s20, %s7572_s11 }
0x1275   :  { %p6302_p5 = pnand %p6300_p4, %p6297_p3 }
0x1277   :  { %6305 = shalt.err (!%p6302_p5)
}
0x1278   :  { %4408 = dma.vmem_to_hbm [thread:$0]  %s4406_s13, 32, %s7572_s11, [#allocation6]  }
0x1279   :  { %6312 = dma.done.wait [#allocation6], 32  }
0x127a   :  { %6313 = vsyncadd [#allocation6], 4294967264 }
0x127b   :  { %4412 = vsyncpa [#allocation5], 1 }
0x127c   :  { %4413 = vsyncpa [#allocation8], 1 }
0x127d   :  { %4414 = vsyncpa [#allocation11], 1 }
0x127e   :  { %4415 = vsyncpa [#allocation6], 1 }

</bundles_post_ra>
